<compile_context>
chip_gen: v7x
topology: tpu7x:2x2x1
jax: 0.10.0
libtpu: 0.0.40
codegen_flags: <defaults>
</compile_context>

<pallas_src>
import functools

import numpy as np

import jax
import jax.numpy as jnp
from jax.experimental import pallas as pl
from jax.experimental.pallas import tpu as pltpu  # noqa: F401  (TPU backend)

EPS = 1e-5


# ----------------------------------------------------------------------------
# One-time parameter lowering (hoisted out of the per-forward path)
# ----------------------------------------------------------------------------
def _conv_mats(w_oihw, wp_in, w_out, pad_out, wbuf_out):
    """Lower a stride-2 conv weight (OC, IC, KH, KW) to KH dense matrices of
    shape (IC*wp_in, OC*wbuf_out).  Row index = ic*wp_in + (padded input w),
    column index = oc*wbuf_out + (ow + pad_out), i.e. the stride-2 W gather and
    the channel contraction are fused into a single matmul operand, and the
    output columns are pre-shifted so results drop straight into the next
    layer's zero-padded row buffer."""
    oc, ic, kh, kw = w_oihw.shape
    mats = np.zeros((kh, ic * wp_in, oc * wbuf_out), np.float32)
    for i in range(kh):
        for j in range(kw):
            for ow in range(w_out):
                w_in = 2 * ow + j                      # padded input w coord
                rows = np.arange(ic) * wp_in + w_in
                cols = np.arange(oc) * wbuf_out + ow + pad_out
                mats[i][np.ix_(rows, cols)] = w_oihw[:, :, i, j].T
    return mats


def _bn_fold(g, b, m, v):
    s = g / np.sqrt(v + EPS)
    return s, b - m * s


def _col_vector(per_ch, w_out, pad_out, wbuf_out):
    """Broadcast a per-channel value to per-output-column, zero at padding."""
    oc = per_ch.shape[0]
    col = np.zeros((oc, wbuf_out), np.float32)
    col[:, pad_out:pad_out + w_out] = per_ch[:, None]
    return col.reshape(-1)


def prepare_ops(params):
    """Precompute all kernel operands from the PyTorch-style parameters.
    Called once per parameter set (weight lowering is NOT in the fwd path)."""
    p = {k: np.asarray(v, np.float32) for k, v in params.items()}
    ops = {}

    # layer 1: relu(bn1(conv1(x)))  -- padded in W=54, out 26, next pad 2 -> buf 30
    s1, t1 = _bn_fold(p["bn1_g"], p["bn1_b"], p["bn1_m"], p["bn1_v"])
    ops["m1"] = _conv_mats(p["conv1_w"], 54, 26, 2, 30)
    ops["ss1"] = np.stack([_col_vector(s1, 26, 2, 30),
                           _col_vector(p["conv1_b"] * s1 + t1, 26, 2, 30)])

    # layer 2: relu(bn3(conv3(x)))  -- buf in W=30, out 14, next pad 0 -> buf 14
    s3, t3 = _bn_fold(p["bn3_g"], p["bn3_b"], p["bn3_m"], p["bn3_v"])
    ops["m2"] = _conv_mats(p["conv3_w"], 30, 14, 0, 14)
    ops["ss2"] = np.stack([_col_vector(s3, 14, 0, 14),
                           _col_vector(p["conv3_b"] * s3 + t3, 14, 0, 14)])

    # layer 3: dropout(bn4(relu(conv4(x)))) -- bias kept separate (relu between)
    s4, t4 = _bn_fold(p["bn4_g"], p["bn4_b"], p["bn4_m"], p["bn4_v"])
    ops["m3"] = _conv_mats(p["conv4_w"], 14, 6, 0, 6)
    ops["bss3"] = np.stack([np.repeat(p["conv4_b"], 6),
                            np.repeat(s4, 6),
                            np.repeat(t4, 6)]).astype(np.float32)

    # fc1: fold PyTorch's (C,H,W) flatten order into a (6, 48, 100) weight so
    # the kernel can consume the (oh, oc*6+ow) conv4 slab without a transpose.
    ops["w1p"] = (p["fc1_w"].reshape(100, 8, 6, 6)
                  .transpose(2, 1, 3, 0).reshape(6, 48, 100))
    ops["b1"] = p["fc1_b"].reshape(1, 100)
    ops["w2"] = p["fc2_w"].T.copy()            # (100, 1)
    ops["b2"] = p["fc2_b"].reshape(1, 1)
    return {k: jnp.asarray(v, jnp.float32) for k, v in ops.items()}


# ----------------------------------------------------------------------------
# The single fused Pallas kernel
# ----------------------------------------------------------------------------
def _net_kernel(xp_ref, m1_ref, ss1_ref, m2_ref, ss2_ref, m3_ref, bss3_ref,
                w1p_ref, b1_ref, w2_ref, b2_ref, o_ref, *, batch):
    f32 = jnp.float32

    def row_select(oh, hp, kh):
        # 0/1 matrices selecting input rows (2*oh + i); gather done on the MXU.
        r = jax.lax.broadcasted_iota(jnp.int32, (oh, hp), 0)
        c = jax.lax.broadcasted_iota(jnp.int32, (oh, hp), 1)
        return [(c == 2 * r + i).astype(f32) for i in range(kh)]

    sel1 = row_select(26, 54, 4)
    sel2 = row_select(14, 30, 4)
    sel3 = row_select(6, 14, 3)

    def conv_block(p, sels, m_ref):
        acc = None
        for i, s in enumerate(sels):
            rows = jnp.dot(s, p, preferred_element_type=f32)        # row gather
            term = jnp.dot(rows, m_ref[i], preferred_element_type=f32)
            acc = term if acc is None else acc + term
        return acc

    zrows = jnp.zeros((2, 240), f32)      # H-padding rows for layer 2's input

    for n in range(batch):                # small static batch -> unrolled
        # ---- layer 1: relu(bn1(conv1)) ------------------------------------
        p1 = xp_ref[n]                                          # (54, 162)
        a1 = conv_block(p1, sel1, m1_ref)                       # (26, 240)
        y1 = jnp.maximum(a1 * ss1_ref[0:1, :] + ss1_ref[1:2, :], 0.0)

        # ---- layer 2: relu(bn3(conv3)) ------------------------------------
        p2 = jnp.concatenate([zrows, y1, zrows], axis=0)        # (30, 240)
        a2 = conv_block(p2, sel2, m2_ref)                       # (14, 112)
        y2 = jnp.maximum(a2 * ss2_ref[0:1, :] + ss2_ref[1:2, :], 0.0)

        # ---- layer 3: bn4(relu(conv4)); dropout(p=0.1) is identity in eval -
        # TODO(synk): training-mode stochastic dropout is not implemented.
        a3 = conv_block(y2, sel3, m3_ref)                       # (6, 48)
        y3 = (jnp.maximum(a3 + bss3_ref[0:1, :], 0.0)
              * bss3_ref[1:2, :] + bss3_ref[2:3, :])

        # ---- fc1 + relu (flatten folded into permuted weight) --------------
        h = None
        for oh in range(6):
            t = jnp.dot(y3[oh:oh + 1, :], w1p_ref[oh],
                        preferred_element_type=f32)             # (1, 100)
            h = t if h is None else h + t
        h = jnp.maximum(h + b1_ref[...], 0.0)

        # ---- fc2 + sigmoid --------------------------------------------------
        z = jnp.dot(h, w2_ref[...], preferred_element_type=f32) + b2_ref[...]
        o_ref[pl.ds(n, 1), :] = pl.reciprocal(1.0 + jnp.exp(-z), approx=False)


# ----------------------------------------------------------------------------
# Forward pass: one cheap XLA input-prep step + a single pallas_call
# ----------------------------------------------------------------------------
@jax.jit
def net_forward(x, ops):
    n = x.shape[0]
    assert x.shape[1:] == (3, 50, 50), x.shape   # fc1(288) implies 50x50 input

    # NCHW -> (N, H, C, W), pad H/W by 2, flatten to (N, 54, 3*54) row slabs.
    xt = jnp.transpose(x.astype(jnp.float32), (0, 2, 1, 3))
    xp = jnp.pad(xt, ((0, 0), (2, 2), (0, 0), (2, 2)))
    x_pre = xp.reshape(n, 54, 3 * 54)

    args = (x_pre, ops["m1"], ops["ss1"], ops["m2"], ops["ss2"], ops["m3"],
            ops["bss3"], ops["w1p"], ops["b1"], ops["w2"], ops["b2"])

    return pl.pallas_call(
        functools.partial(_net_kernel, batch=n),
        out_shape=jax.ShapeDtypeStruct((n, 1), jnp.float32),
        grid=(1,),
        in_specs=[pl.BlockSpec(a.shape, (lambda i, _nd=a.ndim: (0,) * _nd))
                  for a in args],
        out_specs=pl.BlockSpec((n, 1), lambda i: (0, 0)),
    )(*args)


# ----------------------------------------------------------------------------
# Pure-JAX reference (lax.conv) for correctness checking
# ----------------------------------------------------------------------------
def reference_forward(x, p):
    def conv(x, w, b, stride, pad):
        y = jax.lax.conv_general_dilated(
            x, w, (stride, stride), [(pad, pad), (pad, pad)],
            dimension_numbers=("NCHW", "OIHW", "NCHW"))
        return y + b[None, :, None, None]

    def bn(x, g, b_, m, v):
        return (x - m[None, :, None, None]) / jnp.sqrt(
            v[None, :, None, None] + EPS) * g[None, :, None, None] + \
            b_[None, :, None, None]

    x = jax.nn.relu(bn(conv(x, p["conv1_w"], p["conv1_b"], 2, 2),
                       p["bn1_g"], p["bn1_b"], p["bn1_m"], p["bn1_v"]))
    x = jax.nn.relu(bn(conv(x, p["conv3_w"], p["conv3_b"], 2, 2),
                       p["bn3_g"], p["bn3_b"], p["bn3_m"], p["bn3_v"]))
    x = bn(jax.nn.relu(conv(x, p["conv4_w"], p["conv4_b"], 2, 0)),
           p["bn4_g"], p["bn4_b"], p["bn4_m"], p["bn4_v"])
    x = x.reshape(x.shape[0], -1)
    x = jax.nn.relu(x @ p["fc1_w"].T + p["fc1_b"])
    x = x @ p["fc2_w"].T + p["fc2_b"]
    return jax.nn.sigmoid(x)


# ----------------------------------------------------------------------------
# Deterministic parameter construction (PyTorch-style uniform fan-in init)
# ----------------------------------------------------------------------------
def make_params(key):
    ks = list(jax.random.split(key, 24))

    def unif(k, shape, fan_in):
        bound = 1.0 / (fan_in ** 0.5)
        return jax.random.uniform(k, shape, jnp.float32, -bound, bound)

    p = {}
    p["conv1_w"] = unif(ks[0], (8, 3, 4, 4), 3 * 16)
    p["conv1_b"] = unif(ks[1], (8,), 3 * 16)
    p["conv3_w"] = unif(ks[2], (8, 8, 4, 4), 8 * 16)
    p["conv3_b"] = unif(ks[3], (8,), 8 * 16)
    p["conv4_w"] = unif(ks[4], (8, 8, 3, 3), 8 * 9)
    p["conv4_b"] = unif(ks[5], (8,), 8 * 9)
    for i, name in enumerate(["bn1", "bn3", "bn4"]):
        p[f"{name}_g"] = 1.0 + 0.1 * jax.random.normal(ks[6 + 4 * i], (8,))
        p[f"{name}_b"] = 0.1 * jax.random.normal(ks[7 + 4 * i], (8,))
        p[f"{name}_m"] = 0.1 * jax.random.normal(ks[8 + 4 * i], (8,))
        p[f"{name}_v"] = 0.5 + jnp.abs(jax.random.normal(ks[9 + 4 * i], (8,)))
    p["fc1_w"] = unif(ks[18], (100, 288), 288)
    p["fc1_b"] = unif(ks[19], (100,), 288)
    p["fc2_w"] = unif(ks[20], (1, 100), 100)
    p["fc2_b"] = unif(ks[21], (1,), 100)
    return p


if __name__ == "__main__":
    key = jax.random.PRNGKey(0)
    k_x, k_p = jax.random.split(key)
    # fc1 expects 288 = 8*6*6 flat features -> input spatial must be 50x50
    # (3x50x50 -> conv1 26x26 -> conv3 14x14 -> conv4 6x6).
    x = jax.random.normal(k_x, (2, 3, 50, 50), jnp.float32)
    params = make_params(k_p)

    ops = prepare_ops(params)          # one-time weight lowering (hoisted)

    out = jax.block_until_ready(net_forward(x, ops))
    ref = jax.block_until_ready(reference_forward(x, params))

    assert out.shape == (2, 1), out.shape
    assert jnp.allclose(out, ref, atol=2e-4, rtol=2e-4), (out, ref)
    print("KERNEL_OK")
</pallas_src>

<mosaic_0001>
module attributes {stable_mosaic.version = 11 : i64} {
  func.func @_net_kernel(%arg0: i32, %arg1: memref<2x54x162xf32, #tpu.memory_space<vmem>>, %arg2: memref<4x162x240xf32, #tpu.memory_space<vmem>>, %arg3: memref<2x240xf32, #tpu.memory_space<vmem>>, %arg4: memref<4x240x112xf32, #tpu.memory_space<vmem>>, %arg5: memref<2x112xf32, #tpu.memory_space<vmem>>, %arg6: memref<3x112x48xf32, #tpu.memory_space<vmem>>, %arg7: memref<3x48xf32, #tpu.memory_space<vmem>>, %arg8: memref<6x48x100xf32, #tpu.memory_space<vmem>>, %arg9: memref<1x100xf32, #tpu.memory_space<vmem>>, %arg10: memref<100x1xf32, #tpu.memory_space<vmem>>, %arg11: memref<1x1xf32, #tpu.memory_space<vmem>>, %arg12: memref<2x1xf32, #tpu.memory_space<vmem>>) attributes {dimension_semantics = [#tpu.dimension_semantics<arbitrary>], iteration_bounds = array<i64: 1>, scalar_prefetch = 0 : i64, scratch_operands = 0 : i64, tpu.core_type = #tpu.core_type<tc>, window_params = [{pipeline_mode = #tpu.pipeline_mode<synchronous>, transform_indices = @transform_0, window_bounds = array<i64: 2, 54, 162>}, {pipeline_mode = #tpu.pipeline_mode<synchronous>, transform_indices = @transform_1, window_bounds = array<i64: 4, 162, 240>}, {pipeline_mode = #tpu.pipeline_mode<synchronous>, transform_indices = @transform_2, window_bounds = array<i64: 2, 240>}, {pipeline_mode = #tpu.pipeline_mode<synchronous>, transform_indices = @transform_3, window_bounds = array<i64: 4, 240, 112>}, {pipeline_mode = #tpu.pipeline_mode<synchronous>, transform_indices = @transform_4, window_bounds = array<i64: 2, 112>}, {pipeline_mode = #tpu.pipeline_mode<synchronous>, transform_indices = @transform_5, window_bounds = array<i64: 3, 112, 48>}, {pipeline_mode = #tpu.pipeline_mode<synchronous>, transform_indices = @transform_6, window_bounds = array<i64: 3, 48>}, {pipeline_mode = #tpu.pipeline_mode<synchronous>, transform_indices = @transform_7, window_bounds = array<i64: 6, 48, 100>}, {pipeline_mode = #tpu.pipeline_mode<synchronous>, transform_indices = @transform_8, window_bounds = array<i64: 1, 100>}, {pipeline_mode = #tpu.pipeline_mode<synchronous>, transform_indices = @transform_9, window_bounds = array<i64: 100, 1>}, {pipeline_mode = #tpu.pipeline_mode<synchronous>, transform_indices = @transform_10, window_bounds = array<i64: 1, 1>}, {pipeline_mode = #tpu.pipeline_mode<synchronous>, transform_indices = @transform_11, window_bounds = array<i64: 2, 1>}]} {
    %0 = tpu.iota {dimensions = array<i32: 0>} : vector<26x54xi32>
    %1 = tpu.iota {dimensions = array<i32: 1>} : vector<26x54xi32>
    %c2_i32 = arith.constant 2 : i32
    %2 = vector.broadcast %c2_i32 : i32 to vector<26x54xi32>
    %3 = arith.muli %2, %0 : vector<26x54xi32>
    %c0_i32 = arith.constant 0 : i32
    %4 = vector.broadcast %c0_i32 : i32 to vector<26x54xi32>
    %5 = arith.addi %3, %4 : vector<26x54xi32>
    %6 = arith.cmpi eq, %1, %5 : vector<26x54xi32>
    %7 = arith.extui %6 : vector<26x54xi1> to vector<26x54xi32>
    %8 = arith.sitofp %7 : vector<26x54xi32> to vector<26x54xf32>
    %c2_i32_0 = arith.constant 2 : i32
    %9 = vector.broadcast %c2_i32_0 : i32 to vector<26x54xi32>
    %10 = arith.muli %9, %0 : vector<26x54xi32>
    %c1_i32 = arith.constant 1 : i32
    %11 = vector.broadcast %c1_i32 : i32 to vector<26x54xi32>
    %12 = arith.addi %10, %11 : vector<26x54xi32>
    %13 = arith.cmpi eq, %1, %12 : vector<26x54xi32>
    %14 = arith.extui %13 : vector<26x54xi1> to vector<26x54xi32>
    %15 = arith.sitofp %14 : vector<26x54xi32> to vector<26x54xf32>
    %c2_i32_1 = arith.constant 2 : i32
    %16 = vector.broadcast %c2_i32_1 : i32 to vector<26x54xi32>
    %17 = arith.muli %16, %0 : vector<26x54xi32>
    %c2_i32_2 = arith.constant 2 : i32
    %18 = vector.broadcast %c2_i32_2 : i32 to vector<26x54xi32>
    %19 = arith.addi %17, %18 : vector<26x54xi32>
    %20 = arith.cmpi eq, %1, %19 : vector<26x54xi32>
    %21 = arith.extui %20 : vector<26x54xi1> to vector<26x54xi32>
    %22 = arith.sitofp %21 : vector<26x54xi32> to vector<26x54xf32>
    %c2_i32_3 = arith.constant 2 : i32
    %23 = vector.broadcast %c2_i32_3 : i32 to vector<26x54xi32>
    %24 = arith.muli %23, %0 : vector<26x54xi32>
    %c3_i32 = arith.constant 3 : i32
    %25 = vector.broadcast %c3_i32 : i32 to vector<26x54xi32>
    %26 = arith.addi %24, %25 : vector<26x54xi32>
    %27 = arith.cmpi eq, %1, %26 : vector<26x54xi32>
    %28 = arith.extui %27 : vector<26x54xi1> to vector<26x54xi32>
    %29 = arith.sitofp %28 : vector<26x54xi32> to vector<26x54xf32>
    %30 = tpu.iota {dimensions = array<i32: 0>} : vector<14x30xi32>
    %31 = tpu.iota {dimensions = array<i32: 1>} : vector<14x30xi32>
    %c2_i32_4 = arith.constant 2 : i32
    %32 = vector.broadcast %c2_i32_4 : i32 to vector<14x30xi32>
    %33 = arith.muli %32, %30 : vector<14x30xi32>
    %c0_i32_5 = arith.constant 0 : i32
    %34 = vector.broadcast %c0_i32_5 : i32 to vector<14x30xi32>
    %35 = arith.addi %33, %34 : vector<14x30xi32>
    %36 = arith.cmpi eq, %31, %35 : vector<14x30xi32>
    %37 = arith.extui %36 : vector<14x30xi1> to vector<14x30xi32>
    %38 = arith.sitofp %37 : vector<14x30xi32> to vector<14x30xf32>
    %c2_i32_6 = arith.constant 2 : i32
    %39 = vector.broadcast %c2_i32_6 : i32 to vector<14x30xi32>
    %40 = arith.muli %39, %30 : vector<14x30xi32>
    %c1_i32_7 = arith.constant 1 : i32
    %41 = vector.broadcast %c1_i32_7 : i32 to vector<14x30xi32>
    %42 = arith.addi %40, %41 : vector<14x30xi32>
    %43 = arith.cmpi eq, %31, %42 : vector<14x30xi32>
    %44 = arith.extui %43 : vector<14x30xi1> to vector<14x30xi32>
    %45 = arith.sitofp %44 : vector<14x30xi32> to vector<14x30xf32>
    %c2_i32_8 = arith.constant 2 : i32
    %46 = vector.broadcast %c2_i32_8 : i32 to vector<14x30xi32>
    %47 = arith.muli %46, %30 : vector<14x30xi32>
    %c2_i32_9 = arith.constant 2 : i32
    %48 = vector.broadcast %c2_i32_9 : i32 to vector<14x30xi32>
    %49 = arith.addi %47, %48 : vector<14x30xi32>
    %50 = arith.cmpi eq, %31, %49 : vector<14x30xi32>
    %51 = arith.extui %50 : vector<14x30xi1> to vector<14x30xi32>
    %52 = arith.sitofp %51 : vector<14x30xi32> to vector<14x30xf32>
    %c2_i32_10 = arith.constant 2 : i32
    %53 = vector.broadcast %c2_i32_10 : i32 to vector<14x30xi32>
    %54 = arith.muli %53, %30 : vector<14x30xi32>
    %c3_i32_11 = arith.constant 3 : i32
    %55 = vector.broadcast %c3_i32_11 : i32 to vector<14x30xi32>
    %56 = arith.addi %54, %55 : vector<14x30xi32>
    %57 = arith.cmpi eq, %31, %56 : vector<14x30xi32>
    %58 = arith.extui %57 : vector<14x30xi1> to vector<14x30xi32>
    %59 = arith.sitofp %58 : vector<14x30xi32> to vector<14x30xf32>
    %60 = tpu.iota {dimensions = array<i32: 0>} : vector<6x14xi32>
    %61 = tpu.iota {dimensions = array<i32: 1>} : vector<6x14xi32>
    %c2_i32_12 = arith.constant 2 : i32
    %62 = vector.broadcast %c2_i32_12 : i32 to vector<6x14xi32>
    %63 = arith.muli %62, %60 : vector<6x14xi32>
    %c0_i32_13 = arith.constant 0 : i32
    %64 = vector.broadcast %c0_i32_13 : i32 to vector<6x14xi32>
    %65 = arith.addi %63, %64 : vector<6x14xi32>
    %66 = arith.cmpi eq, %61, %65 : vector<6x14xi32>
    %67 = arith.extui %66 : vector<6x14xi1> to vector<6x14xi32>
    %68 = arith.sitofp %67 : vector<6x14xi32> to vector<6x14xf32>
    %c2_i32_14 = arith.constant 2 : i32
    %69 = vector.broadcast %c2_i32_14 : i32 to vector<6x14xi32>
    %70 = arith.muli %69, %60 : vector<6x14xi32>
    %c1_i32_15 = arith.constant 1 : i32
    %71 = vector.broadcast %c1_i32_15 : i32 to vector<6x14xi32>
    %72 = arith.addi %70, %71 : vector<6x14xi32>
    %73 = arith.cmpi eq, %61, %72 : vector<6x14xi32>
    %74 = arith.extui %73 : vector<6x14xi1> to vector<6x14xi32>
    %75 = arith.sitofp %74 : vector<6x14xi32> to vector<6x14xf32>
    %c2_i32_16 = arith.constant 2 : i32
    %76 = vector.broadcast %c2_i32_16 : i32 to vector<6x14xi32>
    %77 = arith.muli %76, %60 : vector<6x14xi32>
    %c2_i32_17 = arith.constant 2 : i32
    %78 = vector.broadcast %c2_i32_17 : i32 to vector<6x14xi32>
    %79 = arith.addi %77, %78 : vector<6x14xi32>
    %80 = arith.cmpi eq, %61, %79 : vector<6x14xi32>
    %81 = arith.extui %80 : vector<6x14xi1> to vector<6x14xi32>
    %82 = arith.sitofp %81 : vector<6x14xi32> to vector<6x14xf32>
    %cst = arith.constant 0.000000e+00 : f32
    %83 = vector.broadcast %cst : f32 to vector<2x240xf32>
    %c0 = arith.constant 0 : index
    %c0_18 = arith.constant 0 : index
    %c0_19 = arith.constant 0 : index
    %84 = vector.load %arg1[%c0, %c0_18, %c0_19] : memref<2x54x162xf32, #tpu.memory_space<vmem>>, vector<1x54x162xf32>
    %85 = vector.shape_cast %84 : vector<1x54x162xf32> to vector<54x162xf32>
    %cst_20 = arith.constant dense<0.000000e+00> : vector<26x162xf32>
    %86 = tpu.matmul %8, %85, %cst_20 {dimension_numbers = #tpu.dot_dimension_numbers<[1], [0], [0], [1], [0, 0, 1, 1], [], []>} : vector<26x54xf32>, vector<54x162xf32>, vector<26x162xf32> -> vector<26x162xf32>
    %c0_21 = arith.constant 0 : index
    %c0_22 = arith.constant 0 : index
    %c0_23 = arith.constant 0 : index
    %87 = vector.load %arg2[%c0_21, %c0_22, %c0_23] : memref<4x162x240xf32, #tpu.memory_space<vmem>>, vector<1x162x240xf32>
    %88 = vector.shape_cast %87 : vector<1x162x240xf32> to vector<162x240xf32>
    %cst_24 = arith.constant dense<0.000000e+00> : vector<26x240xf32>
    %89 = tpu.matmul %86, %88, %cst_24 {dimension_numbers = #tpu.dot_dimension_numbers<[1], [0], [0], [1], [0, 0, 1, 1], [], []>} : vector<26x162xf32>, vector<162x240xf32>, vector<26x240xf32> -> vector<26x240xf32>
    %cst_25 = arith.constant dense<0.000000e+00> : vector<26x162xf32>
    %90 = tpu.matmul %15, %85, %cst_25 {dimension_numbers = #tpu.dot_dimension_numbers<[1], [0], [0], [1], [0, 0, 1, 1], [], []>} : vector<26x54xf32>, vector<54x162xf32>, vector<26x162xf32> -> vector<26x162xf32>
    %c1 = arith.constant 1 : index
    %c0_26 = arith.constant 0 : index
    %c0_27 = arith.constant 0 : index
    %91 = vector.load %arg2[%c1, %c0_26, %c0_27] : memref<4x162x240xf32, #tpu.memory_space<vmem>>, vector<1x162x240xf32>
    %92 = vector.shape_cast %91 : vector<1x162x240xf32> to vector<162x240xf32>
    %cst_28 = arith.constant dense<0.000000e+00> : vector<26x240xf32>
    %93 = tpu.matmul %90, %92, %cst_28 {dimension_numbers = #tpu.dot_dimension_numbers<[1], [0], [0], [1], [0, 0, 1, 1], [], []>} : vector<26x162xf32>, vector<162x240xf32>, vector<26x240xf32> -> vector<26x240xf32>
    %94 = arith.addf %89, %93 : vector<26x240xf32>
    %cst_29 = arith.constant dense<0.000000e+00> : vector<26x162xf32>
    %95 = tpu.matmul %22, %85, %cst_29 {dimension_numbers = #tpu.dot_dimension_numbers<[1], [0], [0], [1], [0, 0, 1, 1], [], []>} : vector<26x54xf32>, vector<54x162xf32>, vector<26x162xf32> -> vector<26x162xf32>
    %c2 = arith.constant 2 : index
    %c0_30 = arith.constant 0 : index
    %c0_31 = arith.constant 0 : index
    %96 = vector.load %arg2[%c2, %c0_30, %c0_31] : memref<4x162x240xf32, #tpu.memory_space<vmem>>, vector<1x162x240xf32>
    %97 = vector.shape_cast %96 : vector<1x162x240xf32> to vector<162x240xf32>
    %cst_32 = arith.constant dense<0.000000e+00> : vector<26x240xf32>
    %98 = tpu.matmul %95, %97, %cst_32 {dimension_numbers = #tpu.dot_dimension_numbers<[1], [0], [0], [1], [0, 0, 1, 1], [], []>} : vector<26x162xf32>, vector<162x240xf32>, vector<26x240xf32> -> vector<26x240xf32>
    %99 = arith.addf %94, %98 : vector<26x240xf32>
    %cst_33 = arith.constant dense<0.000000e+00> : vector<26x162xf32>
    %100 = tpu.matmul %29, %85, %cst_33 {dimension_numbers = #tpu.dot_dimension_numbers<[1], [0], [0], [1], [0, 0, 1, 1], [], []>} : vector<26x54xf32>, vector<54x162xf32>, vector<26x162xf32> -> vector<26x162xf32>
    %c3 = arith.constant 3 : index
    %c0_34 = arith.constant 0 : index
    %c0_35 = arith.constant 0 : index
    %101 = vector.load %arg2[%c3, %c0_34, %c0_35] : memref<4x162x240xf32, #tpu.memory_space<vmem>>, vector<1x162x240xf32>
    %102 = vector.shape_cast %101 : vector<1x162x240xf32> to vector<162x240xf32>
    %cst_36 = arith.constant dense<0.000000e+00> : vector<26x240xf32>
    %103 = tpu.matmul %100, %102, %cst_36 {dimension_numbers = #tpu.dot_dimension_numbers<[1], [0], [0], [1], [0, 0, 1, 1], [], []>} : vector<26x162xf32>, vector<162x240xf32>, vector<26x240xf32> -> vector<26x240xf32>
    %104 = arith.addf %99, %103 : vector<26x240xf32>
    %c0_37 = arith.constant 0 : index
    %c0_38 = arith.constant 0 : index
    %105 = vector.load %arg3[%c0_37, %c0_38] : memref<2x240xf32, #tpu.memory_space<vmem>>, vector<1x240xf32>
    %106 = vector.broadcast %105 : vector<1x240xf32> to vector<26x240xf32>
    %107 = arith.mulf %104, %106 : vector<26x240xf32>
    %c1_39 = arith.constant 1 : index
    %c0_40 = arith.constant 0 : index
    %108 = vector.load %arg3[%c1_39, %c0_40] : memref<2x240xf32, #tpu.memory_space<vmem>>, vector<1x240xf32>
    %109 = vector.broadcast %108 : vector<1x240xf32> to vector<26x240xf32>
    %110 = arith.addf %107, %109 : vector<26x240xf32>
    %cst_41 = arith.constant 0.000000e+00 : f32
    %111 = vector.broadcast %cst_41 : f32 to vector<26x240xf32>
    %112 = arith.maximumf %110, %111 : vector<26x240xf32>
    %113 = tpu.concatenate %83, %112, %83 in 0 : vector<2x240xf32>, vector<26x240xf32>, vector<2x240xf32> -> vector<30x240xf32>
    %cst_42 = arith.constant dense<0.000000e+00> : vector<14x240xf32>
    %114 = tpu.matmul %38, %113, %cst_42 {dimension_numbers = #tpu.dot_dimension_numbers<[1], [0], [0], [1], [0, 0, 1, 1], [], []>} : vector<14x30xf32>, vector<30x240xf32>, vector<14x240xf32> -> vector<14x240xf32>
    %c0_43 = arith.constant 0 : index
    %c0_44 = arith.constant 0 : index
    %c0_45 = arith.constant 0 : index
    %115 = vector.load %arg4[%c0_43, %c0_44, %c0_45] : memref<4x240x112xf32, #tpu.memory_space<vmem>>, vector<1x240x112xf32>
    %116 = vector.shape_cast %115 : vector<1x240x112xf32> to vector<240x112xf32>
    %cst_46 = arith.constant dense<0.000000e+00> : vector<14x112xf32>
    %117 = tpu.matmul %114, %116, %cst_46 {dimension_numbers = #tpu.dot_dimension_numbers<[1], [0], [0], [1], [0, 0, 1, 1], [], []>} : vector<14x240xf32>, vector<240x112xf32>, vector<14x112xf32> -> vector<14x112xf32>
    %cst_47 = arith.constant dense<0.000000e+00> : vector<14x240xf32>
    %118 = tpu.matmul %45, %113, %cst_47 {dimension_numbers = #tpu.dot_dimension_numbers<[1], [0], [0], [1], [0, 0, 1, 1], [], []>} : vector<14x30xf32>, vector<30x240xf32>, vector<14x240xf32> -> vector<14x240xf32>
    %c1_48 = arith.constant 1 : index
    %c0_49 = arith.constant 0 : index
    %c0_50 = arith.constant 0 : index
    %119 = vector.load %arg4[%c1_48, %c0_49, %c0_50] : memref<4x240x112xf32, #tpu.memory_space<vmem>>, vector<1x240x112xf32>
    %120 = vector.shape_cast %119 : vector<1x240x112xf32> to vector<240x112xf32>
    %cst_51 = arith.constant dense<0.000000e+00> : vector<14x112xf32>
    %121 = tpu.matmul %118, %120, %cst_51 {dimension_numbers = #tpu.dot_dimension_numbers<[1], [0], [0], [1], [0, 0, 1, 1], [], []>} : vector<14x240xf32>, vector<240x112xf32>, vector<14x112xf32> -> vector<14x112xf32>
    %122 = arith.addf %117, %121 : vector<14x112xf32>
    %cst_52 = arith.constant dense<0.000000e+00> : vector<14x240xf32>
    %123 = tpu.matmul %52, %113, %cst_52 {dimension_numbers = #tpu.dot_dimension_numbers<[1], [0], [0], [1], [0, 0, 1, 1], [], []>} : vector<14x30xf32>, vector<30x240xf32>, vector<14x240xf32> -> vector<14x240xf32>
    %c2_53 = arith.constant 2 : index
    %c0_54 = arith.constant 0 : index
    %c0_55 = arith.constant 0 : index
    %124 = vector.load %arg4[%c2_53, %c0_54, %c0_55] : memref<4x240x112xf32, #tpu.memory_space<vmem>>, vector<1x240x112xf32>
    %125 = vector.shape_cast %124 : vector<1x240x112xf32> to vector<240x112xf32>
    %cst_56 = arith.constant dense<0.000000e+00> : vector<14x112xf32>
    %126 = tpu.matmul %123, %125, %cst_56 {dimension_numbers = #tpu.dot_dimension_numbers<[1], [0], [0], [1], [0, 0, 1, 1], [], []>} : vector<14x240xf32>, vector<240x112xf32>, vector<14x112xf32> -> vector<14x112xf32>
    %127 = arith.addf %122, %126 : vector<14x112xf32>
    %cst_57 = arith.constant dense<0.000000e+00> : vector<14x240xf32>
    %128 = tpu.matmul %59, %113, %cst_57 {dimension_numbers = #tpu.dot_dimension_numbers<[1], [0], [0], [1], [0, 0, 1, 1], [], []>} : vector<14x30xf32>, vector<30x240xf32>, vector<14x240xf32> -> vector<14x240xf32>
    %c3_58 = arith.constant 3 : index
    %c0_59 = arith.constant 0 : index
    %c0_60 = arith.constant 0 : index
    %129 = vector.load %arg4[%c3_58, %c0_59, %c0_60] : memref<4x240x112xf32, #tpu.memory_space<vmem>>, vector<1x240x112xf32>
    %130 = vector.shape_cast %129 : vector<1x240x112xf32> to vector<240x112xf32>
    %cst_61 = arith.constant dense<0.000000e+00> : vector<14x112xf32>
    %131 = tpu.matmul %128, %130, %cst_61 {dimension_numbers = #tpu.dot_dimension_numbers<[1], [0], [0], [1], [0, 0, 1, 1], [], []>} : vector<14x240xf32>, vector<240x112xf32>, vector<14x112xf32> -> vector<14x112xf32>
    %132 = arith.addf %127, %131 : vector<14x112xf32>
    %c0_62 = arith.constant 0 : index
    %c0_63 = arith.constant 0 : index
    %133 = vector.load %arg5[%c0_62, %c0_63] : memref<2x112xf32, #tpu.memory_space<vmem>>, vector<1x112xf32>
    %134 = vector.broadcast %133 : vector<1x112xf32> to vector<14x112xf32>
    %135 = arith.mulf %132, %134 : vector<14x112xf32>
    %c1_64 = arith.constant 1 : index
    %c0_65 = arith.constant 0 : index
    %136 = vector.load %arg5[%c1_64, %c0_65] : memref<2x112xf32, #tpu.memory_space<vmem>>, vector<1x112xf32>
    %137 = vector.broadcast %136 : vector<1x112xf32> to vector<14x112xf32>
    %138 = arith.addf %135, %137 : vector<14x112xf32>
    %cst_66 = arith.constant 0.000000e+00 : f32
    %139 = vector.broadcast %cst_66 : f32 to vector<14x112xf32>
    %140 = arith.maximumf %138, %139 : vector<14x112xf32>
    %cst_67 = arith.constant dense<0.000000e+00> : vector<6x112xf32>
    %141 = tpu.matmul %68, %140, %cst_67 {dimension_numbers = #tpu.dot_dimension_numbers<[1], [0], [0], [1], [0, 0, 1, 1], [], []>} : vector<6x14xf32>, vector<14x112xf32>, vector<6x112xf32> -> vector<6x112xf32>
    %c0_68 = arith.constant 0 : index
    %c0_69 = arith.constant 0 : index
    %c0_70 = arith.constant 0 : index
    %142 = vector.load %arg6[%c0_68, %c0_69, %c0_70] : memref<3x112x48xf32, #tpu.memory_space<vmem>>, vector<1x112x48xf32>
    %143 = vector.shape_cast %142 : vector<1x112x48xf32> to vector<112x48xf32>
    %cst_71 = arith.constant dense<0.000000e+00> : vector<6x48xf32>
    %144 = tpu.matmul %141, %143, %cst_71 {dimension_numbers = #tpu.dot_dimension_numbers<[1], [0], [0], [1], [0, 0, 1, 1], [], []>} : vector<6x112xf32>, vector<112x48xf32>, vector<6x48xf32> -> vector<6x48xf32>
    %cst_72 = arith.constant dense<0.000000e+00> : vector<6x112xf32>
    %145 = tpu.matmul %75, %140, %cst_72 {dimension_numbers = #tpu.dot_dimension_numbers<[1], [0], [0], [1], [0, 0, 1, 1], [], []>} : vector<6x14xf32>, vector<14x112xf32>, vector<6x112xf32> -> vector<6x112xf32>
    %c1_73 = arith.constant 1 : index
    %c0_74 = arith.constant 0 : index
    %c0_75 = arith.constant 0 : index
    %146 = vector.load %arg6[%c1_73, %c0_74, %c0_75] : memref<3x112x48xf32, #tpu.memory_space<vmem>>, vector<1x112x48xf32>
    %147 = vector.shape_cast %146 : vector<1x112x48xf32> to vector<112x48xf32>
    %cst_76 = arith.constant dense<0.000000e+00> : vector<6x48xf32>
    %148 = tpu.matmul %145, %147, %cst_76 {dimension_numbers = #tpu.dot_dimension_numbers<[1], [0], [0], [1], [0, 0, 1, 1], [], []>} : vector<6x112xf32>, vector<112x48xf32>, vector<6x48xf32> -> vector<6x48xf32>
    %149 = arith.addf %144, %148 : vector<6x48xf32>
    %cst_77 = arith.constant dense<0.000000e+00> : vector<6x112xf32>
    %150 = tpu.matmul %82, %140, %cst_77 {dimension_numbers = #tpu.dot_dimension_numbers<[1], [0], [0], [1], [0, 0, 1, 1], [], []>} : vector<6x14xf32>, vector<14x112xf32>, vector<6x112xf32> -> vector<6x112xf32>
    %c2_78 = arith.constant 2 : index
    %c0_79 = arith.constant 0 : index
    %c0_80 = arith.constant 0 : index
    %151 = vector.load %arg6[%c2_78, %c0_79, %c0_80] : memref<3x112x48xf32, #tpu.memory_space<vmem>>, vector<1x112x48xf32>
    %152 = vector.shape_cast %151 : vector<1x112x48xf32> to vector<112x48xf32>
    %cst_81 = arith.constant dense<0.000000e+00> : vector<6x48xf32>
    %153 = tpu.matmul %150, %152, %cst_81 {dimension_numbers = #tpu.dot_dimension_numbers<[1], [0], [0], [1], [0, 0, 1, 1], [], []>} : vector<6x112xf32>, vector<112x48xf32>, vector<6x48xf32> -> vector<6x48xf32>
    %154 = arith.addf %149, %153 : vector<6x48xf32>
    %c0_82 = arith.constant 0 : index
    %c0_83 = arith.constant 0 : index
    %155 = vector.load %arg7[%c0_82, %c0_83] : memref<3x48xf32, #tpu.memory_space<vmem>>, vector<1x48xf32>
    %156 = vector.broadcast %155 : vector<1x48xf32> to vector<6x48xf32>
    %157 = arith.addf %154, %156 : vector<6x48xf32>
    %cst_84 = arith.constant 0.000000e+00 : f32
    %158 = vector.broadcast %cst_84 : f32 to vector<6x48xf32>
    %159 = arith.maximumf %157, %158 : vector<6x48xf32>
    %c1_85 = arith.constant 1 : index
    %c0_86 = arith.constant 0 : index
    %160 = vector.load %arg7[%c1_85, %c0_86] : memref<3x48xf32, #tpu.memory_space<vmem>>, vector<1x48xf32>
    %161 = vector.broadcast %160 : vector<1x48xf32> to vector<6x48xf32>
    %162 = arith.mulf %159, %161 : vector<6x48xf32>
    %c2_87 = arith.constant 2 : index
    %c0_88 = arith.constant 0 : index
    %163 = vector.load %arg7[%c2_87, %c0_88] : memref<3x48xf32, #tpu.memory_space<vmem>>, vector<1x48xf32>
    %164 = vector.broadcast %163 : vector<1x48xf32> to vector<6x48xf32>
    %165 = arith.addf %162, %164 : vector<6x48xf32>
    %166 = vector.extract_strided_slice %165 {offsets = [0, 0], sizes = [1, 48], strides = [1, 1]} : vector<6x48xf32> to vector<1x48xf32>
    %c0_89 = arith.constant 0 : index
    %c0_90 = arith.constant 0 : index
    %c0_91 = arith.constant 0 : index
    %167 = vector.load %arg8[%c0_89, %c0_90, %c0_91] : memref<6x48x100xf32, #tpu.memory_space<vmem>>, vector<1x48x100xf32>
    %168 = vector.shape_cast %167 : vector<1x48x100xf32> to vector<48x100xf32>
    %cst_92 = arith.constant dense<0.000000e+00> : vector<1x100xf32>
    %169 = tpu.matmul %166, %168, %cst_92 {dimension_numbers = #tpu.dot_dimension_numbers<[1], [0], [0], [1], [0, 0, 1, 1], [], []>} : vector<1x48xf32>, vector<48x100xf32>, vector<1x100xf32> -> vector<1x100xf32>
    %170 = vector.extract_strided_slice %165 {offsets = [1, 0], sizes = [1, 48], strides = [1, 1]} : vector<6x48xf32> to vector<1x48xf32>
    %c1_93 = arith.constant 1 : index
    %c0_94 = arith.constant 0 : index
    %c0_95 = arith.constant 0 : index
    %171 = vector.load %arg8[%c1_93, %c0_94, %c0_95] : memref<6x48x100xf32, #tpu.memory_space<vmem>>, vector<1x48x100xf32>
    %172 = vector.shape_cast %171 : vector<1x48x100xf32> to vector<48x100xf32>
    %cst_96 = arith.constant dense<0.000000e+00> : vector<1x100xf32>
    %173 = tpu.matmul %170, %172, %cst_96 {dimension_numbers = #tpu.dot_dimension_numbers<[1], [0], [0], [1], [0, 0, 1, 1], [], []>} : vector<1x48xf32>, vector<48x100xf32>, vector<1x100xf32> -> vector<1x100xf32>
    %174 = arith.addf %169, %173 : vector<1x100xf32>
    %175 = vector.extract_strided_slice %165 {offsets = [2, 0], sizes = [1, 48], strides = [1, 1]} : vector<6x48xf32> to vector<1x48xf32>
    %c2_97 = arith.constant 2 : index
    %c0_98 = arith.constant 0 : index
    %c0_99 = arith.constant 0 : index
    %176 = vector.load %arg8[%c2_97, %c0_98, %c0_99] : memref<6x48x100xf32, #tpu.memory_space<vmem>>, vector<1x48x100xf32>
    %177 = vector.shape_cast %176 : vector<1x48x100xf32> to vector<48x100xf32>
    %cst_100 = arith.constant dense<0.000000e+00> : vector<1x100xf32>
    %178 = tpu.matmul %175, %177, %cst_100 {dimension_numbers = #tpu.dot_dimension_numbers<[1], [0], [0], [1], [0, 0, 1, 1], [], []>} : vector<1x48xf32>, vector<48x100xf32>, vector<1x100xf32> -> vector<1x100xf32>
    %179 = arith.addf %174, %178 : vector<1x100xf32>
    %180 = vector.extract_strided_slice %165 {offsets = [3, 0], sizes = [1, 48], strides = [1, 1]} : vector<6x48xf32> to vector<1x48xf32>
    %c3_101 = arith.constant 3 : index
    %c0_102 = arith.constant 0 : index
    %c0_103 = arith.constant 0 : index
    %181 = vector.load %arg8[%c3_101, %c0_102, %c0_103] : memref<6x48x100xf32, #tpu.memory_space<vmem>>, vector<1x48x100xf32>
    %182 = vector.shape_cast %181 : vector<1x48x100xf32> to vector<48x100xf32>
    %cst_104 = arith.constant dense<0.000000e+00> : vector<1x100xf32>
    %183 = tpu.matmul %180, %182, %cst_104 {dimension_numbers = #tpu.dot_dimension_numbers<[1], [0], [0], [1], [0, 0, 1, 1], [], []>} : vector<1x48xf32>, vector<48x100xf32>, vector<1x100xf32> -> vector<1x100xf32>
    %184 = arith.addf %179, %183 : vector<1x100xf32>
    %185 = vector.extract_strided_slice %165 {offsets = [4, 0], sizes = [1, 48], strides = [1, 1]} : vector<6x48xf32> to vector<1x48xf32>
    %c4 = arith.constant 4 : index
    %c0_105 = arith.constant 0 : index
    %c0_106 = arith.constant 0 : index
    %186 = vector.load %arg8[%c4, %c0_105, %c0_106] : memref<6x48x100xf32, #tpu.memory_space<vmem>>, vector<1x48x100xf32>
    %187 = vector.shape_cast %186 : vector<1x48x100xf32> to vector<48x100xf32>
    %cst_107 = arith.constant dense<0.000000e+00> : vector<1x100xf32>
    %188 = tpu.matmul %185, %187, %cst_107 {dimension_numbers = #tpu.dot_dimension_numbers<[1], [0], [0], [1], [0, 0, 1, 1], [], []>} : vector<1x48xf32>, vector<48x100xf32>, vector<1x100xf32> -> vector<1x100xf32>
    %189 = arith.addf %184, %188 : vector<1x100xf32>
    %190 = vector.extract_strided_slice %165 {offsets = [5, 0], sizes = [1, 48], strides = [1, 1]} : vector<6x48xf32> to vector<1x48xf32>
    %c5 = arith.constant 5 : index
    %c0_108 = arith.constant 0 : index
    %c0_109 = arith.constant 0 : index
    %191 = vector.load %arg8[%c5, %c0_108, %c0_109] : memref<6x48x100xf32, #tpu.memory_space<vmem>>, vector<1x48x100xf32>
    %192 = vector.shape_cast %191 : vector<1x48x100xf32> to vector<48x100xf32>
    %cst_110 = arith.constant dense<0.000000e+00> : vector<1x100xf32>
    %193 = tpu.matmul %190, %192, %cst_110 {dimension_numbers = #tpu.dot_dimension_numbers<[1], [0], [0], [1], [0, 0, 1, 1], [], []>} : vector<1x48xf32>, vector<48x100xf32>, vector<1x100xf32> -> vector<1x100xf32>
    %194 = arith.addf %189, %193 : vector<1x100xf32>
    %c0_111 = arith.constant 0 : index
    %c0_112 = arith.constant 0 : index
    %195 = vector.load %arg9[%c0_111, %c0_112] : memref<1x100xf32, #tpu.memory_space<vmem>>, vector<1x100xf32>
    %196 = arith.addf %194, %195 : vector<1x100xf32>
    %cst_113 = arith.constant 0.000000e+00 : f32
    %197 = vector.broadcast %cst_113 : f32 to vector<1x100xf32>
    %198 = arith.maximumf %196, %197 : vector<1x100xf32>
    %c0_114 = arith.constant 0 : index
    %c0_115 = arith.constant 0 : index
    %199 = vector.load %arg10[%c0_114, %c0_115] : memref<100x1xf32, #tpu.memory_space<vmem>>, vector<100x1xf32>
    %cst_116 = arith.constant dense<0.000000e+00> : vector<1x1xf32>
    %200 = tpu.matmul %198, %199, %cst_116 {dimension_numbers = #tpu.dot_dimension_numbers<[1], [0], [0], [1], [0, 0, 1, 1], [], []>} : vector<1x100xf32>, vector<100x1xf32>, vector<1x1xf32> -> vector<1x1xf32>
    %c0_117 = arith.constant 0 : index
    %c0_118 = arith.constant 0 : index
    %201 = vector.load %arg11[%c0_117, %c0_118] : memref<1x1xf32, #tpu.memory_space<vmem>>, vector<1x1xf32>
    %202 = arith.addf %200, %201 : vector<1x1xf32>
    %cst_119 = arith.constant 0.000000e+00 : f32
    %203 = vector.broadcast %cst_119 : f32 to vector<1x1xf32>
    %204 = arith.subf %203, %202 : vector<1x1xf32>
    %205 = math.exp %204 : vector<1x1xf32>
    %cst_120 = arith.constant 1.000000e+00 : f32
    %206 = vector.broadcast %cst_120 : f32 to vector<1x1xf32>
    %207 = arith.addf %206, %205 : vector<1x1xf32>
    %208 = tpu.reciprocal %207 : vector<1x1xf32> -> vector<1x1xf32>
    %c0_121 = arith.constant 0 : index
    %c0_122 = arith.constant 0 : index
    %209 = vector.load %arg12[%c0_121, %c0_122] : memref<2x1xf32, #tpu.memory_space<vmem>>, vector<1x1xf32>
    tpu.vector_store %arg12[%c0_121, %c0_122], %208 {strides = array<i32>} : memref<2x1xf32, #tpu.memory_space<vmem>>, vector<1x1xf32>,
    %c1_123 = arith.constant 1 : index
    %c0_124 = arith.constant 0 : index
    %c0_125 = arith.constant 0 : index
    %210 = vector.load %arg1[%c1_123, %c0_124, %c0_125] : memref<2x54x162xf32, #tpu.memory_space<vmem>>, vector<1x54x162xf32>
    %211 = vector.shape_cast %210 : vector<1x54x162xf32> to vector<54x162xf32>
    %cst_126 = arith.constant dense<0.000000e+00> : vector<26x162xf32>
    %212 = tpu.matmul %8, %211, %cst_126 {dimension_numbers = #tpu.dot_dimension_numbers<[1], [0], [0], [1], [0, 0, 1, 1], [], []>} : vector<26x54xf32>, vector<54x162xf32>, vector<26x162xf32> -> vector<26x162xf32>
    %c0_127 = arith.constant 0 : index
    %c0_128 = arith.constant 0 : index
    %c0_129 = arith.constant 0 : index
    %213 = vector.load %arg2[%c0_127, %c0_128, %c0_129] : memref<4x162x240xf32, #tpu.memory_space<vmem>>, vector<1x162x240xf32>
    %214 = vector.shape_cast %213 : vector<1x162x240xf32> to vector<162x240xf32>
    %cst_130 = arith.constant dense<0.000000e+00> : vector<26x240xf32>
    %215 = tpu.matmul %212, %214, %cst_130 {dimension_numbers = #tpu.dot_dimension_numbers<[1], [0], [0], [1], [0, 0, 1, 1], [], []>} : vector<26x162xf32>, vector<162x240xf32>, vector<26x240xf32> -> vector<26x240xf32>
    %cst_131 = arith.constant dense<0.000000e+00> : vector<26x162xf32>
    %216 = tpu.matmul %15, %211, %cst_131 {dimension_numbers = #tpu.dot_dimension_numbers<[1], [0], [0], [1], [0, 0, 1, 1], [], []>} : vector<26x54xf32>, vector<54x162xf32>, vector<26x162xf32> -> vector<26x162xf32>
    %c1_132 = arith.constant 1 : index
    %c0_133 = arith.constant 0 : index
    %c0_134 = arith.constant 0 : index
    %217 = vector.load %arg2[%c1_132, %c0_133, %c0_134] : memref<4x162x240xf32, #tpu.memory_space<vmem>>, vector<1x162x240xf32>
    %218 = vector.shape_cast %217 : vector<1x162x240xf32> to vector<162x240xf32>
    %cst_135 = arith.constant dense<0.000000e+00> : vector<26x240xf32>
    %219 = tpu.matmul %216, %218, %cst_135 {dimension_numbers = #tpu.dot_dimension_numbers<[1], [0], [0], [1], [0, 0, 1, 1], [], []>} : vector<26x162xf32>, vector<162x240xf32>, vector<26x240xf32> -> vector<26x240xf32>
    %220 = arith.addf %215, %219 : vector<26x240xf32>
    %cst_136 = arith.constant dense<0.000000e+00> : vector<26x162xf32>
    %221 = tpu.matmul %22, %211, %cst_136 {dimension_numbers = #tpu.dot_dimension_numbers<[1], [0], [0], [1], [0, 0, 1, 1], [], []>} : vector<26x54xf32>, vector<54x162xf32>, vector<26x162xf32> -> vector<26x162xf32>
    %c2_137 = arith.constant 2 : index
    %c0_138 = arith.constant 0 : index
    %c0_139 = arith.constant 0 : index
    %222 = vector.load %arg2[%c2_137, %c0_138, %c0_139] : memref<4x162x240xf32, #tpu.memory_space<vmem>>, vector<1x162x240xf32>
    %223 = vector.shape_cast %222 : vector<1x162x240xf32> to vector<162x240xf32>
    %cst_140 = arith.constant dense<0.000000e+00> : vector<26x240xf32>
    %224 = tpu.matmul %221, %223, %cst_140 {dimension_numbers = #tpu.dot_dimension_numbers<[1], [0], [0], [1], [0, 0, 1, 1], [], []>} : vector<26x162xf32>, vector<162x240xf32>, vector<26x240xf32> -> vector<26x240xf32>
    %225 = arith.addf %220, %224 : vector<26x240xf32>
    %cst_141 = arith.constant dense<0.000000e+00> : vector<26x162xf32>
    %226 = tpu.matmul %29, %211, %cst_141 {dimension_numbers = #tpu.dot_dimension_numbers<[1], [0], [0], [1], [0, 0, 1, 1], [], []>} : vector<26x54xf32>, vector<54x162xf32>, vector<26x162xf32> -> vector<26x162xf32>
    %c3_142 = arith.constant 3 : index
    %c0_143 = arith.constant 0 : index
    %c0_144 = arith.constant 0 : index
    %227 = vector.load %arg2[%c3_142, %c0_143, %c0_144] : memref<4x162x240xf32, #tpu.memory_space<vmem>>, vector<1x162x240xf32>
    %228 = vector.shape_cast %227 : vector<1x162x240xf32> to vector<162x240xf32>
    %cst_145 = arith.constant dense<0.000000e+00> : vector<26x240xf32>
    %229 = tpu.matmul %226, %228, %cst_145 {dimension_numbers = #tpu.dot_dimension_numbers<[1], [0], [0], [1], [0, 0, 1, 1], [], []>} : vector<26x162xf32>, vector<162x240xf32>, vector<26x240xf32> -> vector<26x240xf32>
    %230 = arith.addf %225, %229 : vector<26x240xf32>
    %c0_146 = arith.constant 0 : index
    %c0_147 = arith.constant 0 : index
    %231 = vector.load %arg3[%c0_146, %c0_147] : memref<2x240xf32, #tpu.memory_space<vmem>>, vector<1x240xf32>
    %232 = vector.broadcast %231 : vector<1x240xf32> to vector<26x240xf32>
    %233 = arith.mulf %230, %232 : vector<26x240xf32>
    %c1_148 = arith.constant 1 : index
    %c0_149 = arith.constant 0 : index
    %234 = vector.load %arg3[%c1_148, %c0_149] : memref<2x240xf32, #tpu.memory_space<vmem>>, vector<1x240xf32>
    %235 = vector.broadcast %234 : vector<1x240xf32> to vector<26x240xf32>
    %236 = arith.addf %233, %235 : vector<26x240xf32>
    %cst_150 = arith.constant 0.000000e+00 : f32
    %237 = vector.broadcast %cst_150 : f32 to vector<26x240xf32>
    %238 = arith.maximumf %236, %237 : vector<26x240xf32>
    %239 = tpu.concatenate %83, %238, %83 in 0 : vector<2x240xf32>, vector<26x240xf32>, vector<2x240xf32> -> vector<30x240xf32>
    %cst_151 = arith.constant dense<0.000000e+00> : vector<14x240xf32>
    %240 = tpu.matmul %38, %239, %cst_151 {dimension_numbers = #tpu.dot_dimension_numbers<[1], [0], [0], [1], [0, 0, 1, 1], [], []>} : vector<14x30xf32>, vector<30x240xf32>, vector<14x240xf32> -> vector<14x240xf32>
    %c0_152 = arith.constant 0 : index
    %c0_153 = arith.constant 0 : index
    %c0_154 = arith.constant 0 : index
    %241 = vector.load %arg4[%c0_152, %c0_153, %c0_154] : memref<4x240x112xf32, #tpu.memory_space<vmem>>, vector<1x240x112xf32>
    %242 = vector.shape_cast %241 : vector<1x240x112xf32> to vector<240x112xf32>
    %cst_155 = arith.constant dense<0.000000e+00> : vector<14x112xf32>
    %243 = tpu.matmul %240, %242, %cst_155 {dimension_numbers = #tpu.dot_dimension_numbers<[1], [0], [0], [1], [0, 0, 1, 1], [], []>} : vector<14x240xf32>, vector<240x112xf32>, vector<14x112xf32> -> vector<14x112xf32>
    %cst_156 = arith.constant dense<0.000000e+00> : vector<14x240xf32>
    %244 = tpu.matmul %45, %239, %cst_156 {dimension_numbers = #tpu.dot_dimension_numbers<[1], [0], [0], [1], [0, 0, 1, 1], [], []>} : vector<14x30xf32>, vector<30x240xf32>, vector<14x240xf32> -> vector<14x240xf32>
    %c1_157 = arith.constant 1 : index
    %c0_158 = arith.constant 0 : index
    %c0_159 = arith.constant 0 : index
    %245 = vector.load %arg4[%c1_157, %c0_158, %c0_159] : memref<4x240x112xf32, #tpu.memory_space<vmem>>, vector<1x240x112xf32>
    %246 = vector.shape_cast %245 : vector<1x240x112xf32> to vector<240x112xf32>
    %cst_160 = arith.constant dense<0.000000e+00> : vector<14x112xf32>
    %247 = tpu.matmul %244, %246, %cst_160 {dimension_numbers = #tpu.dot_dimension_numbers<[1], [0], [0], [1], [0, 0, 1, 1], [], []>} : vector<14x240xf32>, vector<240x112xf32>, vector<14x112xf32> -> vector<14x112xf32>
    %248 = arith.addf %243, %247 : vector<14x112xf32>
    %cst_161 = arith.constant dense<0.000000e+00> : vector<14x240xf32>
    %249 = tpu.matmul %52, %239, %cst_161 {dimension_numbers = #tpu.dot_dimension_numbers<[1], [0], [0], [1], [0, 0, 1, 1], [], []>} : vector<14x30xf32>, vector<30x240xf32>, vector<14x240xf32> -> vector<14x240xf32>
    %c2_162 = arith.constant 2 : index
    %c0_163 = arith.constant 0 : index
    %c0_164 = arith.constant 0 : index
    %250 = vector.load %arg4[%c2_162, %c0_163, %c0_164] : memref<4x240x112xf32, #tpu.memory_space<vmem>>, vector<1x240x112xf32>
    %251 = vector.shape_cast %250 : vector<1x240x112xf32> to vector<240x112xf32>
    %cst_165 = arith.constant dense<0.000000e+00> : vector<14x112xf32>
    %252 = tpu.matmul %249, %251, %cst_165 {dimension_numbers = #tpu.dot_dimension_numbers<[1], [0], [0], [1], [0, 0, 1, 1], [], []>} : vector<14x240xf32>, vector<240x112xf32>, vector<14x112xf32> -> vector<14x112xf32>
    %253 = arith.addf %248, %252 : vector<14x112xf32>
    %cst_166 = arith.constant dense<0.000000e+00> : vector<14x240xf32>
    %254 = tpu.matmul %59, %239, %cst_166 {dimension_numbers = #tpu.dot_dimension_numbers<[1], [0], [0], [1], [0, 0, 1, 1], [], []>} : vector<14x30xf32>, vector<30x240xf32>, vector<14x240xf32> -> vector<14x240xf32>
    %c3_167 = arith.constant 3 : index
    %c0_168 = arith.constant 0 : index
    %c0_169 = arith.constant 0 : index
    %255 = vector.load %arg4[%c3_167, %c0_168, %c0_169] : memref<4x240x112xf32, #tpu.memory_space<vmem>>, vector<1x240x112xf32>
    %256 = vector.shape_cast %255 : vector<1x240x112xf32> to vector<240x112xf32>
    %cst_170 = arith.constant dense<0.000000e+00> : vector<14x112xf32>
    %257 = tpu.matmul %254, %256, %cst_170 {dimension_numbers = #tpu.dot_dimension_numbers<[1], [0], [0], [1], [0, 0, 1, 1], [], []>} : vector<14x240xf32>, vector<240x112xf32>, vector<14x112xf32> -> vector<14x112xf32>
    %258 = arith.addf %253, %257 : vector<14x112xf32>
    %c0_171 = arith.constant 0 : index
    %c0_172 = arith.constant 0 : index
    %259 = vector.load %arg5[%c0_171, %c0_172] : memref<2x112xf32, #tpu.memory_space<vmem>>, vector<1x112xf32>
    %260 = vector.broadcast %259 : vector<1x112xf32> to vector<14x112xf32>
    %261 = arith.mulf %258, %260 : vector<14x112xf32>
    %c1_173 = arith.constant 1 : index
    %c0_174 = arith.constant 0 : index
    %262 = vector.load %arg5[%c1_173, %c0_174] : memref<2x112xf32, #tpu.memory_space<vmem>>, vector<1x112xf32>
    %263 = vector.broadcast %262 : vector<1x112xf32> to vector<14x112xf32>
    %264 = arith.addf %261, %263 : vector<14x112xf32>
    %cst_175 = arith.constant 0.000000e+00 : f32
    %265 = vector.broadcast %cst_175 : f32 to vector<14x112xf32>
    %266 = arith.maximumf %264, %265 : vector<14x112xf32>
    %cst_176 = arith.constant dense<0.000000e+00> : vector<6x112xf32>
    %267 = tpu.matmul %68, %266, %cst_176 {dimension_numbers = #tpu.dot_dimension_numbers<[1], [0], [0], [1], [0, 0, 1, 1], [], []>} : vector<6x14xf32>, vector<14x112xf32>, vector<6x112xf32> -> vector<6x112xf32>
    %c0_177 = arith.constant 0 : index
    %c0_178 = arith.constant 0 : index
    %c0_179 = arith.constant 0 : index
    %268 = vector.load %arg6[%c0_177, %c0_178, %c0_179] : memref<3x112x48xf32, #tpu.memory_space<vmem>>, vector<1x112x48xf32>
    %269 = vector.shape_cast %268 : vector<1x112x48xf32> to vector<112x48xf32>
    %cst_180 = arith.constant dense<0.000000e+00> : vector<6x48xf32>
    %270 = tpu.matmul %267, %269, %cst_180 {dimension_numbers = #tpu.dot_dimension_numbers<[1], [0], [0], [1], [0, 0, 1, 1], [], []>} : vector<6x112xf32>, vector<112x48xf32>, vector<6x48xf32> -> vector<6x48xf32>
    %cst_181 = arith.constant dense<0.000000e+00> : vector<6x112xf32>
    %271 = tpu.matmul %75, %266, %cst_181 {dimension_numbers = #tpu.dot_dimension_numbers<[1], [0], [0], [1], [0, 0, 1, 1], [], []>} : vector<6x14xf32>, vector<14x112xf32>, vector<6x112xf32> -> vector<6x112xf32>
    %c1_182 = arith.constant 1 : index
    %c0_183 = arith.constant 0 : index
    %c0_184 = arith.constant 0 : index
    %272 = vector.load %arg6[%c1_182, %c0_183, %c0_184] : memref<3x112x48xf32, #tpu.memory_space<vmem>>, vector<1x112x48xf32>
    %273 = vector.shape_cast %272 : vector<1x112x48xf32> to vector<112x48xf32>
    %cst_185 = arith.constant dense<0.000000e+00> : vector<6x48xf32>
    %274 = tpu.matmul %271, %273, %cst_185 {dimension_numbers = #tpu.dot_dimension_numbers<[1], [0], [0], [1], [0, 0, 1, 1], [], []>} : vector<6x112xf32>, vector<112x48xf32>, vector<6x48xf32> -> vector<6x48xf32>
    %275 = arith.addf %270, %274 : vector<6x48xf32>
    %cst_186 = arith.constant dense<0.000000e+00> : vector<6x112xf32>
    %276 = tpu.matmul %82, %266, %cst_186 {dimension_numbers = #tpu.dot_dimension_numbers<[1], [0], [0], [1], [0, 0, 1, 1], [], []>} : vector<6x14xf32>, vector<14x112xf32>, vector<6x112xf32> -> vector<6x112xf32>
    %c2_187 = arith.constant 2 : index
    %c0_188 = arith.constant 0 : index
    %c0_189 = arith.constant 0 : index
    %277 = vector.load %arg6[%c2_187, %c0_188, %c0_189] : memref<3x112x48xf32, #tpu.memory_space<vmem>>, vector<1x112x48xf32>
    %278 = vector.shape_cast %277 : vector<1x112x48xf32> to vector<112x48xf32>
    %cst_190 = arith.constant dense<0.000000e+00> : vector<6x48xf32>
    %279 = tpu.matmul %276, %278, %cst_190 {dimension_numbers = #tpu.dot_dimension_numbers<[1], [0], [0], [1], [0, 0, 1, 1], [], []>} : vector<6x112xf32>, vector<112x48xf32>, vector<6x48xf32> -> vector<6x48xf32>
    %280 = arith.addf %275, %279 : vector<6x48xf32>
    %c0_191 = arith.constant 0 : index
    %c0_192 = arith.constant 0 : index
    %281 = vector.load %arg7[%c0_191, %c0_192] : memref<3x48xf32, #tpu.memory_space<vmem>>, vector<1x48xf32>
    %282 = vector.broadcast %281 : vector<1x48xf32> to vector<6x48xf32>
    %283 = arith.addf %280, %282 : vector<6x48xf32>
    %cst_193 = arith.constant 0.000000e+00 : f32
    %284 = vector.broadcast %cst_193 : f32 to vector<6x48xf32>
    %285 = arith.maximumf %283, %284 : vector<6x48xf32>
    %c1_194 = arith.constant 1 : index
    %c0_195 = arith.constant 0 : index
    %286 = vector.load %arg7[%c1_194, %c0_195] : memref<3x48xf32, #tpu.memory_space<vmem>>, vector<1x48xf32>
    %287 = vector.broadcast %286 : vector<1x48xf32> to vector<6x48xf32>
    %288 = arith.mulf %285, %287 : vector<6x48xf32>
    %c2_196 = arith.constant 2 : index
    %c0_197 = arith.constant 0 : index
    %289 = vector.load %arg7[%c2_196, %c0_197] : memref<3x48xf32, #tpu.memory_space<vmem>>, vector<1x48xf32>
    %290 = vector.broadcast %289 : vector<1x48xf32> to vector<6x48xf32>
    %291 = arith.addf %288, %290 : vector<6x48xf32>
    %292 = vector.extract_strided_slice %291 {offsets = [0, 0], sizes = [1, 48], strides = [1, 1]} : vector<6x48xf32> to vector<1x48xf32>
    %c0_198 = arith.constant 0 : index
    %c0_199 = arith.constant 0 : index
    %c0_200 = arith.constant 0 : index
    %293 = vector.load %arg8[%c0_198, %c0_199, %c0_200] : memref<6x48x100xf32, #tpu.memory_space<vmem>>, vector<1x48x100xf32>
    %294 = vector.shape_cast %293 : vector<1x48x100xf32> to vector<48x100xf32>
    %cst_201 = arith.constant dense<0.000000e+00> : vector<1x100xf32>
    %295 = tpu.matmul %292, %294, %cst_201 {dimension_numbers = #tpu.dot_dimension_numbers<[1], [0], [0], [1], [0, 0, 1, 1], [], []>} : vector<1x48xf32>, vector<48x100xf32>, vector<1x100xf32> -> vector<1x100xf32>
    %296 = vector.extract_strided_slice %291 {offsets = [1, 0], sizes = [1, 48], strides = [1, 1]} : vector<6x48xf32> to vector<1x48xf32>
    %c1_202 = arith.constant 1 : index
    %c0_203 = arith.constant 0 : index
    %c0_204 = arith.constant 0 : index
    %297 = vector.load %arg8[%c1_202, %c0_203, %c0_204] : memref<6x48x100xf32, #tpu.memory_space<vmem>>, vector<1x48x100xf32>
    %298 = vector.shape_cast %297 : vector<1x48x100xf32> to vector<48x100xf32>
    %cst_205 = arith.constant dense<0.000000e+00> : vector<1x100xf32>
    %299 = tpu.matmul %296, %298, %cst_205 {dimension_numbers = #tpu.dot_dimension_numbers<[1], [0], [0], [1], [0, 0, 1, 1], [], []>} : vector<1x48xf32>, vector<48x100xf32>, vector<1x100xf32> -> vector<1x100xf32>
    %300 = arith.addf %295, %299 : vector<1x100xf32>
    %301 = vector.extract_strided_slice %291 {offsets = [2, 0], sizes = [1, 48], strides = [1, 1]} : vector<6x48xf32> to vector<1x48xf32>
    %c2_206 = arith.constant 2 : index
    %c0_207 = arith.constant 0 : index
    %c0_208 = arith.constant 0 : index
    %302 = vector.load %arg8[%c2_206, %c0_207, %c0_208] : memref<6x48x100xf32, #tpu.memory_space<vmem>>, vector<1x48x100xf32>
    %303 = vector.shape_cast %302 : vector<1x48x100xf32> to vector<48x100xf32>
    %cst_209 = arith.constant dense<0.000000e+00> : vector<1x100xf32>
    %304 = tpu.matmul %301, %303, %cst_209 {dimension_numbers = #tpu.dot_dimension_numbers<[1], [0], [0], [1], [0, 0, 1, 1], [], []>} : vector<1x48xf32>, vector<48x100xf32>, vector<1x100xf32> -> vector<1x100xf32>
    %305 = arith.addf %300, %304 : vector<1x100xf32>
    %306 = vector.extract_strided_slice %291 {offsets = [3, 0], sizes = [1, 48], strides = [1, 1]} : vector<6x48xf32> to vector<1x48xf32>
    %c3_210 = arith.constant 3 : index
    %c0_211 = arith.constant 0 : index
    %c0_212 = arith.constant 0 : index
    %307 = vector.load %arg8[%c3_210, %c0_211, %c0_212] : memref<6x48x100xf32, #tpu.memory_space<vmem>>, vector<1x48x100xf32>
    %308 = vector.shape_cast %307 : vector<1x48x100xf32> to vector<48x100xf32>
    %cst_213 = arith.constant dense<0.000000e+00> : vector<1x100xf32>
    %309 = tpu.matmul %306, %308, %cst_213 {dimension_numbers = #tpu.dot_dimension_numbers<[1], [0], [0], [1], [0, 0, 1, 1], [], []>} : vector<1x48xf32>, vector<48x100xf32>, vector<1x100xf32> -> vector<1x100xf32>
    %310 = arith.addf %305, %309 : vector<1x100xf32>
    %311 = vector.extract_strided_slice %291 {offsets = [4, 0], sizes = [1, 48], strides = [1, 1]} : vector<6x48xf32> to vector<1x48xf32>
    %c4_214 = arith.constant 4 : index
    %c0_215 = arith.constant 0 : index
    %c0_216 = arith.constant 0 : index
    %312 = vector.load %arg8[%c4_214, %c0_215, %c0_216] : memref<6x48x100xf32, #tpu.memory_space<vmem>>, vector<1x48x100xf32>
    %313 = vector.shape_cast %312 : vector<1x48x100xf32> to vector<48x100xf32>
    %cst_217 = arith.constant dense<0.000000e+00> : vector<1x100xf32>
    %314 = tpu.matmul %311, %313, %cst_217 {dimension_numbers = #tpu.dot_dimension_numbers<[1], [0], [0], [1], [0, 0, 1, 1], [], []>} : vector<1x48xf32>, vector<48x100xf32>, vector<1x100xf32> -> vector<1x100xf32>
    %315 = arith.addf %310, %314 : vector<1x100xf32>
    %316 = vector.extract_strided_slice %291 {offsets = [5, 0], sizes = [1, 48], strides = [1, 1]} : vector<6x48xf32> to vector<1x48xf32>
    %c5_218 = arith.constant 5 : index
    %c0_219 = arith.constant 0 : index
    %c0_220 = arith.constant 0 : index
    %317 = vector.load %arg8[%c5_218, %c0_219, %c0_220] : memref<6x48x100xf32, #tpu.memory_space<vmem>>, vector<1x48x100xf32>
    %318 = vector.shape_cast %317 : vector<1x48x100xf32> to vector<48x100xf32>
    %cst_221 = arith.constant dense<0.000000e+00> : vector<1x100xf32>
    %319 = tpu.matmul %316, %318, %cst_221 {dimension_numbers = #tpu.dot_dimension_numbers<[1], [0], [0], [1], [0, 0, 1, 1], [], []>} : vector<1x48xf32>, vector<48x100xf32>, vector<1x100xf32> -> vector<1x100xf32>
    %320 = arith.addf %315, %319 : vector<1x100xf32>
    %c0_222 = arith.constant 0 : index
    %c0_223 = arith.constant 0 : index
    %321 = vector.load %arg9[%c0_222, %c0_223] : memref<1x100xf32, #tpu.memory_space<vmem>>, vector<1x100xf32>
    %322 = arith.addf %320, %321 : vector<1x100xf32>
    %cst_224 = arith.constant 0.000000e+00 : f32
    %323 = vector.broadcast %cst_224 : f32 to vector<1x100xf32>
    %324 = arith.maximumf %322, %323 : vector<1x100xf32>
    %c0_225 = arith.constant 0 : index
    %c0_226 = arith.constant 0 : index
    %325 = vector.load %arg10[%c0_225, %c0_226] : memref<100x1xf32, #tpu.memory_space<vmem>>, vector<100x1xf32>
    %cst_227 = arith.constant dense<0.000000e+00> : vector<1x1xf32>
    %326 = tpu.matmul %324, %325, %cst_227 {dimension_numbers = #tpu.dot_dimension_numbers<[1], [0], [0], [1], [0, 0, 1, 1], [], []>} : vector<1x100xf32>, vector<100x1xf32>, vector<1x1xf32> -> vector<1x1xf32>
    %c0_228 = arith.constant 0 : index
    %c0_229 = arith.constant 0 : index
    %327 = vector.load %arg11[%c0_228, %c0_229] : memref<1x1xf32, #tpu.memory_space<vmem>>, vector<1x1xf32>
    %328 = arith.addf %326, %327 : vector<1x1xf32>
    %cst_230 = arith.constant 0.000000e+00 : f32
    %329 = vector.broadcast %cst_230 : f32 to vector<1x1xf32>
    %330 = arith.subf %329, %328 : vector<1x1xf32>
    %331 = math.exp %330 : vector<1x1xf32>
    %cst_231 = arith.constant 1.000000e+00 : f32
    %332 = vector.broadcast %cst_231 : f32 to vector<1x1xf32>
    %333 = arith.addf %332, %331 : vector<1x1xf32>
    %334 = tpu.reciprocal %333 : vector<1x1xf32> -> vector<1x1xf32>
    %c1_232 = arith.constant 1 : index
    %c0_233 = arith.constant 0 : index
    %335 = vector.load %arg12[%c1_232, %c0_233] : memref<2x1xf32, #tpu.memory_space<vmem>>, vector<1x1xf32>
    tpu.vector_store %arg12[%c1_232, %c0_233], %334 {strides = array<i32>} : memref<2x1xf32, #tpu.memory_space<vmem>>, vector<1x1xf32>,
    return
  }
  func.func @transform_0(%arg0: i32) -> (i32, i32, i32) {
    %c0_i32 = arith.constant 0 : i32
    %c0_i32_0 = arith.constant 0 : i32
    %c0_i32_1 = arith.constant 0 : i32
    %c0_i32_2 = arith.constant 0 : i32
    return %c0_i32, %c0_i32_0, %c0_i32_1 : i32, i32, i32
  }
  func.func @transform_1(%arg0: i32) -> (i32, i32, i32) {
    %c0_i32 = arith.constant 0 : i32
    %c0_i32_0 = arith.constant 0 : i32
    %c0_i32_1 = arith.constant 0 : i32
    %c0_i32_2 = arith.constant 0 : i32
    return %c0_i32, %c0_i32_0, %c0_i32_1 : i32, i32, i32
  }
  func.func @transform_2(%arg0: i32) -> (i32, i32) {
    %c0_i32 = arith.constant 0 : i32
    %c0_i32_0 = arith.constant 0 : i32
    %c0_i32_1 = arith.constant 0 : i32
    return %c0_i32, %c0_i32_0 : i32, i32
  }
  func.func @transform_3(%arg0: i32) -> (i32, i32, i32) {
    %c0_i32 = arith.constant 0 : i32
    %c0_i32_0 = arith.constant 0 : i32
    %c0_i32_1 = arith.constant 0 : i32
    %c0_i32_2 = arith.constant 0 : i32
    return %c0_i32, %c0_i32_0, %c0_i32_1 : i32, i32, i32
  }
  func.func @transform_4(%arg0: i32) -> (i32, i32) {
    %c0_i32 = arith.constant 0 : i32
    %c0_i32_0 = arith.constant 0 : i32
    %c0_i32_1 = arith.constant 0 : i32
    return %c0_i32, %c0_i32_0 : i32, i32
  }
  func.func @transform_5(%arg0: i32) -> (i32, i32, i32) {
    %c0_i32 = arith.constant 0 : i32
    %c0_i32_0 = arith.constant 0 : i32
    %c0_i32_1 = arith.constant 0 : i32
    %c0_i32_2 = arith.constant 0 : i32
    return %c0_i32, %c0_i32_0, %c0_i32_1 : i32, i32, i32
  }
  func.func @transform_6(%arg0: i32) -> (i32, i32) {
    %c0_i32 = arith.constant 0 : i32
    %c0_i32_0 = arith.constant 0 : i32
    %c0_i32_1 = arith.constant 0 : i32
    return %c0_i32, %c0_i32_0 : i32, i32
  }
  func.func @transform_7(%arg0: i32) -> (i32, i32, i32) {
    %c0_i32 = arith.constant 0 : i32
    %c0_i32_0 = arith.constant 0 : i32
    %c0_i32_1 = arith.constant 0 : i32
    %c0_i32_2 = arith.constant 0 : i32
    return %c0_i32, %c0_i32_0, %c0_i32_1 : i32, i32, i32
  }
  func.func @transform_8(%arg0: i32) -> (i32, i32) {
    %c0_i32 = arith.constant 0 : i32
    %c0_i32_0 = arith.constant 0 : i32
    %c0_i32_1 = arith.constant 0 : i32
    return %c0_i32, %c0_i32_0 : i32, i32
  }
  func.func @transform_9(%arg0: i32) -> (i32, i32) {
    %c0_i32 = arith.constant 0 : i32
    %c0_i32_0 = arith.constant 0 : i32
    %c0_i32_1 = arith.constant 0 : i32
    return %c0_i32, %c0_i32_0 : i32, i32
  }
  func.func @transform_10(%arg0: i32) -> (i32, i32) {
    %c0_i32 = arith.constant 0 : i32
    %c0_i32_0 = arith.constant 0 : i32
    %c0_i32_1 = arith.constant 0 : i32
    return %c0_i32, %c0_i32_0 : i32, i32
  }
  func.func @transform_11(%arg0: i32) -> (i32, i32) {
    %c0_i32 = arith.constant 0 : i32
    %c0_i32_0 = arith.constant 0 : i32
    %c0_i32_1 = arith.constant 0 : i32
    return %c0_i32, %c0_i32_0 : i32, i32
  }
}

</mosaic_0001>

<bundles_post_ra>
// kernel: net_forward.1
= control target key start
LH: loop header
LB: loop body
LE: loop exit
PB: predicated region body
PF: predicated region fallthrough
CT: control target
= control target key end

     0   :  { %v40_v0 = vlaneseq  ;;  %v8785_v4 = vmov 0.0   ;;  %vm138_vm0 = vcmask 1045504   ;;  %vm125_vm3 = vcmask 441344   ;;  %s12317_s0 = inlined_call_operand.vmem [shape: f32[2,54,162], index: 0, kind: input, shape index: {}]   ;;  %s12318_s1 = inlined_call_operand.vmem [shape: f32[4,162,240], index: 1, kind: input, shape index: {}]   ;;  %s12319_s2 = inlined_call_operand.vmem [shape: f32[2,240], index: 2, kind: input, shape index: {}]   ;;  %s12320_s3 = inlined_call_operand.vmem [shape: f32[4,240,112], index: 3, kind: input, shape index: {}]   ;;  %s12321_s4 = inlined_call_operand.vmem [shape: f32[2,112], index: 4, kind: input, shape index: {}]   ;;  %s12322_s5 = inlined_call_operand.vmem [shape: f32[3,112,48], index: 5, kind: input, shape index: {}]   ;;  %s12323_s7 = inlined_call_operand.vmem [shape: f32[6,48,100], index: 7, kind: input, shape index: {}]   ;;  %s12324_s6 = inlined_call_operand.vmem [shape: f32[3,48], index: 6, kind: input, shape index: {}]   ;;  %s12325_s9 = inlined_call_operand.vmem [shape: f32[100,1], index: 9, kind: input, shape index: {}]   ;;  %s12326_s8 = inlined_call_operand.vmem [shape: f32[1,100], index: 8, kind: input, shape index: {}]   ;;  %s12327_s10 = inlined_call_operand.<no memory space> [shape: f32[1,1], index: 10, kind: input, shape index: {}]   ;;  %s12328_s11 = inlined_call_operand.vmem [shape: f32[2,1], index: 11, kind: output, shape index: {}]  }
   0x1   :  { %v112_v1 = vld [vmem:[%s12317_s0 + $0x8] sm:$0xff]  ;;  %v114_v2 = vld [vmem:[%s12317_s0 + $0x18] sm:$0xff]  ;;  %v111_v3 = vld [vmem:[%s12317_s0] sm:$0xff]  ;;  %352 = vmatprep.mubr.f32.mxu1 %v8785_v4  ;;  %209 = vmatprep.mubr.f32.mxu0 %v8785_v4 }
   0x2   :  { %v8860_v5 = vpack.c.bf16 %v114_v2, %v112_v1  ;;  %v113_v6 = vld [vmem:[%s12317_s0 + $0x10] sm:$0xff]  ;;  %v116_v7 = vld [vmem:[%s12317_s0 + $0x28] sm:$0xff]  ;;  %v118_v8 = vld [vmem:[%s12317_s0 + $0x38] sm:$0xff]  ;;  %v8871_v9 = vshrl.u32 %v40_v0, 7  ;;  %v8909_v22 = vand.u32 127, %v40_v0 }
   0x3   :  { %v8873_v10 = vpack.c.bf16 %v113_v6, %v111_v3  ;;  %v8875_v11 = vpack.c.bf16 %v118_v8, %v116_v7  ;;  %v115_v12 = vld [vmem:[%s12317_s0 + $0x20] sm:$0xff]  ;;  %v117_v13 = vld [vmem:[%s12317_s0 + $0x30] sm:$0xff]  ;;  %v120_v14 = vld [vmem:[%s12317_s0 + $0x48] sm:$0xff] }
   0x4   :  { %7548 = vmatprep.subr.bf16.mxu1 %v8860_v5  ;;  %v122_v15 = vld [vmem:[%s12317_s0 + $0x58] sm:$0xff]  ;;  %v8891_v16 = vmul.u32 2, %v8871_v9  ;;  %7536 = vmatprep.subr.bf16.mxu0 %v8860_v5  ;;  %v42_v17 = vadd.s32 8, %v8871_v9  ;;  %v8896_v18 = vpack.c.bf16 %v117_v13, %v115_v12  ;;  %v119_v20 = vld [vmem:[%s12317_s0 + $0x40] sm:$0xff]  ;;  %v121_v21 = vld [vmem:[%s12317_s0 + $0x50] sm:$0xff]  ;;  %v43_v25 = vadd.s32 16, %v8871_v9 }
   0x5   :  { %7550 = vmatpush1.bf16.msra.mxu1 %v8873_v10  ;;  %7538 = vmatpush1.bf16.msra.mxu0 %v8873_v10  ;;  %v8900_v19 = vpack.c.bf16 %v122_v15, %v120_v14  ;;  %v8916_v26 = vpack.c.bf16 %v121_v21, %v119_v20  ;;  %v8924_v27 = vld [vmem:[%s12317_s0 + $0x68] sm:$0x3f]  ;;  %v44_v28 = vadd.s32 24, %v8871_v9  ;;  %v8937_v31 = vld [vmem:[%s12317_s0 + $0x60] sm:$0x3f]  ;;  %v6078_v32 = vld [vmem:[%s12318_s1 + $0x158] sm:$0xff] }
   0x6   :  { %7552 = vmatprep.subr.bf16.mxu1 %v8875_v11  ;;  %7540 = vmatprep.subr.bf16.mxu0 %v8875_v11  ;;  %v63_v23 = vadd.s32 1, %v8891_v16  ;;  %v8912_v24 = vmul.u32 2, %v42_v17  ;;  %v8929_v30 = vmul.u32 2, %v43_v25  ;;  %vm51_vm2 = vcmp.eq.s32.totalorder %v8909_v22, %v8891_v16  ;;  %v6080_v33 = vld [vmem:[%s12318_s1 + $0x168] sm:$0xff]  ;;  %v6077_v34 = vld [vmem:[%s12318_s1 + $0x150] sm:$0xff]  ;;  %v6079_v35 = vld [vmem:[%s12318_s1 + $0x160] sm:$0xff] }
   0x7   :  { %v8960_v37 = vsel %vm51_vm2, 1.0, %v8785_v4  ;;  %v8964_v39 = vmul.u32 2, %v44_v28  ;;  %v7559_v40 = vpack.c.bf16 %v6080_v33, %v6078_v32  ;;  %v7561_v41 = vpack.c.bf16 %v6079_v35, %v6077_v34  ;;  %v6082_v42 = vld [vmem:[%s12318_s1 + $0x178] sm:$0xff]  ;;  %v6084_v43 = vld [vmem:[%s12318_s1 + $0x188] sm:$0xff]  ;;  %v6081_v44 = vld [vmem:[%s12318_s1 + $0x170] sm:$0xff] }
   0x8   :  { %vm67_vm1 = vcmp.eq.s32.totalorder %v8909_v22, %v63_v23  ;;  %v64_v29 = vadd.s32 1, %v8912_v24  ;;  %v65_v38 = vadd.s32 1, %v8929_v30  ;;  %vm52_vm5 = vcmp.eq.s32.totalorder %v8909_v22, %v8912_v24  ;;  %v6083_v45 = vld [vmem:[%s12318_s1 + $0x180] sm:$0xff]  ;;  %v6086_v51 = vld [vmem:[%s12318_s1 + $0x198] sm:$0xff]  ;;  %v6088_v52 = vld [vmem:[%s12318_s1 + $0x1a8] sm:$0xff] }
   0x9   :  { %7554 = vmatpush1.bf16.msra.mxu1 %v8896_v18  ;;  %7542 = vmatpush1.bf16.msra.mxu0 %v8896_v18  ;;  %v8957_v36 = vsel %vm67_vm1, 1.0, %v8785_v4  ;;  %v8994_v47 = vsel %vm52_vm5, 1.0, %v8785_v4  ;;  %v66_v48 = vadd.s32 1, %v8964_v39  ;;  %vm53_vm7 = vcmp.eq.s32.totalorder %v8909_v22, %v8929_v30  ;;  %v6085_v53 = vld [vmem:[%s12318_s1 + $0x190] sm:$0xff]  ;;  %v6087_v54 = vld [vmem:[%s12318_s1 + $0x1a0] sm:$0xff]  ;;  %v6090_v60 = vld [vmem:[%s12318_s1 + $0x1b8] sm:$0xff] }
   0xa   :  { %7556 = vmatprep.subr.bf16.mxu1 %v8900_v19  ;;  %7544 = vmatprep.subr.bf16.mxu0 %v8900_v19  ;;  %vm68_vm4 = vcmp.eq.s32.totalorder %v8909_v22, %v64_v29  ;;  %vm69_vm6 = vcmp.eq.s32.totalorder %v8909_v22, %v65_v38  ;;  %v7563_v49 = vpack.c.bf16 %v6084_v43, %v6082_v42  ;;  %v9026_v56 = vsel %vm53_vm7, 1.0, %v8785_v4  ;;  %v6092_v61 = vld [vmem:[%s12318_s1 + $0x1c8] sm:$0xff]  ;;  %v6089_v62 = vld [vmem:[%s12318_s1 + $0x1b0] sm:$0xff]  ;;  %v6091_v63 = vld [vmem:[%s12318_s1 + $0x1c0] sm:$0xff] }
   0xb   :  { %v8990_v46 = vsel %vm68_vm4, 1.0, %v8785_v4  ;;  %v7565_v50 = vpack.c.bf16 %v6083_v45, %v6081_v44  ;;  %v9022_v55 = vsel %vm69_vm6, 1.0, %v8785_v4  ;;  %vm70_vm8 = vcmp.eq.s32.totalorder %v8909_v22, %v66_v48  ;;  %v6094_v7 = vld [vmem:[%s12318_s1 + $0x1d8] sm:$0xff]  ;;  %v6096_v8 = vld [vmem:[%s12318_s1 + $0x1e8] sm:$0xff]  ;;  %v6093_v12 = vld [vmem:[%s12318_s1 + $0x1d0] sm:$0xff] }
   0xc   :  { %vm54_vm9 = vcmp.eq.s32.totalorder %v8909_v22, %v8964_v39  ;;  %v79_v57 = vadd.s32 2, %v8891_v16  ;;  %v7567_v58 = vpack.c.bf16 %v6088_v52, %v6086_v51  ;;  %v7569_v59 = vpack.c.bf16 %v6087_v54, %v6085_v53  ;;  %v6095_v13 = vld [vmem:[%s12318_s1 + $0x1e0] sm:$0xff]  ;;  %v6098_v15 = vld [vmem:[%s12318_s1 + $0x1f8] sm:$0xff]  ;;  %v6100_v17 = vld [vmem:[%s12318_s1 + $0x208] sm:$0xff] }
   0xd   :  { %7558 = vmatpush1.bf16.msra.mxu1 %v8916_v26  ;;  %7546 = vmatpush1.bf16.msra.mxu0 %v8916_v26  ;;  %v9054_v0 = vsel %vm70_vm8, 1.0, %v8785_v4  ;;  %v9061_v1 = vsel %vm54_vm9, 1.0, %v8785_v4  ;;  %v80_v2 = vadd.s32 2, %v8912_v24  ;;  %v7571_v3 = vpack.c.bf16 %v6092_v61, %v6090_v60  ;;  %v6097_v28 = vld [vmem:[%s12318_s1 + $0x1f0] sm:$0xff]  ;;  %v6099_v29 = vld [vmem:[%s12318_s1 + $0x200] sm:$0xff]  ;;  %v6104_v33 = vld [vmem:[%s12318_s1 + $0x228] sm:$0xff] }
   0xe   :  { %6071 = vmatprep.subr.msk.mxu1 %vm138_vm0, %v8924_v27  ;;  %6065 = vmatprep.subr.msk.mxu0 %vm138_vm0, %v8924_v27  ;;  %vm83_vm10 = vcmp.eq.s32.totalorder %v8909_v22, %v79_v57  ;;  %v7573_v6 = vpack.c.bf16 %v6091_v63, %v6089_v62  ;;  %v81_v20 = vadd.s32 2, %v8929_v30  ;;  %v7575_v21 = vpack.c.bf16 %v6096_v8, %v6094_v7  ;;  %v6101_v38 = vld [vmem:[%s12318_s1 + $0x210] sm:$0xff]  ;;  %v6108_v42 = vld [vmem:[%s12318_s1 + $0x248] sm:$0xff]  ;;  %v6107_v48 = vld [vmem:[%s12318_s1 + $0x240] sm:$0xff] }
   0xf   :  { %v9087_v14 = vsel %vm83_vm10, 1.0, %v8785_v4  ;;  %vm84_vm11 = vcmp.eq.s32.totalorder %v8909_v22, %v80_v2  ;;  %v7577_v23 = vpack.c.bf16 %v6095_v13, %v6093_v12  ;;  %v7579_v25 = vpack.c.bf16 %v6100_v17, %v6098_v15  ;;  %v6105_v45 = vld [vmem:[%s12318_s1 + $0x230] sm:$0xff]  ;;  %v6111_v53 = vld [vmem:[%s12318_s1 + $0x260] sm:$0xff]  ;;  %v6116_v54 = vld [vmem:[%s12318_s1 + $0x288] sm:$0xff] }
  0x10   :  { %v9110_v32 = vsel %vm84_vm11, 1.0, %v8785_v4  ;;  %vm85_vm12 = vcmp.eq.s32.totalorder %v8909_v22, %v81_v20  ;;  %v82_v34 = vadd.s32 2, %v8964_v39  ;;  %v7581_v35 = vpack.c.bf16 %v6099_v29, %v6097_v28  ;;  %v6109_v52 = vld [vmem:[%s12318_s1 + $0x250] sm:$0xff]  ;;  %v6115_v60 = vld [vmem:[%s12318_s1 + $0x280] sm:$0xff]  ;;  %v6118_v2 = vld [vmem:[%s12318_s1 + $0x298] sm:$0x3] }
  0x11   :  { %6072 = vmatpush1.msk.msra.mxu1 %vm138_vm0, %v8937_v31  ;;  %6066 = vmatpush1.msk.msra.mxu0 %vm138_vm0, %v8937_v31  ;;  %v95_v43 = vadd.s32 3, %v8891_v16  ;;  %v6110_v16 = vld [vmem:[%s12318_s1 + $0x258] sm:$0xff]  ;;  %v7589_v51 = vpack.c.bf16 %v6107_v48, %v6105_v45  ;;  %v97_v57 = vadd.s32 3, %v8929_v30  ;;  %v98_v30 = vadd.s32 3, %v8964_v39  ;;  %v234_v8 = vld [vmem:[%s12318_s1] sm:$0xff]  ;;  %v236_v12 = vld [vmem:[%s12318_s1 + $0x10] sm:$0xff] }
  0x12   :  { %6073 = vmatmul.mubr.msk.f32.vlgmr.msra.gmra.mrb[0].mxu1 %vm125_vm3, %v8957_v36  ;;  %6067 = vmatmul.mubr.msk.f32.vlgmr.msra.gmra.mrb[0].mxu0 %vm125_vm3, %v8960_v37  ;;  %vm86_vm13 = vcmp.eq.s32.totalorder %v8909_v22, %v82_v34  ;;  %vm433_vm4 = vcmask 1041408   ;;  %v239_v13 = vld [vmem:[%s12318_s1 + $0x28] sm:$0xff]  ;;  %v241_v15 = vld [vmem:[%s12318_s1 + $0x38] sm:$0xff]  ;;  %vm420_vm5 = vcmask 277504   ;;  %v7601_v20 = vpack.c.bf16 %v236_v12, %v234_v8  ;;  %v238_v28 = vld [vmem:[%s12318_s1 + $0x20] sm:$0xff] }
  0x13   :  { %358 = vmatprep.mubr.f32.mxu1 %v8785_v4  ;;  %215 = vmatprep.mubr.f32.mxu0 %v8785_v4  ;;  %vm99_vm14 = vcmp.eq.s32.totalorder %v8909_v22, %v95_v43  ;;  %vm101_vm1 = vcmp.eq.s32.totalorder %v8909_v22, %v97_v57  ;;  %vm102_vm2 = vcmp.eq.s32.totalorder %v8909_v22, %v98_v30  ;;  %v240_v29 = vld [vmem:[%s12318_s1 + $0x30] sm:$0xff]  ;;  %v245_v34 = vld [vmem:[%s12318_s1 + $0x58] sm:$0xff]  ;;  %v254_v12 = vld [vmem:[%s12318_s1 + $0xa0] sm:$0xff]  ;;  %vm8786_vm7 = vmmov 1  }
  0x14   :  { %7640 = vmatprep.subr.bf16.mxu1 %v8860_v5  ;;  %7560 = vmatprep.subr.bf16.mxu0 %v7559_v40  ;;  %v9132_v40 = vsel %vm85_vm12, 1.0, %v8785_v4  ;;  %v9207_v63 = vsel %vm101_vm1, 1.0, %v8785_v4  ;;  %v9214_v39 = vsel %vm102_vm2, 1.0, %v8785_v4  ;;  %v249_v45 = vld [vmem:[%s12318_s1 + $0x78] sm:$0xff]  ;;  %v252_v30 = vld [vmem:[%s12318_s1 + $0x90] sm:$0xff]  ;;  %vm6240_vm6 = vmneg %vm433_vm4  ;;  %vm1235_vm9 = vcmask 1043456  }
  0x15   :  { %7642 = vmatpush1.bf16.msra.mxu1 %v8873_v10  ;;  %7562 = vmatpush1.bf16.msra.mxu0 %v7561_v41  ;;  %v6106_v41 = vld [vmem:[%s12318_s1 + $0x238] sm:$0xff]  ;;  %vm9719_vm8 = vmpackc.low %vm8786_vm7, %vm6240_vm6  ;;  %vm1238_vm11 = vcmask 244736   ;;  %vm1468_vm12 = vcmask 916480  }
  0x16   :  { %6074 = vmatmul.mubr.msk.f32.gmra.mrb[2].mxu1 %vm125_vm3, %v8990_v46  ;;  %6068 = vmatmul.mubr.msk.f32.gmra.mrb[2].mxu0 %vm125_vm3, %v8994_v47  ;;  %vm9740_vm10 = vmpackc.low %vm138_vm0, %vm8786_vm7 }
  0x17   :  { %364 = vmatprep.mubr.f32.mxu1 %v8785_v4  ;;  %221 = vmatprep.mubr.f32.mxu0 %v8785_v4 }
  0x18   :  { %7644 = vmatprep.subr.bf16.mxu1 %v8875_v11  ;;  %7564 = vmatprep.subr.bf16.mxu0 %v7563_v49  ;;  %v6112_v49 = vld [vmem:[%s12318_s1 + $0x268] sm:$0xff] }
  0x19   :  { %7646 = vmatpush1.bf16.msra.mxu1 %v8896_v18  ;;  %7566 = vmatpush1.bf16.msra.mxu0 %v7565_v50  ;;  %v96_v50 = vadd.s32 3, %v8912_v24  ;;  %v9179_v24 = vsel %vm99_vm14, 1.0, %v8785_v4  ;;  %vm2037_vm14 = vcmask 113664  }
  0x1a   :  { %6075 = vmatmul.mubr.msk.f32.gmra.mrb[4].mxu1 %vm125_vm3, %v9022_v55  ;;  %6069 = vmatmul.mubr.msk.f32.gmra.mrb[4].mxu0 %vm125_vm3, %v9026_v56 }
  0x1b   :  { %370 = vmatprep.mubr.f32.mxu1 %v8785_v4  ;;  %227 = vmatprep.mubr.f32.mxu0 %v8785_v4  ;;  %vm100_vm15 = vcmp.eq.s32.totalorder %v8909_v22, %v96_v50  ;;  %v235_v22 = vld [vmem:[%s12318_s1 + $0x8] sm:$0xff] }
  0x1c   :  { %7648 = vmatprep.subr.bf16.mxu1 %v8900_v19  ;;  %7568 = vmatprep.subr.bf16.mxu0 %v7567_v58  ;;  %v7593_v58 = vpack.c.bf16 %v6111_v53, %v6109_v52  ;;  %v9199_v61 = vsel %vm100_vm15, 1.0, %v8785_v4  ;;  %vm2555_vm15 = vcmask 392192  }
  0x1d   :  { %7650 = vmatpush1.bf16.msra.mxu1 %v8916_v26  ;;  %7570 = vmatpush1.bf16.msra.mxu0 %v7569_v59  ;;  %v6113_v59 = vld [vmem:[%s12318_s1 + $0x270] sm:$0xff] }
  0x1e   :  { %6076 = vmatmul.mubr.msk.f32.gmra.mrb[6].mxu1 %vm125_vm3, %v9054_v0  ;;  %6070 = vmatmul.mubr.msk.f32.gmra.mrb[6].mxu0 %vm125_vm3, %v9061_v1  ;;  %v7597_v62 = vpack.c.bf16 %v6115_v60, %v6113_v59  ;;  %v250_v60 = vld [vmem:[%s12318_s1 + $0x80] sm:$0xff] }
  0x1f   :  { %6131 = vmatprep.subr.msk.mxu1 %vm138_vm0, %v8924_v27  ;;  %712 = vmatprep.mubr.f32.mxu1 %v8785_v4 }
  0x20   :  { %7572 = vmatprep.subr.bf16.mxu0 %v7571_v3  ;;  %v237_v3 = vld [vmem:[%s12318_s1 + $0x18] sm:$0xff] }
  0x21   :  { %6132 = vmatpush1.msk.msra.mxu1 %vm138_vm0, %v8937_v31  ;;  %7574 = vmatpush1.bf16.msra.mxu0 %v7573_v6  ;;  %v6117_v6 = vld [vmem:[%s12318_s1 + $0x290] sm:$0x3]  ;;  %v7599_v7 = vpack.c.bf16 %v237_v3, %v235_v22  ;;  %v255_v22 = vld [vmem:[%s12318_s1 + $0xa8] sm:$0xff]  ;;  %v257_v3 = vld [vmem:[%s12318_s1 + $0xb8] sm:$0xff] }
  0x22   :  { %6133 = vmatmul.mubr.msk.f32.vlgmr.msra.gmra.mrb[8].mxu1 %vm125_vm3, %v9087_v14  ;;  %7692 = vmatprep.subr.bf16.mxu1 %v8860_v5  ;;  %v6102_v5 = vld [vmem:[%s12318_s1 + $0x218] sm:$0xff]  ;;  %v7619_v8 = vpack.c.bf16 %v257_v3, %v255_v22 }
  0x23   :  { %718 = vmatprep.mubr.f32.mxu1 %v8785_v4  ;;  %7694 = vmatpush1.bf16.msra.mxu1 %v8873_v10  ;;  %v7583_v10 = vpack.c.bf16 %v6104_v33, %v6102_v5  ;;  %v243_v33 = vld [vmem:[%s12318_s1 + $0x48] sm:$0xff] }
  0x24   :  { %7696 = vmatprep.subr.bf16.mxu1 %v8875_v11  ;;  %7576 = vmatprep.subr.bf16.mxu0 %v7575_v21  ;;  %v6103_v11 = vld [vmem:[%s12318_s1 + $0x220] sm:$0xff] }
  0x25   :  { %7578 = vmatpush1.bf16.msra.mxu0 %v7577_v23  ;;  %v7585_v44 = vpack.c.bf16 %v6103_v11, %v6101_v38  ;;  %v7607_v11 = vpack.c.bf16 %v245_v34, %v243_v33  ;;  %v263_v34 = vld [vmem:[%s12318_s1 + $0xe8] sm:$0xff] }
  0x26   :  { %6134 = vmatmul.mubr.msk.f32.gmra.mrb[10].mxu1 %vm125_vm3, %v9110_v32  ;;  %7580 = vmatprep.subr.bf16.mxu0 %v7579_v25  ;;  %v7603_v25 = vpack.c.bf16 %v241_v15, %v239_v13  ;;  %v256_v13 = vld [vmem:[%s12318_s1 + $0xb0] sm:$0xff] }
  0x27   :  { %724 = vmatprep.mubr.f32.mxu1 %v8785_v4  ;;  %7698 = vmatpush1.bf16.msra.mxu1 %v8896_v18  ;;  %v7587_v18 = vpack.c.bf16 %v6108_v42, %v6106_v41  ;;  %v242_v41 = vld [vmem:[%s12318_s1 + $0x40] sm:$0xff]  ;;  %v244_v42 = vld [vmem:[%s12318_s1 + $0x50] sm:$0xff] }
  0x28   :  { %7700 = vmatprep.subr.bf16.mxu1 %v8900_v19  ;;  %v9154_v19 = vsel %vm86_vm13, 1.0, %v8785_v4  ;;  %v7609_v48 = vpack.c.bf16 %v244_v42, %v242_v41  ;;  %v262_v42 = vld [vmem:[%s12318_s1 + $0xe0] sm:$0xff]  ;;  %vm8788_vm13 = vmmov 0  }
  0x29   :  { %7582 = vmatpush1.bf16.msra.mxu0 %v7581_v35  ;;  %v7605_v35 = vpack.c.bf16 %v240_v29, %v238_v28  ;;  %v258_v29 = vld [vmem:[%s12318_s1 + $0xc0] sm:$0xff] }
  0x2a   :  { %6135 = vmatmul.mubr.msk.f32.gmra.mrb[12].mxu1 %vm125_vm3, %v9132_v40  ;;  %7584 = vmatprep.subr.bf16.mxu0 %v7583_v10 }
  0x2b   :  { %730 = vmatprep.mubr.f32.mxu1 %v8785_v4  ;;  %7702 = vmatpush1.bf16.msra.mxu1 %v8916_v26  ;;  %v7591_v26 = vpack.c.bf16 %v6112_v49, %v6110_v16 }
  0x2c   :  { %6185 = vmatprep.subr.msk.mxu1 %vm138_vm0, %v8924_v27  ;;  %v6114_v27 = vld [vmem:[%s12318_s1 + $0x278] sm:$0xff] }
  0x2d   :  { %7586 = vmatpush1.bf16.msra.mxu0 %v7585_v44 }
  0x2e   :  { %6136 = vmatmul.mubr.msk.f32.gmra.mrb[14].mxu1 %vm125_vm3, %v9154_v19  ;;  %7588 = vmatprep.subr.bf16.mxu0 %v7587_v18  ;;  %v247_v18 = vld [vmem:[%s12318_s1 + $0x68] sm:$0xff] }
  0x2f   :  { %6186 = vmatpush1.msk.msra.mxu1 %vm138_vm0, %v8937_v31  ;;  %971 = vmatprep.mubr.f32.mxu1 %v8785_v4  ;;  %v7595_v31 = vpack.c.bf16 %v6116_v54, %v6114_v27  ;;  %v7611_v50 = vpack.c.bf16 %v249_v45, %v247_v18  ;;  %v251_v27 = vld [vmem:[%s12318_s1 + $0x88] sm:$0xff]  ;;  %v253_v54 = vld [vmem:[%s12318_s1 + $0x98] sm:$0xff] }
  0x30   :  { %v7615_v59 = vpack.c.bf16 %v253_v54, %v251_v27  ;;  %v267_v45 = vld [vmem:[%s12318_s1 + $0x108] sm:$0xff] }
  0x31   :  { %7590 = vmatpush1.bf16.msra.mxu0 %v7589_v51  ;;  %v246_v51 = vld [vmem:[%s12318_s1 + $0x60] sm:$0xff]  ;;  %v271_v54 = vld [vmem:[%s12318_s1 + $0x128] sm:$0xff] }
  0x32   :  { %6187 = vmatmul.mubr.msk.f32.vlgmr.msra.gmra.mrb[16].mxu1 %vm125_vm3, %v9179_v24  ;;  %7592 = vmatprep.subr.bf16.mxu0 %v7591_v26  ;;  %v248_v26 = vld [vmem:[%s12318_s1 + $0x70] sm:$0xff] }
  0x33   :  { %977 = vmatprep.mubr.f32.mxu1 %v8785_v4  ;;  %v7613_v57 = vpack.c.bf16 %v248_v26, %v246_v51  ;;  %v266_v26 = vld [vmem:[%s12318_s1 + $0x100] sm:$0xff] }
  0x35   :  { %7594 = vmatpush1.bf16.msra.mxu0 %v7593_v58 }
  0x36   :  { %6188 = vmatmul.mubr.msk.f32.gmra.mrb[18].mxu1 %vm125_vm3, %v9199_v61  ;;  %7596 = vmatprep.subr.bf16.mxu0 %v7595_v31 }
  0x37   :  { %983 = vmatprep.mubr.f32.mxu1 %v8785_v4 }
  0x39   :  { %7598 = vmatpush1.bf16.msra.mxu0 %v7597_v62 }
  0x3a   :  { %6189 = vmatmul.mubr.msk.f32.gmra.mrb[20].mxu1 %vm125_vm3, %v9207_v63  ;;  %6119 = vmatprep.subr.msk.mxu0 %vm433_vm4, %v6118_v2 }
  0x3b   :  { %989 = vmatprep.mubr.f32.mxu1 %v8785_v4 }
  0x3d   :  { %6120 = vmatpush1.msk.msra.mxu0 %vm433_vm4, %v6117_v6  ;;  %v7617_v6 = vpack.c.bf16 %v252_v30, %v250_v60  ;;  %v270_v30 = vld [vmem:[%s12318_s1 + $0x120] sm:$0xff] }
  0x3e   :  { %6190 = vmatmul.mubr.msk.f32.gmra.mrb[22].mxu1 %vm125_vm3, %v9214_v39  ;;  %7600 = vmatprep.subr.bf16.mxu0 %v7599_v7 }
  0x3f   :  { %1424 = vmatprep.mubr.f32.mxu1 %v8785_v4 }
  0xe5   :  { %v354_v17 = vpop.f32.mrb[0].mxu1  ;;  %v9245_v21 = vpop.f32.mrb[0].mxu0 }
  0xe6   :  { %v356_v23 = vpop.f32.mrb[1].mxu1  ;;  %v213_v5 = vpop.f32.mrb[1].mxu0 }
  0xe7   :  { %6121 = vmatprep.mubr.msk.f32.mxu0 %vm420_vm5, %v356_v23  ;;  %v7621_v23 = vpack.c.bf16 %v256_v13, %v254_v12  ;;  %v275_v12 = vld [vmem:[%s12318_s1 + $0x148] sm:$0x3] }
  0xe8   :  { %505 = vmatmul.mubr.f32.vlgmr.msra.gmra.mrb[8].mxu0 %v354_v17  ;;  %v259_v17 = vld [vmem:[%s12318_s1 + $0xc8] sm:$0xff] }
  0xe9   :  { %7602 = vmatpush1.bf16.msra.mxu0 %v7601_v20  ;;  %v360_v10 = vpop.f32.mrb[2].mxu1  ;;  %v9260_v38 = vpop.f32.mrb[2].mxu0  ;;  %v261_v20 = vld [vmem:[%s12318_s1 + $0xd8] sm:$0xff]  ;;  %v6138_v13 = vld [vmem:[%s12318_s1 + $0x2a8] sm:$0xff] }
  0xea   :  { %7604 = vmatprep.subr.bf16.mxu0 %v7603_v25  ;;  %v362_v43 = vpop.f32.mrb[3].mxu1  ;;  %v9268_v44 = vpop.f32.mrb[3].mxu0  ;;  %v7623_v28 = vpack.c.bf16 %v261_v20, %v259_v17  ;;  %v6140_v17 = vld [vmem:[%s12318_s1 + $0x2b8] sm:$0xff]  ;;  %v6137_v20 = vld [vmem:[%s12318_s1 + $0x2a0] sm:$0xff] }
  0xeb   :  { %6122 = vmatprep.mubr.msk.f32.mxu0 %vm420_vm5, %v362_v43  ;;  %v264_v43 = vld [vmem:[%s12318_s1 + $0xf0] sm:$0xff] }
  0xec   :  { %511 = vmatmul.mubr.f32.gmra.mrb[10].mxu0 %v360_v10 }
  0xed   :  { %7606 = vmatpush1.bf16.msra.mxu0 %v7605_v35  ;;  %v366_v16 = vpop.f32.mrb[4].mxu1  ;;  %v9277_v49 = vpop.f32.mrb[4].mxu0  ;;  %v265_v35 = vld [vmem:[%s12318_s1 + $0xf8] sm:$0xff] }
  0xee   :  { %7608 = vmatprep.subr.bf16.mxu0 %v7607_v11  ;;  %v368_v52 = vpop.f32.mrb[5].mxu1  ;;  %v9285_v53 = vpop.f32.mrb[5].mxu0  ;;  %v7627_v41 = vpack.c.bf16 %v265_v35, %v263_v34  ;;  %v274_v34 = vld [vmem:[%s12318_s1 + $0x140] sm:$0x3]  ;;  %v7651_v35 = vpack.c.bf16 %v6140_v17, %v6138_v13 }
  0xef   :  { %6123 = vmatprep.mubr.msk.f32.mxu0 %vm420_vm5, %v368_v52  ;;  %v268_v52 = vld [vmem:[%s12318_s1 + $0x110] sm:$0xff]  ;;  %v6153_v17 = vld [vmem:[%s12318_s1 + $0x320] sm:$0xff] }
  0xf0   :  { %517 = vmatmul.mubr.f32.gmra.mrb[12].mxu0 %v366_v16  ;;  %v7629_v16 = vpack.c.bf16 %v264_v43, %v262_v42  ;;  %v6141_v43 = vld [vmem:[%s12318_s1 + $0x2c0] sm:$0xff] }
  0xf1   :  { %7610 = vmatpush1.bf16.msra.mxu0 %v7609_v48  ;;  %v372_v58 = vpop.f32.mrb[6].mxu1  ;;  %v9294_v31 = vpop.f32.mrb[6].mxu0  ;;  %v269_v48 = vld [vmem:[%s12318_s1 + $0x118] sm:$0xff] }
  0xf2   :  { %7612 = vmatprep.subr.bf16.mxu0 %v7611_v50  ;;  %v374_v62 = vpop.f32.mrb[7].mxu1  ;;  %v9302_v2 = vpop.f32.mrb[7].mxu0  ;;  %v7631_v51 = vpack.c.bf16 %v269_v48, %v267_v45  ;;  %v6143_v45 = vld [vmem:[%s12318_s1 + $0x2d0] sm:$0xff]  ;;  %v6146_v48 = vld [vmem:[%s12318_s1 + $0x2e8] sm:$0xff] }
  0xf3   :  { %6124 = vmatprep.mubr.msk.f32.mxu0 %vm420_vm5, %v374_v62  ;;  %v272_v62 = vld [vmem:[%s12318_s1 + $0x130] sm:$0xff] }
  0xf4   :  { %523 = vmatmul.mubr.f32.gmra.mrb[14].mxu0 %v372_v58  ;;  %v7633_v58 = vpack.c.bf16 %v268_v52, %v266_v26  ;;  %v7637_v3 = vpack.c.bf16 %v272_v62, %v270_v30  ;;  %v7657_v52 = vpack.c.bf16 %v6143_v45, %v6141_v43  ;;  %v6149_v62 = vld [vmem:[%s12318_s1 + $0x300] sm:$0xff]  ;;  %v6163_v43 = vld [vmem:[%s12318_s1 + $0x370] sm:$0xff]  ;;  %v6166_v45 = vld [vmem:[%s12318_s1 + $0x388] sm:$0xff] }
  0xf5   :  { %7614 = vmatpush1.bf16.msra.mxu0 %v7613_v57  ;;  %6127 = vmatprep.mubr.msk.f32.mxu0 %vm420_vm5, %v213_v5  ;;  %v9312_v7 = vpop.f32.mrb[8].mxu1  ;;  %v260_v5 = vld [vmem:[%s12318_s1 + $0xd0] sm:$0xff]  ;;  %v273_v57 = vld [vmem:[%s12318_s1 + $0x138] sm:$0xff] }
  0xf6   :  { %7616 = vmatprep.subr.bf16.mxu0 %v7615_v59  ;;  %v9320_v15 = vpop.f32.mrb[9].mxu1  ;;  %v7625_v10 = vpack.c.bf16 %v260_v5, %v258_v29  ;;  %v7635_v60 = vpack.c.bf16 %v273_v57, %v271_v54  ;;  %v6144_v29 = vld [vmem:[%s12318_s1 + $0x2d8] sm:$0xff]  ;;  %v6145_v57 = vld [vmem:[%s12318_s1 + $0x2e0] sm:$0xff] }
  0xf9   :  { %7618 = vmatpush1.bf16.msra.mxu0 %v7617_v6  ;;  %v9328_v25 = vpop.f32.mrb[10].mxu1 }
  0xfa   :  { %7620 = vmatprep.subr.bf16.mxu0 %v7619_v8  ;;  %v9336_v33 = vpop.f32.mrb[11].mxu1 }
  0xfd   :  { %7622 = vmatpush1.bf16.msra.mxu0 %v7621_v23  ;;  %v9344_v11 = vpop.f32.mrb[12].mxu1  ;;  %v6139_v23 = vld [vmem:[%s12318_s1 + $0x2b0] sm:$0xff] }
  0xfe   :  { %7624 = vmatprep.subr.bf16.mxu0 %v7623_v28  ;;  %v9352_v18 = vpop.f32.mrb[13].mxu1  ;;  %v6142_v28 = vld [vmem:[%s12318_s1 + $0x2c8] sm:$0xff] }
  0xff   :  { %v7655_v42 = vpack.c.bf16 %v6144_v29, %v6142_v28  ;;  %v6157_v29 = vld [vmem:[%s12318_s1 + $0x340] sm:$0xff] }
 0x101   :  { %7626 = vmatpush1.bf16.msra.mxu0 %v7625_v10  ;;  %v9360_v50 = vpop.f32.mrb[14].mxu1 }
 0x102   :  { %7628 = vmatprep.subr.bf16.mxu0 %v7627_v41  ;;  %v9368_v27 = vpop.f32.mrb[15].mxu1  ;;  %v7653_v41 = vpack.c.bf16 %v6139_v23, %v6137_v20  ;;  %v6155_v20 = vld [vmem:[%s12318_s1 + $0x330] sm:$0xff]  ;;  %v6158_v23 = vld [vmem:[%s12318_s1 + $0x348] sm:$0xff] }
 0x105   :  { %7630 = vmatpush1.bf16.msra.mxu0 %v7629_v16  ;;  %v9376_v59 = vpop.f32.mrb[16].mxu1  ;;  %v6148_v16 = vld [vmem:[%s12318_s1 + $0x2f8] sm:$0xff] }
 0x106   :  { %7632 = vmatprep.subr.bf16.mxu0 %v7631_v51  ;;  %v9384_v22 = vpop.f32.mrb[17].mxu1  ;;  %v7659_v54 = vpack.c.bf16 %v6148_v16, %v6146_v48  ;;  %v6168_v48 = vld [vmem:[%s12318_s1 + $0x398] sm:$0xff] }
 0x109   :  { %7634 = vmatpush1.bf16.msra.mxu0 %v7633_v58  ;;  %v9386_v6 = vpop.f32.mrb[18].mxu1  ;;  %v6147_v58 = vld [vmem:[%s12318_s1 + $0x2f0] sm:$0xff] }
 0x10a   :  { %7636 = vmatprep.subr.bf16.mxu0 %v7635_v60  ;;  %v9388_v8 = vpop.f32.mrb[19].mxu1  ;;  %v6152_v60 = vld [vmem:[%s12318_s1 + $0x318] sm:$0xff] }
 0x10d   :  { %7638 = vmatpush1.bf16.msra.mxu0 %v7637_v3  ;;  %v9411_v5 = vpop.f32.mrb[20].mxu1  ;;  %v6151_v3 = vld [vmem:[%s12318_s1 + $0x310] sm:$0xff] }
 0x10e   :  { %6125 = vmatprep.subr.msk.mxu0 %vm433_vm4, %v275_v12  ;;  %v9417_v10 = vpop.f32.mrb[21].mxu1  ;;  %v6154_v12 = vld [vmem:[%s12318_s1 + $0x328] sm:$0xff] }
 0x111   :  { %6126 = vmatpush1.msk.msra.mxu0 %vm433_vm4, %v274_v34  ;;  %v9432_v51 = vpop.f32.mrb[22].mxu1  ;;  %v6159_v34 = vld [vmem:[%s12318_s1 + $0x350] sm:$0xff] }
 0x112   :  { %612 = vmatmul.mubr.f32.vlgmr.msra.gmra.mrb[8].mxu0 %v9245_v21  ;;  %7652 = vmatprep.subr.bf16.mxu0 %v7651_v35  ;;  %v9435_v26 = vpop.f32.mrb[23].mxu1  ;;  %v6150_v21 = vld [vmem:[%s12318_s1 + $0x308] sm:$0xff] }
 0x113   :  { %7654 = vmatpush1.bf16.msra.mxu0 %v7653_v41  ;;  %6128 = vmatprep.mubr.msk.f32.mxu0 %vm420_vm5, %v9268_v44  ;;  %v7661_v44 = vpack.c.bf16 %v6147_v58, %v6145_v57  ;;  %v7663_v30 = vpack.c.bf16 %v6152_v60, %v6150_v21  ;;  %v6162_v35 = vld [vmem:[%s12318_s1 + $0x368] sm:$0xff]  ;;  %v6167_v57 = vld [vmem:[%s12318_s1 + $0x390] sm:$0xff]  ;;  %v6172_v21 = vld [vmem:[%s12318_s1 + $0x3b8] sm:$0xff] }
 0x114   :  { %7656 = vmatprep.subr.bf16.mxu0 %v7655_v42  ;;  %v6161_v42 = vld [vmem:[%s12318_s1 + $0x360] sm:$0xff]  ;;  %v6170_v58 = vld [vmem:[%s12318_s1 + $0x3a8] sm:$0xff] }
 0x115   :  { %v7677_v16 = vpack.c.bf16 %v6163_v43, %v6161_v42  ;;  %v6195_v43 = vld [vmem:[%s12318_s1 + $0x410] sm:$0xff] }
 0x116   :  { %618 = vmatmul.mubr.f32.gmra.mrb[10].mxu0 %v9260_v38  ;;  %v6156_v38 = vld [vmem:[%s12318_s1 + $0x338] sm:$0xff] }
 0x117   :  { %7658 = vmatpush1.bf16.msra.mxu0 %v7657_v52  ;;  %6129 = vmatprep.mubr.msk.f32.mxu0 %vm420_vm5, %v9285_v53  ;;  %v7665_v53 = vpack.c.bf16 %v6151_v3, %v6149_v62  ;;  %v7667_v13 = vpack.c.bf16 %v6156_v38, %v6154_v12  ;;  %v7679_v52 = vpack.c.bf16 %v6168_v48, %v6166_v45  ;;  %v6171_v62 = vld [vmem:[%s12318_s1 + $0x3b0] sm:$0xff]  ;;  %v6174_v3 = vld [vmem:[%s12318_s1 + $0x3c8] sm:$0xff]  ;;  %v6176_v12 = vld [vmem:[%s12318_s1 + $0x3d8] sm:$0xff] }
 0x118   :  { %7660 = vmatprep.subr.bf16.mxu0 %v7659_v54  ;;  %v6165_v54 = vld [vmem:[%s12318_s1 + $0x380] sm:$0xff]  ;;  %v6200_v48 = vld [vmem:[%s12318_s1 + $0x438] sm:$0xff] }
 0x119   :  { %v7681_v60 = vpack.c.bf16 %v6167_v57, %v6165_v54  ;;  %v6197_v45 = vld [vmem:[%s12318_s1 + $0x420] sm:$0xff]  ;;  %v6199_v57 = vld [vmem:[%s12318_s1 + $0x430] sm:$0xff] }
 0x11a   :  { %624 = vmatmul.mubr.f32.gmra.mrb[12].mxu0 %v9277_v49  ;;  %v6160_v49 = vld [vmem:[%s12318_s1 + $0x358] sm:$0xff] }
 0x11b   :  { %7662 = vmatpush1.bf16.msra.mxu0 %v7661_v44  ;;  %6130 = vmatprep.mubr.msk.f32.mxu0 %vm420_vm5, %v9302_v2  ;;  %v7669_v2 = vpack.c.bf16 %v6155_v20, %v6153_v17  ;;  %v7671_v28 = vpack.c.bf16 %v6160_v49, %v6158_v23  ;;  %v7683_v44 = vpack.c.bf16 %v6172_v21, %v6170_v58  ;;  %v6175_v17 = vld [vmem:[%s12318_s1 + $0x3d0] sm:$0xff]  ;;  %v6178_v23 = vld [vmem:[%s12318_s1 + $0x3e8] sm:$0x3]  ;;  %v6192_v49 = vld [vmem:[%s12318_s1 + $0x3f8] sm:$0xff] }
 0x11c   :  { %7664 = vmatprep.subr.bf16.mxu0 %v7663_v30  ;;  %v6169_v30 = vld [vmem:[%s12318_s1 + $0x3a0] sm:$0xff]  ;;  %v6206_v21 = vld [vmem:[%s12318_s1 + $0x468] sm:$0xff] }
 0x11d   :  { %v7685_v38 = vpack.c.bf16 %v6171_v62, %v6169_v30  ;;  %v6201_v58 = vld [vmem:[%s12318_s1 + $0x440] sm:$0xff]  ;;  %v6208_v62 = vld [vmem:[%s12318_s1 + $0x478] sm:$0xff] }
 0x11e   :  { %630 = vmatmul.mubr.f32.gmra.mrb[14].mxu0 %v9294_v31  ;;  %v6164_v31 = vld [vmem:[%s12318_s1 + $0x378] sm:$0xff]  ;;  %v6205_v30 = vld [vmem:[%s12318_s1 + $0x460] sm:$0xff] }
 0x11f   :  { %7666 = vmatpush1.bf16.msra.mxu0 %v7665_v53  ;;  %6181 = vmatprep.mubr.msk.f32.mxu0 %vm420_vm5, %v9320_v15  ;;  %v7673_v15 = vpack.c.bf16 %v6159_v34, %v6157_v29  ;;  %v7675_v41 = vpack.c.bf16 %v6164_v31, %v6162_v35  ;;  %v7687_v53 = vpack.c.bf16 %v6176_v12, %v6174_v3  ;;  %v6193_v29 = vld [vmem:[%s12318_s1 + $0x400] sm:$0xff]  ;;  %v6196_v34 = vld [vmem:[%s12318_s1 + $0x418] sm:$0xff]  ;;  %v6198_v35 = vld [vmem:[%s12318_s1 + $0x428] sm:$0xff] }
 0x120   :  { %7668 = vmatprep.subr.bf16.mxu0 %v7667_v13  ;;  %v6173_v13 = vld [vmem:[%s12318_s1 + $0x3c0] sm:$0xff]  ;;  %v7707_v42 = vpack.c.bf16 %v6198_v35, %v6196_v34  ;;  %v6207_v12 = vld [vmem:[%s12318_s1 + $0x470] sm:$0xff]  ;;  %v6222_v34 = vld [vmem:[%s12318_s1 + $0x4e8] sm:$0xff] }
 0x121   :  { %v7689_v20 = vpack.c.bf16 %v6175_v17, %v6173_v13  ;;  %v6177_v31 = vld [vmem:[%s12318_s1 + $0x3e0] sm:$0x3]  ;;  %v6211_v17 = vld [vmem:[%s12318_s1 + $0x490] sm:$0xff] }
 0x123   :  { %7670 = vmatpush1.bf16.msra.mxu0 %v7669_v2  ;;  %v6194_v2 = vld [vmem:[%s12318_s1 + $0x408] sm:$0xff] }
 0x124   :  { %7672 = vmatprep.subr.bf16.mxu0 %v7671_v28  ;;  %v6191_v28 = vld [vmem:[%s12318_s1 + $0x3f0] sm:$0xff] }
 0x127   :  { %7674 = vmatpush1.bf16.msra.mxu0 %v7673_v15  ;;  %v7703_v15 = vpack.c.bf16 %v6194_v2, %v6192_v49  ;;  %v6215_v2 = vld [vmem:[%s12318_s1 + $0x4b0] sm:$0xff] }
 0x128   :  { %7676 = vmatprep.subr.bf16.mxu0 %v7675_v41  ;;  %v7705_v41 = vpack.c.bf16 %v6193_v29, %v6191_v28  ;;  %v6217_v28 = vld [vmem:[%s12318_s1 + $0x4c0] sm:$0xff]  ;;  %v6220_v29 = vld [vmem:[%s12318_s1 + $0x4d8] sm:$0xff] }
 0x129   :  { %v7729_v35 = vpack.c.bf16 %v6217_v28, %v6215_v2 }
 0x12b   :  { %7678 = vmatpush1.bf16.msra.mxu0 %v7677_v16  ;;  %v6202_v16 = vld [vmem:[%s12318_s1 + $0x448] sm:$0xff] }
 0x12c   :  { %7680 = vmatprep.subr.bf16.mxu0 %v7679_v52  ;;  %v7709_v52 = vpack.c.bf16 %v6197_v45, %v6195_v43  ;;  %v7711_v54 = vpack.c.bf16 %v6202_v16, %v6200_v48  ;;  %v6226_v43 = vld [vmem:[%s12318_s1 + $0x508] sm:$0xff]  ;;  %v6223_v16 = vld [vmem:[%s12318_s1 + $0x4f0] sm:$0xff] }
 0x12f   :  { %7682 = vmatpush1.bf16.msra.mxu0 %v7681_v60 }
 0x130   :  { %7684 = vmatprep.subr.bf16.mxu0 %v7683_v44  ;;  %v6203_v44 = vld [vmem:[%s12318_s1 + $0x450] sm:$0xff] }
 0x133   :  { %7686 = vmatpush1.bf16.msra.mxu0 %v7685_v38  ;;  %v6209_v38 = vld [vmem:[%s12318_s1 + $0x480] sm:$0xff] }
 0x134   :  { %7688 = vmatprep.subr.bf16.mxu0 %v7687_v53  ;;  %v6212_v53 = vld [vmem:[%s12318_s1 + $0x498] sm:$0xff] }
 0x137   :  { %7690 = vmatpush1.bf16.msra.mxu0 %v7689_v20  ;;  %v6213_v20 = vld [vmem:[%s12318_s1 + $0x4a0] sm:$0xff] }
 0x138   :  { %6179 = vmatprep.subr.msk.mxu0 %vm433_vm4, %v6178_v23  ;;  %v6216_v23 = vld [vmem:[%s12318_s1 + $0x4b8] sm:$0xff] }
 0x13b   :  { %6180 = vmatpush1.msk.msra.mxu0 %vm433_vm4, %v6177_v31  ;;  %v7731_v31 = vpack.c.bf16 %v6222_v34, %v6220_v29 }
 0x13c   :  { %863 = vmatmul.mubr.f32.vlgmr.msra.gmra.mrb[8].mxu0 %v9312_v7  ;;  %7704 = vmatprep.subr.bf16.mxu0 %v7703_v15  ;;  %v6204_v7 = vld [vmem:[%s12318_s1 + $0x458] sm:$0xff]  ;;  %v6219_v15 = vld [vmem:[%s12318_s1 + $0x4d0] sm:$0xff] }
 0x13d   :  { %7706 = vmatpush1.bf16.msra.mxu0 %v7705_v41  ;;  %6182 = vmatprep.mubr.msk.f32.mxu0 %vm420_vm5, %v9336_v33  ;;  %v7713_v33 = vpack.c.bf16 %v6201_v58, %v6199_v57  ;;  %v7715_v60 = vpack.c.bf16 %v6206_v21, %v6204_v7  ;;  %v6221_v41 = vld [vmem:[%s12318_s1 + $0x4e0] sm:$0xff]  ;;  %v6230_v57 = vld [vmem:[%s12318_s1 + $0x528] sm:$0xff]  ;;  %v6227_v21 = vld [vmem:[%s12318_s1 + $0x510] sm:$0xff] }
 0x13e   :  { %7708 = vmatprep.subr.bf16.mxu0 %v7707_v42  ;;  %v6224_v42 = vld [vmem:[%s12318_s1 + $0x4f8] sm:$0xff]  ;;  %v7733_v45 = vpack.c.bf16 %v6221_v41, %v6219_v15 }
 0x13f   :  { %v7735_v48 = vpack.c.bf16 %v6226_v43, %v6224_v42 }
 0x140   :  { %869 = vmatmul.mubr.f32.gmra.mrb[10].mxu0 %v9328_v25  ;;  %v6210_v25 = vld [vmem:[%s12318_s1 + $0x488] sm:$0xff] }
 0x141   :  { %7710 = vmatpush1.bf16.msra.mxu0 %v7709_v52  ;;  %6183 = vmatprep.mubr.msk.f32.mxu0 %vm420_vm5, %v9352_v18  ;;  %v7717_v18 = vpack.c.bf16 %v6205_v30, %v6203_v44  ;;  %v7719_v3 = vpack.c.bf16 %v6210_v25, %v6208_v62  ;;  %v6225_v52 = vld [vmem:[%s12318_s1 + $0x500] sm:$0xff]  ;;  %v6232_v44 = vld [vmem:[%s12318_s1 + $0x538] sm:$0x3]  ;;  %v6231_v30 = vld [vmem:[%s12318_s1 + $0x530] sm:$0x3]  ;;  %v9698_v62 = vsub.s32 0, %v8871_v9 }
 0x142   :  { %7712 = vmatprep.subr.bf16.mxu0 %v7711_v54  ;;  %v6228_v54 = vld [vmem:[%s12318_s1 + $0x518] sm:$0xff]  ;;  %v7737_v58 = vpack.c.bf16 %v6225_v52, %v6223_v16 }
 0x143   :  { %v7739_v7 = vpack.c.bf16 %v6230_v57, %v6228_v54 }
 0x144   :  { %875 = vmatmul.mubr.f32.gmra.mrb[12].mxu0 %v9344_v11  ;;  %v6214_v11 = vld [vmem:[%s12318_s1 + $0x4a8] sm:$0xff] }
 0x145   :  { %7714 = vmatpush1.bf16.msra.mxu0 %v7713_v33  ;;  %6184 = vmatprep.mubr.msk.f32.mxu0 %vm420_vm5, %v9368_v27  ;;  %v7721_v27 = vpack.c.bf16 %v6209_v38, %v6207_v12  ;;  %v7723_v13 = vpack.c.bf16 %v6214_v11, %v6212_v53  ;;  %v6229_v33 = vld [vmem:[%s12318_s1 + $0x520] sm:$0xff] }
 0x146   :  { %7716 = vmatprep.subr.bf16.mxu0 %v7715_v60  ;;  %v7741_v60 = vpack.c.bf16 %v6229_v33, %v6227_v21 }
 0x148   :  { %881 = vmatmul.mubr.f32.gmra.mrb[14].mxu0 %v9360_v50  ;;  %v6218_v50 = vld [vmem:[%s12318_s1 + $0x4c8] sm:$0xff] }
 0x149   :  { %7718 = vmatpush1.bf16.msra.mxu0 %v7717_v18  ;;  %6235 = vmatprep.mubr.msk.f32.mxu0 %vm420_vm5, %v9384_v22  ;;  %v7725_v22 = vpack.c.bf16 %v6213_v20, %v6211_v17  ;;  %v7727_v49 = vpack.c.bf16 %v6218_v50, %v6216_v23 }
 0x14a   :  { %7720 = vmatprep.subr.bf16.mxu0 %v7719_v3 }
 0x14d   :  { %7722 = vmatpush1.bf16.msra.mxu0 %v7721_v27 }
 0x14e   :  { %7724 = vmatprep.subr.bf16.mxu0 %v7723_v13 }
 0x151   :  { %7726 = vmatpush1.bf16.msra.mxu0 %v7725_v22 }
 0x152   :  { %7728 = vmatprep.subr.bf16.mxu0 %v7727_v49 }
 0x155   :  { %7730 = vmatpush1.bf16.msra.mxu0 %v7729_v35 }
 0x156   :  { %7732 = vmatprep.subr.bf16.mxu0 %v7731_v31 }
 0x159   :  { %7734 = vmatpush1.bf16.msra.mxu0 %v7733_v45 }
 0x15a   :  { %7736 = vmatprep.subr.bf16.mxu0 %v7735_v48 }
 0x15d   :  { %7738 = vmatpush1.bf16.msra.mxu0 %v7737_v58 }
 0x15e   :  { %7740 = vmatprep.subr.bf16.mxu0 %v7739_v7 }
 0x161   :  { %7742 = vmatpush1.bf16.msra.mxu0 %v7741_v60 }
 0x162   :  { %6233 = vmatprep.subr.msk.mxu0 %vm433_vm4, %v6232_v44 }
 0x165   :  { %6234 = vmatpush1.msk.msra.mxu0 %vm433_vm4, %v6231_v30 }
 0x166   :  { %1122 = vmatmul.mubr.f32.vlgmr.msra.gmra.mrb[8].mxu0 %v9376_v59  ;;  %v1154_v59 = vld [vmem:[%s12319_s2] ss:$2 sm:$0x3] }
 0x167   :  { %6236 = vmatprep.mubr.msk.f32.mxu0 %vm420_vm5, %v9388_v8  ;;  %v6239_v8 = vld [vmem:[%s12319_s2 + $0x1] ss:$2 sm:$0x3] }
 0x16a   :  { %1128 = vmatmul.mubr.f32.gmra.mrb[10].mxu0 %v9386_v6  ;;  %v9704_v6 = vsub.s32 1, %v8871_v9 }
 0x16b   :  { %6237 = vmatprep.mubr.msk.f32.mxu0 %vm420_vm5, %v9417_v10 }
 0x16c   :  { %v1163_v10 = vrot.slane %v1154_v59, %v9704_v6  ;;  %v1184_v25 = vrot.slane %v6239_v8, %v9704_v6 }
 0x16e   :  { %1134 = vmatmul.mubr.f32.gmra.mrb[12].mxu0 %v9411_v5  ;;  %v1159_v5 = vrot.slane %v1154_v59, %v9698_v62 }
 0x16f   :  { %6238 = vmatprep.mubr.msk.f32.mxu0 %vm420_vm5, %v9435_v26 }
 0x172   :  { %1140 = vmatmul.mubr.f32.gmra.mrb[14].mxu0 %v9432_v51  ;;  %v1180_v51 = vrot.slane %v6239_v8, %v9698_v62 }
 0x173   :  { %1313 = vmatprep.mubr.f32.mxu0 %v8785_v4 }
 0x239   :  { %v1123_v26 = vpop.f32.mrb[8].mxu0 }
 0x23a   :  { %v1166_v18 = vmul.f32 %v1159_v5, %v1123_v26  ;;  %v1125_v3 = vpop.f32.mrb[9].mxu0 }
 0x23b   :  { %v1167_v12 = vmul.f32 %v1163_v10, %v1125_v3 }
 0x23c   :  { %v1187_v38 = vadd.f32 %v1180_v51, %v1166_v18 }
 0x23d   :  { %v1188_v53 = vadd.f32 %v1184_v25, %v1167_v12  ;;  %v1129_v9 = vpop.f32.mrb[10].mxu0 }
 0x23e   :  { %v1168_v11 = vmul.f32 %v1159_v5, %v1129_v9  ;;  %v1131_v27 = vpop.f32.mrb[11].mxu0  ;;  %v1195_v17 = vmax.f32 %v1187_v38, 0.0  ;;  %v6794_v9 = vld [vmem:[%s12322_s5 + $0xe8] sm:$0xff] }
 0x23f   :  { %v1169_v13 = vmul.f32 %v1163_v10, %v1131_v27  ;;  %v1196_v23 = vmax.f32 %v1188_v53, 0.0 }
 0x240   :  { %v1189_v20 = vadd.f32 %v1180_v51, %v1168_v11  ;;  %v1211_v35 = vrot.slane %v1195_v17, 6  ;;  %v6257_v17 = vld [vmem:[%s12320_s3 + $0xf8] sm:$0xff] }
 0x241   :  { %v1190_v50 = vadd.f32 %v1184_v25, %v1169_v13  ;;  %v1135_v22 = vpop.f32.mrb[12].mxu0  ;;  %v1212_v41 = vrot.slane %v1196_v23, 6  ;;  %v6256_v13 = vld [vmem:[%s12320_s3 + $0xf0] sm:$0xff] }
 0x242   :  { %v1197_v49 = vmax.f32 %v1189_v20, 0.0  ;;  %v1170_v2 = vmul.f32 %v1159_v5, %v1135_v22  ;;  %v1137_v28 = vpop.f32.mrb[13].mxu0  ;;  %v8787_v20 = vmov 0.0|0.0   ;;  %v7768_v23 = vpack.c.bf16 %v6257_v17, %v6256_v13  ;;  %v6259_v22 = vld [vmem:[%s12320_s3 + $0x108] sm:$0xff]  ;;  %v6284_v13 = vld [vmem:[%s12320_s3 + $0x1d0] sm:$0xff]  ;;  %v6285_v17 = vld [vmem:[%s12320_s3 + $0x1d8] sm:$0xff] }
 0x243   :  { %v1198_v29 = vmax.f32 %v1190_v50, 0.0  ;;  %v1171_v34 = vmul.f32 %v1163_v10, %v1137_v28  ;;  %v6258_v50 = vld [vmem:[%s12320_s3 + $0x100] sm:$0xff]  ;;  %v6261_v28 = vld [vmem:[%s12320_s3 + $0x118] sm:$0xff] }
 0x244   :  { %v1213_v31 = vrot.slane %v1197_v49, 6  ;;  %v1191_v15 = vadd.f32 %v1180_v51, %v1170_v2  ;;  %v7771_v49 = vpack.c.bf16 %v6259_v22, %v6258_v50  ;;  %v6260_v2 = vld [vmem:[%s12320_s3 + $0x110] sm:$0xff]  ;;  %v1326_v50 = vld [vmem:[%s12320_s3] sm:$0xff]  ;;  %v1327_v22 = vld [vmem:[%s12320_s3 + $0x8] sm:$0xff] }
 0x245   :  { %v1215_v42 = vrot.slane %v1198_v29, 6  ;;  %v1192_v43 = vadd.f32 %v1184_v25, %v1171_v34  ;;  %v1141_v45 = vpop.f32.mrb[14].mxu0  ;;  %v7774_v29 = vpack.c.bf16 %v6261_v28, %v6260_v2  ;;  %v6262_v34 = vld [vmem:[%s12320_s3 + $0x120] sm:$0xff]  ;;  %v7813_v2 = vpack.c.bf16 %v1327_v22, %v1326_v50  ;;  %v1348_v22 = vld [vmem:[%s12320_s3 + $0xb0] sm:$0xff] }
 0x246   :  { %v1214_v48 = vsel %vm433_vm4, %v1211_v35, %v1213_v31  ;;  %v1199_v16 = vmax.f32 %v1191_v15, 0.0  ;;  %v1172_v52 = vmul.f32 %v1159_v5, %v1141_v45  ;;  %v1143_v54 = vpop.f32.mrb[15].mxu0  ;;  %v6264_v15 = vld [vmem:[%s12320_s3 + $0x130] sm:$0xff]  ;;  %v6267_v45 = vld [vmem:[%s12320_s3 + $0x148] sm:$0xff] }
 0x247   :  { %v9715_v57 = vpack.c.bf16 %v1214_v48, %v1211_v35  ;;  %v1216_v58 = vsel %vm433_vm4, %v1212_v41, %v1215_v42  ;;  %v1200_v7 = vmax.f32 %v1192_v43, 0.0  ;;  %v1173_v21 = vmul.f32 %v1163_v10, %v1143_v54  ;;  %v6263_v35 = vld [vmem:[%s12320_s3 + $0x128] sm:$0xff]  ;;  %v6266_v43 = vld [vmem:[%s12320_s3 + $0x140] sm:$0xff] }
 0x248   :  { %v1217_v60 = vrot.slane %v1199_v16, 6  ;;  %v1193_v44 = vadd.f32 %v1180_v51, %v1172_v52  ;;  %v7743_v30 = vpack.c.bf16 %v1216_v58, %v1212_v41  ;;  %v6265_v41 = vld [vmem:[%s12320_s3 + $0x138] sm:$0xff]  ;;  %v7783_v48 = vpack.c.bf16 %v6267_v45, %v6266_v43  ;;  %v6268_v16 = vld [vmem:[%s12320_s3 + $0x150] sm:$0xff]  ;;  %v6271_v58 = vld [vmem:[%s12320_s3 + $0x168] sm:$0xff] }
 0x249   :  { %v1219_v59 = vrot.slane %v1200_v7, 6  ;;  %v1194_v8 = vadd.f32 %v1184_v25, %v1173_v21  ;;  %v6269_v52 = vld [vmem:[%s12320_s3 + $0x158] sm:$0xff]  ;;  %v6272_v21 = vld [vmem:[%s12320_s3 + $0x170] sm:$0xff]  ;;  %v1330_v43 = vld [vmem:[%s12320_s3 + $0x20] sm:$0xff] }
 0x24a   :  { %v1218_v5 = vsel %vm433_vm4, %v1213_v31, %v1217_v60  ;;  %v1201_v26 = vmax.f32 %v1193_v44, 0.0  ;;  %7745 = vmatprep.subr.msk.bf16.mxu0 %vm9719_vm8, %v7743_v30  ;;  %7757 = vmatprep.subr.msk.bf16.mxu1 %vm9719_vm8, %v7743_v30  ;;  %v7777_v31 = vpack.c.bf16 %v6263_v35, %v6262_v34  ;;  %v7786_v54 = vpack.c.bf16 %v6269_v52, %v6268_v16  ;;  %v1328_v34 = vld [vmem:[%s12320_s3 + $0x10] sm:$0xff]  ;;  %v1329_v35 = vld [vmem:[%s12320_s3 + $0x18] sm:$0xff]  ;;  %v1331_v45 = vld [vmem:[%s12320_s3 + $0x28] sm:$0xff] }
 0x24b   :  { %v1220_v10 = vsel %vm433_vm4, %v1215_v42, %v1219_v59  ;;  %v1202_v18 = vmax.f32 %v1194_v8, 0.0  ;;  %7748 = vmatpush1.bf16.msk.msra.mxu0 %vm9719_vm8, %v9715_v57  ;;  %7760 = vmatpush1.bf16.msk.msra.mxu1 %vm9719_vm8, %v9715_v57  ;;  %v7780_v42 = vpack.c.bf16 %v6265_v41, %v6264_v15  ;;  %v7816_v15 = vpack.c.bf16 %v1329_v35, %v1328_v34  ;;  %v1350_v34 = vld [vmem:[%s12320_s3 + $0xc0] sm:$0xff]  ;;  %v1351_v35 = vld [vmem:[%s12320_s3 + $0xc8] sm:$0xff] }
 0x24c   :  { %v1221_v51 = vrot.slane %v1201_v26, 6  ;;  %v6277_v26 = vld [vmem:[%s12320_s3 + $0x198] sm:$0xff]  ;;  %v7819_v52 = vpack.c.bf16 %v1331_v45, %v1330_v43  ;;  %v1352_v43 = vld [vmem:[%s12320_s3 + $0xd0] sm:$0xff] }
 0x24d   :  { %v1223_v25 = vrot.slane %v1202_v18, 6  ;;  %v6278_v18 = vld [vmem:[%s12320_s3 + $0x1a0] sm:$0xff]  ;;  %v1353_v45 = vld [vmem:[%s12320_s3 + $0xd8] sm:$0xff] }
 0x24e   :  { %v1222_v3 = vsel %vm433_vm4, %v1217_v60, %v1221_v51  ;;  %v6273_v60 = vld [vmem:[%s12320_s3 + $0x178] sm:$0xff]  ;;  %v6279_v51 = vld [vmem:[%s12320_s3 + $0x1a8] sm:$0xff] }
 0x24f   :  { %v1236_v12 = vsel %vm1235_vm9, %v1222_v3, 0.0  ;;  %v1224_v38 = vsel %vm433_vm4, %v1219_v59, %v1223_v25  ;;  %v7792_v44 = vpack.c.bf16 %v6273_v60, %v6272_v21  ;;  %v6275_v59 = vld [vmem:[%s12320_s3 + $0x188] sm:$0xff]  ;;  %v7801_v25 = vpack.c.bf16 %v6279_v51, %v6278_v18  ;;  %v6280_v3 = vld [vmem:[%s12320_s3 + $0x1b0] sm:$0xff]  ;;  %v1334_v60 = vld [vmem:[%s12320_s3 + $0x40] sm:$0xff] }
 0x250   :  { %v7752_v53 = vpack.c.bf16 %v1236_v12, %v1218_v5  ;;  %v1237_v11 = vsel %vm1235_vm9, %v1224_v38, 0.0  ;;  %v6276_v5 = vld [vmem:[%s12320_s3 + $0x190] sm:$0xff]  ;;  %v6281_v12 = vld [vmem:[%s12320_s3 + $0x1b8] sm:$0xff] }
 0x251   :  { %v7749_v27 = vpack.c.bf16 %v1237_v11, %v1220_v10  ;;  %v7798_v10 = vpack.c.bf16 %v6277_v26, %v6276_v5  ;;  %v7804_v38 = vpack.c.bf16 %v6281_v12, %v6280_v3  ;;  %v6283_v11 = vld [vmem:[%s12320_s3 + $0x1c8] sm:$0xff]  ;;  %v1338_v26 = vld [vmem:[%s12320_s3 + $0x60] sm:$0xff]  ;;  %v1340_v51 = vld [vmem:[%s12320_s3 + $0x70] sm:$0xff] }
 0x252   :  { %v1342_v12 = vld [vmem:[%s12320_s3 + $0x80] sm:$0xff] }
 0x253   :  { %7751 = vmatprep.subr.msk.bf16.mxu0 %vm9740_vm10, %v7749_v27  ;;  %7763 = vmatprep.subr.msk.bf16.mxu1 %vm9740_vm10, %v7749_v27 }
 0x254   :  { %7754 = vmatpush1.bf16.msk.msra.mxu0 %vm9740_vm10, %v7752_v53  ;;  %7766 = vmatpush1.bf16.msk.msra.mxu1 %vm9740_vm10, %v7752_v53 }
 0x255   :  { %7859 = vmatprep.subr.msk.bf16.mxu0 %vm9719_vm8, %v7743_v30  ;;  %7767 = vmatprep.subr.bf16.mxu1 %v8787_v20 }
 0x257   :  { %6254 = vmatmul.mubr.msk.f32.vlgmr.msra.gmra.mrb[24].mxu1 %vm1238_vm11, %v8957_v36  ;;  %6246 = vmatmul.mubr.msk.f32.vlgmr.msra.gmra.mrb[16].mxu0 %vm1238_vm11, %v8960_v37 }
 0x258   :  { %7862 = vmatpush1.bf16.msk.msra.mxu0 %vm9719_vm8, %v9715_v57  ;;  %1319 = vmatprep.mubr.f32.mxu0 %v8785_v4 }
 0x259   :  { %7865 = vmatprep.subr.msk.bf16.mxu0 %vm9740_vm10, %v7749_v27  ;;  %1430 = vmatprep.mubr.f32.mxu1 %v8785_v4 }
 0x25a   :  { %7769 = vmatpush1.bf16.msra.mxu1 %v7768_v23  ;;  %v7810_v23 = vpack.c.bf16 %v6285_v17, %v6284_v13  ;;  %v1346_v17 = vld [vmem:[%s12320_s3 + $0xa0] sm:$0xff] }
 0x25b   :  { %6247 = vmatmul.mubr.msk.f32.gmra.mrb[18].mxu0 %vm1238_vm11, %v8994_v47  ;;  %6255 = vmatmul.mubr.msk.f32.gmra.mrb[26].mxu1 %vm1238_vm11, %v8990_v46 }
 0x25c   :  { %7868 = vmatpush1.bf16.msk.msra.mxu0 %vm9740_vm10, %v7752_v53  ;;  %1699 = vmatprep.mubr.f32.mxu0 %v8785_v4 }
 0x25d   :  { %7916 = vmatprep.subr.msk.bf16.mxu0 %vm9719_vm8, %v7743_v30  ;;  %7770 = vmatprep.subr.bf16.mxu1 %v8787_v20  ;;  %v6274_v30 = vld [vmem:[%s12320_s3 + $0x180] sm:$0xff] }
 0x25e   :  { %7772 = vmatpush1.bf16.msra.mxu1 %v7771_v49  ;;  %v7795_v8 = vpack.c.bf16 %v6275_v59, %v6274_v30  ;;  %v1336_v59 = vld [vmem:[%s12320_s3 + $0x50] sm:$0xff] }
 0x25f   :  { %6296 = vmatmul.mubr.msk.f32.vlgmr.msra.gmra.mrb[20].mxu0 %vm1238_vm11, %v9087_v14  ;;  %7773 = vmatprep.subr.bf16.mxu1 %v8787_v20 }
 0x260   :  { %7919 = vmatpush1.bf16.msk.msra.mxu0 %vm9719_vm8, %v9715_v57  ;;  %1705 = vmatprep.mubr.f32.mxu0 %v8785_v4  ;;  %v6270_v57 = vld [vmem:[%s12320_s3 + $0x160] sm:$0xff] }
 0x261   :  { %7922 = vmatprep.subr.msk.bf16.mxu0 %vm9740_vm10, %v7749_v27  ;;  %v7789_v7 = vpack.c.bf16 %v6271_v58, %v6270_v57  ;;  %v1332_v57 = vld [vmem:[%s12320_s3 + $0x30] sm:$0xff]  ;;  %v1333_v58 = vld [vmem:[%s12320_s3 + $0x38] sm:$0xff] }
 0x262   :  { %7775 = vmatpush1.bf16.msra.mxu1 %v7774_v29  ;;  %v7822_v21 = vpack.c.bf16 %v1333_v58, %v1332_v57  ;;  %v1354_v58 = vld [vmem:[%s12320_s3 + $0xe0] sm:$0xff] }
 0x263   :  { %7776 = vmatprep.subr.bf16.mxu1 %v8787_v20  ;;  %6297 = vmatmul.mubr.msk.f32.gmra.mrb[22].mxu0 %vm1238_vm11, %v9110_v32 }
 0x264   :  { %7925 = vmatpush1.bf16.msk.msra.mxu0 %vm9740_vm10, %v7752_v53  ;;  %1894 = vmatprep.mubr.f32.mxu0 %v8785_v4  ;;  %v6282_v53 = vld [vmem:[%s12320_s3 + $0x1c0] sm:$0xff] }
 0x265   :  { %7971 = vmatprep.subr.bf16.mxu0 %v8787_v20  ;;  %v7807_v27 = vpack.c.bf16 %v6283_v11, %v6282_v53  ;;  %v1344_v11 = vld [vmem:[%s12320_s3 + $0x90] sm:$0xff] }
 0x266   :  { %7778 = vmatpush1.bf16.msra.mxu1 %v7777_v31 }
 0x267   :  { %7779 = vmatprep.subr.bf16.mxu1 %v8787_v20  ;;  %6336 = vmatmul.mubr.msk.f32.vlgmr.msra.gmra.mrb[24].mxu0 %vm1238_vm11, %v9179_v24 }
 0x268   :  { %1900 = vmatprep.mubr.f32.mxu0 %v8785_v4 }
 0x26a   :  { %7781 = vmatpush1.bf16.msra.mxu1 %v7780_v42 }
 0x26b   :  { %7782 = vmatprep.subr.bf16.mxu1 %v8787_v20  ;;  %6337 = vmatmul.mubr.msk.f32.gmra.mrb[26].mxu0 %vm1238_vm11, %v9199_v61 }
 0x26c   :  { %7073 = vmatprep.mubr.msk.f32.mxu0 %vm8788_vm13, %v8785_v4 }
 0x26e   :  { %7784 = vmatpush1.bf16.msra.mxu1 %v7783_v48 }
 0x26f   :  { %7785 = vmatprep.subr.bf16.mxu1 %v8787_v20 }
 0x272   :  { %7787 = vmatpush1.bf16.msra.mxu1 %v7786_v54 }
 0x273   :  { %7788 = vmatprep.subr.bf16.mxu1 %v8787_v20 }
 0x276   :  { %7790 = vmatpush1.bf16.msra.mxu1 %v7789_v7 }
 0x277   :  { %7791 = vmatprep.subr.bf16.mxu1 %v8787_v20 }
 0x27a   :  { %7793 = vmatpush1.bf16.msra.mxu1 %v7792_v44  ;;  %v1335_v44 = vld [vmem:[%s12320_s3 + $0x48] sm:$0xff] }
 0x27b   :  { %7794 = vmatprep.subr.bf16.mxu1 %v8787_v20  ;;  %v7825_v30 = vpack.c.bf16 %v1335_v44, %v1334_v60 }
 0x27e   :  { %7796 = vmatpush1.bf16.msra.mxu1 %v7795_v8  ;;  %v1337_v8 = vld [vmem:[%s12320_s3 + $0x58] sm:$0xff] }
 0x27f   :  { %7797 = vmatprep.subr.bf16.mxu1 %v8787_v20  ;;  %v7828_v5 = vpack.c.bf16 %v1337_v8, %v1336_v59  ;;  %v6299_v59 = vld [vmem:[%s12320_s3 + $0x1e8] sm:$0xff] }
 0x282   :  { %7799 = vmatpush1.bf16.msra.mxu1 %v7798_v10  ;;  %v1339_v10 = vld [vmem:[%s12320_s3 + $0x68] sm:$0xff] }
 0x283   :  { %7800 = vmatprep.subr.bf16.mxu1 %v8787_v20  ;;  %v7831_v18 = vpack.c.bf16 %v1339_v10, %v1338_v26  ;;  %v6301_v26 = vld [vmem:[%s12320_s3 + $0x1f8] sm:$0xff] }
 0x286   :  { %7802 = vmatpush1.bf16.msra.mxu1 %v7801_v25  ;;  %v1341_v25 = vld [vmem:[%s12320_s3 + $0x78] sm:$0xff] }
 0x287   :  { %7803 = vmatprep.subr.bf16.mxu1 %v8787_v20  ;;  %v7834_v3 = vpack.c.bf16 %v1341_v25, %v1340_v51  ;;  %v6303_v51 = vld [vmem:[%s12320_s3 + $0x208] sm:$0xff] }
 0x28a   :  { %7805 = vmatpush1.bf16.msra.mxu1 %v7804_v38  ;;  %v1343_v38 = vld [vmem:[%s12320_s3 + $0x88] sm:$0xff] }
 0x28b   :  { %7806 = vmatprep.subr.bf16.mxu1 %v8787_v20  ;;  %v7837_v53 = vpack.c.bf16 %v1343_v38, %v1342_v12  ;;  %v6308_v38 = vld [vmem:[%s12320_s3 + $0x230] sm:$0xff] }
 0x28e   :  { %7808 = vmatpush1.bf16.msra.mxu1 %v7807_v27  ;;  %v1345_v27 = vld [vmem:[%s12320_s3 + $0x98] sm:$0xff] }
 0x28f   :  { %7809 = vmatprep.subr.bf16.mxu1 %v8787_v20  ;;  %v7840_v13 = vpack.c.bf16 %v1345_v27, %v1344_v11  ;;  %v6310_v27 = vld [vmem:[%s12320_s3 + $0x240] sm:$0xff] }
 0x292   :  { %7811 = vmatpush1.bf16.msra.mxu1 %v7810_v23  ;;  %v1347_v23 = vld [vmem:[%s12320_s3 + $0xa8] sm:$0xff] }
 0x293   :  { %7812 = vmatprep.subr.bf16.mxu1 %v8787_v20  ;;  %v7843_v50 = vpack.c.bf16 %v1347_v23, %v1346_v17  ;;  %v6312_v23 = vld [vmem:[%s12320_s3 + $0x250] sm:$0xff] }
 0x32a   :  { %v1426_v49 = vpop.f32.mrb[24].mxu1  ;;  %v9906_v28 = vpop.f32.mrb[16].mxu0 }
 0x32b   :  { %v1428_v29 = vpop.f32.mrb[25].mxu1  ;;  %v1317_v31 = vpop.f32.mrb[17].mxu0 }
 0x32c   :  { %6286 = vmatprep.mubr.msk.f32.mxu1 %vm1468_vm12, %v1428_v29 }
 0x32d   :  { %1540 = vmatmul.mubr.f32.vlgmr.msra.gmra.mrb[28].mxu1 %v1426_v49  ;;  %v1349_v49 = vld [vmem:[%s12320_s3 + $0xb8] sm:$0xff] }
 0x32e   :  { %7814 = vmatpush1.bf16.msra.mxu1 %v7813_v2  ;;  %v1432_v41 = vpop.f32.mrb[26].mxu1  ;;  %v9915_v42 = vpop.f32.mrb[18].mxu0  ;;  %v7846_v2 = vpack.c.bf16 %v1349_v49, %v1348_v22  ;;  %v6314_v49 = vld [vmem:[%s12320_s3 + $0x260] sm:$0xff] }
 0x32f   :  { %7815 = vmatprep.subr.bf16.mxu1 %v8787_v20  ;;  %v1434_v48 = vpop.f32.mrb[27].mxu1  ;;  %v9924_v16 = vpop.f32.mrb[19].mxu0 }
 0x330   :  { %6287 = vmatprep.mubr.msk.f32.mxu1 %vm1468_vm12, %v1434_v48 }
 0x331   :  { %1545 = vmatmul.mubr.f32.gmra.mrb[30].mxu1 %v1432_v41 }
 0x332   :  { %7817 = vmatpush1.bf16.msra.mxu1 %v7816_v15  ;;  %6288 = vmatprep.mubr.msk.f32.mxu1 %vm1468_vm12, %v1317_v31  ;;  %v9928_v54 = vpop.f32.mrb[20].mxu0  ;;  %v7849_v15 = vpack.c.bf16 %v1351_v35, %v1350_v34  ;;  %v6316_v35 = vld [vmem:[%s12320_s3 + $0x270] sm:$0xff] }
 0x333   :  { %7818 = vmatprep.subr.bf16.mxu1 %v8787_v20  ;;  %v9937_v7 = vpop.f32.mrb[21].mxu0 }
 0x336   :  { %7820 = vmatpush1.bf16.msra.mxu1 %v7819_v52  ;;  %v9995_v29 = vpop.f32.mrb[22].mxu0  ;;  %v7852_v52 = vpack.c.bf16 %v1353_v45, %v1352_v43  ;;  %v6318_v45 = vld [vmem:[%s12320_s3 + $0x280] sm:$0xff] }
 0x337   :  { %7821 = vmatprep.subr.bf16.mxu1 %v8787_v20  ;;  %v10004_v31 = vpop.f32.mrb[23].mxu0 }
 0x33a   :  { %7823 = vmatpush1.bf16.msra.mxu1 %v7822_v21  ;;  %v10006_v41 = vpop.f32.mrb[24].mxu0  ;;  %v1355_v21 = vld [vmem:[%s12320_s3 + $0xe8] sm:$0xff] }
 0x33b   :  { %7824 = vmatprep.subr.bf16.mxu1 %v8787_v20  ;;  %v10015_v48 = vpop.f32.mrb[25].mxu0  ;;  %v7855_v44 = vpack.c.bf16 %v1355_v21, %v1354_v58  ;;  %v6320_v21 = vld [vmem:[%s12320_s3 + $0x290] sm:$0xff] }
 0x33e   :  { %7826 = vmatpush1.bf16.msra.mxu1 %v7825_v30  ;;  %v10017_v57 = vpop.f32.mrb[26].mxu0  ;;  %v6298_v30 = vld [vmem:[%s12320_s3 + $0x1e0] sm:$0xff] }
 0x33f   :  { %7827 = vmatprep.subr.bf16.mxu1 %v8787_v20  ;;  %v10026_v60 = vpop.f32.mrb[27].mxu0  ;;  %v7870_v8 = vpack.c.bf16 %v6299_v59, %v6298_v30  ;;  %v6322_v59 = vld [vmem:[%s12320_s3 + $0x2a0] sm:$0xff] }
 0x342   :  { %7829 = vmatpush1.bf16.msra.mxu1 %v7828_v5  ;;  %v6300_v5 = vld [vmem:[%s12320_s3 + $0x1f0] sm:$0xff] }
 0x343   :  { %7830 = vmatprep.subr.bf16.mxu1 %v8787_v20  ;;  %v7873_v10 = vpack.c.bf16 %v6301_v26, %v6300_v5  ;;  %v6324_v26 = vld [vmem:[%s12320_s3 + $0x2b0] sm:$0xff] }
 0x346   :  { %7832 = vmatpush1.bf16.msra.mxu1 %v7831_v18  ;;  %v6302_v18 = vld [vmem:[%s12320_s3 + $0x200] sm:$0xff] }
 0x347   :  { %7833 = vmatprep.subr.bf16.mxu1 %v8787_v20  ;;  %v7876_v25 = vpack.c.bf16 %v6303_v51, %v6302_v18  ;;  %v6326_v51 = vld [vmem:[%s12320_s3 + $0x2c0] sm:$0xff] }
 0x34a   :  { %7835 = vmatpush1.bf16.msra.mxu1 %v7834_v3 }
 0x34b   :  { %7836 = vmatprep.subr.bf16.mxu1 %v8787_v20 }
 0x34e   :  { %7838 = vmatpush1.bf16.msra.mxu1 %v7837_v53  ;;  %v6309_v53 = vld [vmem:[%s12320_s3 + $0x238] sm:$0xff] }
 0x34f   :  { %7839 = vmatprep.subr.bf16.mxu1 %v8787_v20  ;;  %v7885_v11 = vpack.c.bf16 %v6309_v53, %v6308_v38  ;;  %v6342_v53 = vld [vmem:[%s12320_s3 + $0x2f0] sm:$0xff] }
 0x352   :  { %7841 = vmatpush1.bf16.msra.mxu1 %v7840_v13  ;;  %v6311_v13 = vld [vmem:[%s12320_s3 + $0x248] sm:$0xff] }
 0x353   :  { %7842 = vmatprep.subr.bf16.mxu1 %v8787_v20  ;;  %v7888_v17 = vpack.c.bf16 %v6311_v13, %v6310_v27 }
 0x356   :  { %7844 = vmatpush1.bf16.msra.mxu1 %v7843_v50  ;;  %v6313_v50 = vld [vmem:[%s12320_s3 + $0x258] sm:$0xff] }
 0x357   :  { %7845 = vmatprep.subr.bf16.mxu1 %v8787_v20  ;;  %v7891_v22 = vpack.c.bf16 %v6313_v50, %v6312_v23  ;;  %v6348_v23 = vld [vmem:[%s12320_s3 + $0x320] sm:$0xff]  ;;  %v6349_v50 = vld [vmem:[%s12320_s3 + $0x328] sm:$0xff] }
 0x35a   :  { %7847 = vmatpush1.bf16.msra.mxu1 %v7846_v2  ;;  %v6315_v2 = vld [vmem:[%s12320_s3 + $0x268] sm:$0xff] }
 0x35b   :  { %7848 = vmatprep.subr.bf16.mxu1 %v8787_v20  ;;  %v7894_v34 = vpack.c.bf16 %v6315_v2, %v6314_v49  ;;  %v6350_v49 = vld [vmem:[%s12320_s3 + $0x330] sm:$0xff]  ;;  %v6351_v2 = vld [vmem:[%s12320_s3 + $0x338] sm:$0xff] }
 0x35e   :  { %7850 = vmatpush1.bf16.msra.mxu1 %v7849_v15  ;;  %v6317_v15 = vld [vmem:[%s12320_s3 + $0x278] sm:$0xff] }
 0x35f   :  { %7851 = vmatprep.subr.bf16.mxu1 %v8787_v20  ;;  %v7897_v43 = vpack.c.bf16 %v6317_v15, %v6316_v35  ;;  %v6352_v35 = vld [vmem:[%s12320_s3 + $0x340] sm:$0xff]  ;;  %v6353_v15 = vld [vmem:[%s12320_s3 + $0x348] sm:$0xff] }
 0x362   :  { %7853 = vmatpush1.bf16.msra.mxu1 %v7852_v52  ;;  %v6319_v52 = vld [vmem:[%s12320_s3 + $0x288] sm:$0xff] }
 0x363   :  { %7854 = vmatprep.subr.bf16.mxu1 %v8787_v20  ;;  %v7900_v58 = vpack.c.bf16 %v6319_v52, %v6318_v45  ;;  %v6354_v45 = vld [vmem:[%s12320_s3 + $0x350] sm:$0xff]  ;;  %v6355_v52 = vld [vmem:[%s12320_s3 + $0x358] sm:$0xff] }
 0x366   :  { %7856 = vmatpush1.bf16.msra.mxu1 %v7855_v44  ;;  %v6321_v44 = vld [vmem:[%s12320_s3 + $0x298] sm:$0xff] }
 0x367   :  { %7869 = vmatprep.subr.bf16.mxu1 %v8787_v20  ;;  %v7903_v30 = vpack.c.bf16 %v6321_v44, %v6320_v21  ;;  %v6356_v21 = vld [vmem:[%s12320_s3 + $0x360] sm:$0xff]  ;;  %v6357_v44 = vld [vmem:[%s12320_s3 + $0x368] sm:$0xff] }
 0x369   :  { %1621 = vmatmul.mubr.f32.vlgmr.msra.gmra.mrb[28].mxu1 %v9906_v28  ;;  %v6304_v28 = vld [vmem:[%s12320_s3 + $0x210] sm:$0xff] }
 0x36a   :  { %7871 = vmatpush1.bf16.msra.mxu1 %v7870_v8  ;;  %6289 = vmatprep.mubr.msk.f32.mxu1 %vm1468_vm12, %v9924_v16  ;;  %v6305_v16 = vld [vmem:[%s12320_s3 + $0x218] sm:$0xff]  ;;  %v6323_v8 = vld [vmem:[%s12320_s3 + $0x2a8] sm:$0xff] }
 0x36b   :  { %7872 = vmatprep.subr.bf16.mxu1 %v8787_v20  ;;  %v7879_v3 = vpack.c.bf16 %v6305_v16, %v6304_v28  ;;  %v7906_v5 = vpack.c.bf16 %v6323_v8, %v6322_v59  ;;  %v6338_v16 = vld [vmem:[%s12320_s3 + $0x2d0] sm:$0xff]  ;;  %v6359_v8 = vld [vmem:[%s12320_s3 + $0x378] sm:$0xff] }
 0x36c   :  { %v6358_v59 = vld [vmem:[%s12320_s3 + $0x370] sm:$0xff] }
 0x36d   :  { %1626 = vmatmul.mubr.f32.gmra.mrb[30].mxu1 %v9915_v42  ;;  %v6306_v42 = vld [vmem:[%s12320_s3 + $0x220] sm:$0xff] }
 0x36e   :  { %7874 = vmatpush1.bf16.msra.mxu1 %v7873_v10  ;;  %6328 = vmatprep.mubr.msk.f32.mxu1 %vm1468_vm12, %v9937_v7  ;;  %v6307_v7 = vld [vmem:[%s12320_s3 + $0x228] sm:$0xff]  ;;  %v6325_v10 = vld [vmem:[%s12320_s3 + $0x2b8] sm:$0xff] }
 0x36f   :  { %7875 = vmatprep.subr.bf16.mxu1 %v8787_v20  ;;  %v7882_v12 = vpack.c.bf16 %v6307_v7, %v6306_v42  ;;  %v7909_v18 = vpack.c.bf16 %v6325_v10, %v6324_v26  ;;  %v6340_v7 = vld [vmem:[%s12320_s3 + $0x2e0] sm:$0xff]  ;;  %v6361_v10 = vld [vmem:[%s12320_s3 + $0x388] sm:$0xff] }
 0x370   :  { %v6360_v26 = vld [vmem:[%s12320_s3 + $0x380] sm:$0xff] }
 0x372   :  { %7877 = vmatpush1.bf16.msra.mxu1 %v7876_v25  ;;  %v6327_v25 = vld [vmem:[%s12320_s3 + $0x2c8] sm:$0xff] }
 0x373   :  { %7878 = vmatprep.subr.bf16.mxu1 %v8787_v20  ;;  %v7912_v28 = vpack.c.bf16 %v6327_v25, %v6326_v51  ;;  %v6362_v51 = vld [vmem:[%s12320_s3 + $0x390] sm:$0xff]  ;;  %v6363_v25 = vld [vmem:[%s12320_s3 + $0x398] sm:$0xff] }
 0x376   :  { %7880 = vmatpush1.bf16.msra.mxu1 %v7879_v3  ;;  %v6339_v3 = vld [vmem:[%s12320_s3 + $0x2d8] sm:$0xff] }
 0x377   :  { %7881 = vmatprep.subr.bf16.mxu1 %v8787_v20  ;;  %v7927_v42 = vpack.c.bf16 %v6339_v3, %v6338_v16  ;;  %v6364_v16 = vld [vmem:[%s12320_s3 + $0x3a0] sm:$0xff]  ;;  %v6365_v3 = vld [vmem:[%s12320_s3 + $0x3a8] sm:$0xff] }
 0x37a   :  { %7883 = vmatpush1.bf16.msra.mxu1 %v7882_v12  ;;  %v6341_v12 = vld [vmem:[%s12320_s3 + $0x2e8] sm:$0xff] }
 0x37b   :  { %7884 = vmatprep.subr.bf16.mxu1 %v8787_v20  ;;  %v7930_v38 = vpack.c.bf16 %v6341_v12, %v6340_v7  ;;  %v6366_v7 = vld [vmem:[%s12320_s3 + $0x3b0] sm:$0xff]  ;;  %v6367_v12 = vld [vmem:[%s12320_s3 + $0x3b8] sm:$0xff] }
 0x37e   :  { %7886 = vmatpush1.bf16.msra.mxu1 %v7885_v11  ;;  %v6343_v11 = vld [vmem:[%s12320_s3 + $0x2f8] sm:$0xff] }
 0x37f   :  { %7887 = vmatprep.subr.bf16.mxu1 %v8787_v20  ;;  %v7933_v27 = vpack.c.bf16 %v6343_v11, %v6342_v53  ;;  %v6370_v53 = vld [vmem:[%s12321_s4] ss:$0 sm:$0xff] }
 0x382   :  { %7889 = vmatpush1.bf16.msra.mxu1 %v7888_v17 }
 0x383   :  { %7890 = vmatprep.subr.bf16.mxu1 %v8787_v20 }
 0x386   :  { %7892 = vmatpush1.bf16.msra.mxu1 %v7891_v22  ;;  %v7942_v22 = vpack.c.bf16 %v6349_v50, %v6348_v23  ;;  %v6376_v50 = vld [vmem:[%s12322_s5 + $0x70] sm:$0xff] }
 0x387   :  { %7893 = vmatprep.subr.bf16.mxu1 %v8787_v20 }
 0x38a   :  { %7895 = vmatpush1.bf16.msra.mxu1 %v7894_v34  ;;  %v7945_v34 = vpack.c.bf16 %v6351_v2, %v6350_v49  ;;  %v6378_v2 = vld [vmem:[%s12322_s5 + $0x80] sm:$0xff] }
 0x38b   :  { %7896 = vmatprep.subr.bf16.mxu1 %v8787_v20 }
 0x38e   :  { %7898 = vmatpush1.bf16.msra.mxu1 %v7897_v43  ;;  %v7948_v43 = vpack.c.bf16 %v6353_v15, %v6352_v35  ;;  %v6380_v15 = vld [vmem:[%s12322_s5 + $0x90] sm:$0xff] }
 0x38f   :  { %7899 = vmatprep.subr.bf16.mxu1 %v8787_v20 }
 0x392   :  { %7901 = vmatpush1.bf16.msra.mxu1 %v7900_v58  ;;  %v7951_v58 = vpack.c.bf16 %v6355_v52, %v6354_v45  ;;  %v6382_v52 = vld [vmem:[%s12322_s5 + $0xa0] sm:$0xff] }
 0x393   :  { %7902 = vmatprep.subr.bf16.mxu1 %v8787_v20 }
 0x396   :  { %7904 = vmatpush1.bf16.msra.mxu1 %v7903_v30  ;;  %v7954_v30 = vpack.c.bf16 %v6357_v44, %v6356_v21  ;;  %v6384_v44 = vld [vmem:[%s12322_s5 + $0xb0] sm:$0xff] }
 0x397   :  { %7905 = vmatprep.subr.bf16.mxu1 %v8787_v20 }
 0x39a   :  { %7907 = vmatpush1.bf16.msra.mxu1 %v7906_v5  ;;  %v7957_v5 = vpack.c.bf16 %v6359_v8, %v6358_v59  ;;  %v6386_v8 = vld [vmem:[%s12322_s5 + $0xc0] sm:$0xff] }
 0x39b   :  { %7908 = vmatprep.subr.bf16.mxu1 %v8787_v20 }
 0x39e   :  { %7910 = vmatpush1.bf16.msra.mxu1 %v7909_v18  ;;  %v7960_v18 = vpack.c.bf16 %v6361_v10, %v6360_v26  ;;  %v6388_v10 = vld [vmem:[%s12322_s5 + $0xd0] sm:$0xff] }
 0x39f   :  { %7911 = vmatprep.subr.bf16.mxu1 %v8787_v20 }
 0x3a2   :  { %7913 = vmatpush1.bf16.msra.mxu1 %v7912_v28  ;;  %v7963_v28 = vpack.c.bf16 %v6363_v25, %v6362_v51  ;;  %v2113_v25 = vld [vmem:[%s12322_s5] sm:$0xff] }
 0x3a3   :  { %7926 = vmatprep.subr.bf16.mxu1 %v8787_v20 }
 0x3a5   :  { %1814 = vmatmul.mubr.f32.vlgmr.msra.gmra.mrb[28].mxu1 %v9928_v54  ;;  %v6344_v54 = vld [vmem:[%s12320_s3 + $0x300] sm:$0xff] }
 0x3a6   :  { %7928 = vmatpush1.bf16.msra.mxu1 %v7927_v42  ;;  %6329 = vmatprep.mubr.msk.f32.mxu1 %vm1468_vm12, %v10004_v31  ;;  %v6345_v31 = vld [vmem:[%s12320_s3 + $0x308] sm:$0xff]  ;;  %v7966_v42 = vpack.c.bf16 %v6365_v3, %v6364_v16 }
 0x3a7   :  { %7929 = vmatprep.subr.bf16.mxu1 %v8787_v20  ;;  %v7936_v13 = vpack.c.bf16 %v6345_v31, %v6344_v54 }
 0x3a9   :  { %1819 = vmatmul.mubr.f32.gmra.mrb[30].mxu1 %v9995_v29  ;;  %v6346_v29 = vld [vmem:[%s12320_s3 + $0x310] sm:$0xff] }
 0x3aa   :  { %7931 = vmatpush1.bf16.msra.mxu1 %v7930_v38  ;;  %6368 = vmatprep.mubr.msk.f32.mxu1 %vm1468_vm12, %v10015_v48  ;;  %v6347_v48 = vld [vmem:[%s12320_s3 + $0x318] sm:$0xff]  ;;  %v7969_v38 = vpack.c.bf16 %v6367_v12, %v6366_v7  ;;  %v2115_v7 = vld [vmem:[%s12322_s5 + $0x10] sm:$0xff] }
 0x3ab   :  { %7932 = vmatprep.subr.bf16.mxu1 %v8787_v20  ;;  %v7939_v17 = vpack.c.bf16 %v6347_v48, %v6346_v29  ;;  %v2116_v12 = vld [vmem:[%s12322_s5 + $0x18] sm:$0xff] }
 0x3ae   :  { %7934 = vmatpush1.bf16.msra.mxu1 %v7933_v27 }
 0x3af   :  { %7935 = vmatprep.subr.bf16.mxu1 %v8787_v20 }
 0x3b2   :  { %7937 = vmatpush1.bf16.msra.mxu1 %v7936_v13 }
 0x3b3   :  { %7938 = vmatprep.subr.bf16.mxu1 %v8787_v20 }
 0x3b6   :  { %7940 = vmatpush1.bf16.msra.mxu1 %v7939_v17 }
 0x3b7   :  { %7941 = vmatprep.subr.bf16.mxu1 %v8787_v20 }
 0x3ba   :  { %7943 = vmatpush1.bf16.msra.mxu1 %v7942_v22  ;;  %v6377_v22 = vld [vmem:[%s12322_s5 + $0x78] sm:$0xff] }
 0x3bb   :  { %7944 = vmatprep.subr.bf16.mxu1 %v8787_v20  ;;  %v7980_v49 = vpack.c.bf16 %v6377_v22, %v6376_v50  ;;  %v2124_v50 = vld [vmem:[%s12322_s5 + $0x58] sm:$0xff] }
 0x3be   :  { %7946 = vmatpush1.bf16.msra.mxu1 %v7945_v34  ;;  %v6379_v34 = vld [vmem:[%s12322_s5 + $0x88] sm:$0xff] }
 0x3bf   :  { %7947 = vmatprep.subr.bf16.mxu1 %v8787_v20  ;;  %v7983_v35 = vpack.c.bf16 %v6379_v34, %v6378_v2  ;;  %v2126_v2 = vld [vmem:[%s12322_s5 + $0x68] sm:$0xff] }
 0x3c2   :  { %7949 = vmatpush1.bf16.msra.mxu1 %v7948_v43  ;;  %v6381_v43 = vld [vmem:[%s12322_s5 + $0x98] sm:$0xff] }
 0x3c3   :  { %7950 = vmatprep.subr.bf16.mxu1 %v8787_v20  ;;  %v7986_v45 = vpack.c.bf16 %v6381_v43, %v6380_v15  ;;  %v6395_v15 = vld [vmem:[%s12322_s5 + $0xe8] sm:$0xff] }
 0x3c6   :  { %7952 = vmatpush1.bf16.msra.mxu1 %v7951_v58  ;;  %v6383_v58 = vld [vmem:[%s12322_s5 + $0xa8] sm:$0xff] }
 0x3c7   :  { %7953 = vmatprep.subr.bf16.mxu1 %v8787_v20  ;;  %v7989_v21 = vpack.c.bf16 %v6383_v58, %v6382_v52  ;;  %v6398_v58 = vld [vmem:[%s12322_s5 + $0x100] sm:$0xff] }
 0x3ca   :  { %7955 = vmatpush1.bf16.msra.mxu1 %v7954_v30  ;;  %v6385_v30 = vld [vmem:[%s12322_s5 + $0xb8] sm:$0xff] }
 0x3cb   :  { %7956 = vmatprep.subr.bf16.mxu1 %v8787_v20  ;;  %v7992_v59 = vpack.c.bf16 %v6385_v30, %v6384_v44  ;;  %v6400_v30 = vld [vmem:[%s12322_s5 + $0x110] sm:$0xff] }
 0x3ce   :  { %7958 = vmatpush1.bf16.msra.mxu1 %v7957_v5  ;;  %v6387_v5 = vld [vmem:[%s12322_s5 + $0xc8] sm:$0xff] }
 0x3cf   :  { %7959 = vmatprep.subr.bf16.mxu1 %v8787_v20  ;;  %v7995_v26 = vpack.c.bf16 %v6387_v5, %v6386_v8  ;;  %v6402_v5 = vld [vmem:[%s12322_s5 + $0x120] sm:$0xff] }
 0x3d2   :  { %7961 = vmatpush1.bf16.msra.mxu1 %v7960_v18  ;;  %v6389_v18 = vld [vmem:[%s12322_s5 + $0xd8] sm:$0xff] }
 0x3d3   :  { %7962 = vmatprep.subr.bf16.mxu1 %v8787_v20  ;;  %v7998_v51 = vpack.c.bf16 %v6389_v18, %v6388_v10  ;;  %v6404_v18 = vld [vmem:[%s12322_s5 + $0x130] sm:$0xff] }
 0x3d6   :  { %7964 = vmatpush1.bf16.msra.mxu1 %v7963_v28  ;;  %v2114_v28 = vld [vmem:[%s12322_s5 + $0x8] sm:$0xff] }
 0x3d7   :  { %7965 = vmatprep.subr.bf16.mxu1 %v8787_v20 }
 0x3da   :  { %7967 = vmatpush1.bf16.msra.mxu1 %v7966_v42  ;;  %v8001_v42 = vpack.c.bf16 %v2114_v28, %v2113_v25  ;;  %v6406_v28 = vld [vmem:[%s12322_s5 + $0x140] sm:$0xff] }
 0x3db   :  { %7968 = vmatprep.subr.bf16.mxu1 %v8787_v20 }
 0x3de   :  { %7970 = vmatpush1.bf16.msra.mxu1 %v7969_v38 }
 0x3df   :  { %8055 = vmatprep.subr.bf16.mxu1 %v8787_v20 }
 0x3e1   :  { %2009 = vmatmul.mubr.f32.vlgmr.msra.gmra.mrb[28].mxu1 %v10006_v41  ;;  %v6371_v41 = vld [vmem:[%s12321_s4 + $0x1] ss:$0 sm:$0xff] }
 0x3e2   :  { %6369 = vmatprep.mubr.msk.f32.mxu1 %vm1468_vm12, %v10026_v60 }
 0x3e5   :  { %2014 = vmatmul.mubr.f32.gmra.mrb[30].mxu1 %v10017_v57 }
 0x3e6   :  { %7210 = vmatprep.mubr.msk.f32.mxu1 %vm8788_vm13, %v8785_v4 }
 0x4b4   :  { %v2010_v11 = vpop.f32.mrb[28].mxu1 }
 0x4b5   :  { %v2026_v27 = vmul.f32 %v6370_v53, %v2010_v11  ;;  %v2012_v54 = vpop.f32.mrb[29].mxu1  ;;  %v8004_v11 = vpack.c.bf16 %v2116_v12, %v2115_v7  ;;  %v2541_v7 = vld [vmem:[%s12323_s7 + $0x8] sm:$0xff] }
 0x4b6   :  { %v2118_v54 = vld [vmem:[%s12322_s5 + $0x28] sm:$0xff] }
 0x4b7   :  { %v2033_v57 = vadd.f32 %v6371_v41, %v2026_v27  ;;  %v2117_v27 = vld [vmem:[%s12322_s5 + $0x20] sm:$0xff] }
 0x4b8   :  { %v2015_v60 = vpop.f32.mrb[30].mxu1 }
 0x4b9   :  { %v2027_v31 = vmul.f32 %v6370_v53, %v2015_v60  ;;  %v2017_v13 = vpop.f32.mrb[31].mxu1  ;;  %v2035_v48 = vmax.f32 %v2033_v57, 0.0  ;;  %v2119_v60 = vld [vmem:[%s12322_s5 + $0x30] sm:$0xff]  ;;  %v2120_v57 = vld [vmem:[%s12322_s5 + $0x38] sm:$0xff] }
 0x4ba   :  { %v2121_v13 = vld [vmem:[%s12322_s5 + $0x40] sm:$0xff] }
 0x4bb   :  { %v2034_v29 = vadd.f32 %v6371_v41, %v2027_v31  ;;  %v8007_v41 = vpack.c.bf16 %v2118_v54, %v2117_v27  ;;  %v8010_v31 = vpack.c.bf16 %v2120_v57, %v2119_v60  ;;  %v6412_v57 = vld [vmem:[%s12323_s7 + $0x30] sm:$0xff] }
 0x4bd   :  { %v2036_v17 = vmax.f32 %v2034_v29, 0.0  ;;  %v2122_v29 = vld [vmem:[%s12322_s5 + $0x48] sm:$0xff] }
 0x4bf   :  { %v10266_v23 = vpack.c.bf16 %v2036_v17, %v2035_v48  ;;  %v8013_v48 = vpack.c.bf16 %v2122_v29, %v2121_v13  ;;  %v2123_v17 = vld [vmem:[%s12322_s5 + $0x50] sm:$0xff] }
 0x4c0   :  { %v8016_v22 = vpack.c.bf16 %v2124_v50, %v2123_v17  ;;  %v2542_v29 = vld [vmem:[%s12323_s7 + $0x10] sm:$0xff]  ;;  %v6414_v50 = vld [vmem:[%s12323_s7 + $0x40] sm:$0xff] }
 0x4c1   :  { %7974 = vmatpush3.bf16.msk.msra.mxu0 %vm9740_vm10, %v10266_v23 }
 0x4c2   :  { %7975 = vmatprep.subr.bf16.mxu0 %v8787_v20 }
 0x4c4   :  { %7074 = vmatmul.mubr.msk.f32.vlgmr.msra.gmra.mrb[28].mxu0 %vm2037_vm14, %v8960_v37 }
 0x4c5   :  { %7978 = vmatpush3.bf16.msk.msra.mxu0 %vm9740_vm10, %v10266_v23  ;;  %7080 = vmatprep.mubr.msk.f32.mxu0 %vm8788_vm13, %v8785_v4 }
 0x4c6   :  { %7979 = vmatprep.subr.bf16.mxu0 %v8787_v20 }
 0x4c8   :  { %7081 = vmatmul.mubr.msk.f32.vlgmr.msra.gmra.mrb[30].mxu0 %vm2037_vm14, %v8957_v36 }
 0x4c9   :  { %7981 = vmatpush3.bf16.msra.mxu0 %v7980_v49  ;;  %7111 = vmatprep.mubr.msk.f32.mxu0 %vm8788_vm13, %v8785_v4  ;;  %v2125_v49 = vld [vmem:[%s12322_s5 + $0x60] sm:$0xff] }
 0x4ca   :  { %7982 = vmatprep.subr.bf16.mxu0 %v8787_v20  ;;  %v8019_v34 = vpack.c.bf16 %v2126_v2, %v2125_v49  ;;  %v2544_v2 = vld [vmem:[%s12323_s7 + $0x20] sm:$0xff] }
 0x4cd   :  { %7984 = vmatpush3.bf16.msra.mxu0 %v7983_v35  ;;  %v6394_v35 = vld [vmem:[%s12322_s5 + $0xe0] sm:$0xff] }
 0x4ce   :  { %7985 = vmatprep.subr.bf16.mxu0 %v8787_v20  ;;  %v8026_v43 = vpack.c.bf16 %v6395_v15, %v6394_v35  ;;  %v6416_v15 = vld [vmem:[%s12323_s7 + $0x50] sm:$0xff] }
 0x4d1   :  { %7987 = vmatpush3.bf16.msra.mxu0 %v7986_v45  ;;  %v6397_v45 = vld [vmem:[%s12322_s5 + $0xf8] sm:$0xff] }
 0x4d2   :  { %7988 = vmatprep.subr.bf16.mxu0 %v8787_v20 }
 0x4d5   :  { %7990 = vmatpush3.bf16.msra.mxu0 %v7989_v21  ;;  %v6399_v21 = vld [vmem:[%s12322_s5 + $0x108] sm:$0xff] }
 0x4d6   :  { %7991 = vmatprep.subr.bf16.mxu0 %v8787_v20  ;;  %v8032_v44 = vpack.c.bf16 %v6399_v21, %v6398_v58 }
 0x4d9   :  { %7993 = vmatpush3.bf16.msra.mxu0 %v7992_v59  ;;  %v6401_v59 = vld [vmem:[%s12322_s5 + $0x118] sm:$0xff] }
 0x4da   :  { %7994 = vmatprep.subr.bf16.mxu0 %v8787_v20  ;;  %v8035_v8 = vpack.c.bf16 %v6401_v59, %v6400_v30  ;;  %v6410_v30 = vld [vmem:[%s12324_s6 + $0x1] ss:$0 sm:$0xff] }
 0x4dd   :  { %7996 = vmatpush3.bf16.msra.mxu0 %v7995_v26  ;;  %v6403_v26 = vld [vmem:[%s12322_s5 + $0x128] sm:$0xff] }
 0x4de   :  { %7997 = vmatprep.subr.bf16.mxu0 %v8787_v20  ;;  %v8038_v10 = vpack.c.bf16 %v6403_v26, %v6402_v5  ;;  %v6428_v5 = vld [vmem:[%s12323_s7 + $0x98] sm:$0xff]  ;;  %v6411_v26 = vld [vmem:[%s12324_s6 + $0x2] ss:$0 sm:$0xff] }
 0x4e1   :  { %7999 = vmatpush3.bf16.msra.mxu0 %v7998_v51  ;;  %v6405_v51 = vld [vmem:[%s12322_s5 + $0x138] sm:$0xff] }
 0x4e2   :  { %8000 = vmatprep.subr.bf16.mxu0 %v8787_v20  ;;  %v8041_v25 = vpack.c.bf16 %v6405_v51, %v6404_v18  ;;  %v6420_v18 = vld [vmem:[%s12323_s7 + $0x60] sm:$0xff]  ;;  %v6421_v51 = vld [vmem:[%s12323_s7 + $0x68] sm:$0xff] }
 0x597   :  { %v2109_v16 = vpop.f32.mrb[28].mxu0 }
 0x598   :  { %v7075_v3 = vpop.f32.mrb[29].mxu0 }
 0x59b   :  { %v2195_v38 = vpop.f32.mrb[30].mxu0 }
 0x59c   :  { %v7082_v53 = vpop.f32.mrb[31].mxu0  ;;  %7112 = vmatmul.mubr.msk.f32.vlgmr.msra.gmra.mrb[32].mxu0 %vm1468_vm12, %v2195_v38 }
 0x59d   :  { %8002 = vmatpush3.bf16.msra.mxu0 %v8001_v42  ;;  %7142 = vmatprep.mubr.msk.f32.mxu0 %vm8788_vm13, %v8785_v4  ;;  %v2540_v42 = vld [vmem:[%s12323_s7] sm:$0xff] }
 0x59e   :  { %8003 = vmatprep.subr.bf16.mxu0 %v8787_v20  ;;  %v8056_v12 = vpack.c.bf16 %v2541_v7, %v2540_v42  ;;  %v8065_v42 = vpack.c.bf16 %v6421_v51, %v6420_v18  ;;  %v6455_v51 = vld [vmem:[%s12317_s0 + $0x98] sm:$0xff] }
 0x5a0   :  { %8057 = vmatpush3.bf16.msra.mxu1 %v8056_v12  ;;  %v6422_v12 = vld [vmem:[%s12323_s7 + $0x70] sm:$0xff] }
 0x5a1   :  { %8005 = vmatpush3.bf16.msra.mxu0 %v8004_v11  ;;  %8058 = vmatprep.subr.bf16.mxu1 %v8787_v20 }
 0x5a2   :  { %8006 = vmatprep.subr.bf16.mxu0 %v8787_v20 }
 0x5a5   :  { %8008 = vmatpush3.bf16.msra.mxu0 %v8007_v41 }
 0x5a6   :  { %8009 = vmatprep.subr.bf16.mxu0 %v8787_v20 }
 0x5a9   :  { %8011 = vmatpush3.bf16.msra.mxu0 %v8010_v31  ;;  %v6413_v31 = vld [vmem:[%s12323_s7 + $0x38] sm:$0xff] }
 0x5aa   :  { %8012 = vmatprep.subr.bf16.mxu0 %v8787_v20  ;;  %v8047_v13 = vpack.c.bf16 %v6413_v31, %v6412_v57  ;;  %v6441_v31 = vld [vmem:[%s12323_s7 + $0xf0] sm:$0xff] }
 0x5ad   :  { %8014 = vmatpush3.bf16.msra.mxu0 %v8013_v48  ;;  %v2543_v48 = vld [vmem:[%s12323_s7 + $0x18] sm:$0xff] }
 0x5ae   :  { %8015 = vmatprep.subr.bf16.mxu0 %v8787_v20  ;;  %v8059_v17 = vpack.c.bf16 %v2543_v48, %v2542_v29  ;;  %v6434_v48 = vld [vmem:[%s12323_s7 + $0xc0] sm:$0xff] }
 0x5b0   :  { %8060 = vmatpush3.bf16.msra.mxu1 %v8059_v17  ;;  %v6435_v17 = vld [vmem:[%s12323_s7 + $0xc8] sm:$0xff] }
 0x5b1   :  { %8017 = vmatpush3.bf16.msra.mxu0 %v8016_v22  ;;  %v6415_v22 = vld [vmem:[%s12323_s7 + $0x48] sm:$0xff]  ;;  %8061 = vmatprep.subr.bf16.mxu1 %v8787_v20 }
 0x5b2   :  { %8018 = vmatprep.subr.bf16.mxu0 %v8787_v20  ;;  %v8050_v49 = vpack.c.bf16 %v6415_v22, %v6414_v50 }
 0x5b5   :  { %8020 = vmatpush3.bf16.msra.mxu0 %v8019_v34  ;;  %v2545_v34 = vld [vmem:[%s12323_s7 + $0x28] sm:$0xff] }
 0x5b6   :  { %8021 = vmatprep.subr.bf16.mxu0 %v8787_v20  ;;  %v8062_v35 = vpack.c.bf16 %v2545_v34, %v2544_v2  ;;  %v6444_v2 = vld [vmem:[%s12323_s7 + $0x108] sm:$0xff]  ;;  %v8083_v34 = vpack.c.bf16 %v6435_v17, %v6434_v48  ;;  %v3034_v17 = vld [vmem:[%s12325_s9 + $0x38] sm:$0xff] }
 0x5b8   :  { %7143 = vmatmul.mubr.msk.f32.vlgmr.msra.gmra.mrb[34].mxu0 %vm1468_vm12, %v2109_v16  ;;  %v6407_v16 = vld [vmem:[%s12322_s5 + $0x148] sm:$0xff]  ;;  %8063 = vmatpush3.bf16.msra.mxu1 %v8062_v35 }
 0x5b9   :  { %8024 = vmatpush3.bf16.msk.msra.mxu0 %vm9740_vm10, %v10266_v23  ;;  %7149 = vmatprep.mubr.msk.f32.mxu0 %vm8788_vm13, %v8785_v4  ;;  %v6396_v23 = vld [vmem:[%s12322_s5 + $0xf0] sm:$0xff]  ;;  %v8044_v3 = vpack.c.bf16 %v6407_v16, %v6406_v28  ;;  %v6429_v16 = vld [vmem:[%s12323_s7 + $0xa0] sm:$0xff] }
 0x5ba   :  { %8025 = vmatprep.subr.bf16.mxu0 %v8787_v20  ;;  %v8029_v52 = vpack.c.bf16 %v6397_v45, %v6396_v23  ;;  %v6417_v23 = vld [vmem:[%s12323_s7 + $0x58] sm:$0xff]  ;;  %8073 = vmatprep.subr.bf16.mxu1 %v8787_v20 }
 0x5bc   :  { %7150 = vmatmul.mubr.msk.f32.vlgmr.msra.gmra.mrb[36].mxu0 %vm2037_vm14, %v9087_v14 }
 0x5bd   :  { %7180 = vmatprep.mubr.msk.f32.mxu0 %vm8788_vm13, %v8785_v4  ;;  %8027 = vmatpush3.bf16.msra.mxu0 %v8026_v43  ;;  %v8053_v43 = vpack.c.bf16 %v6417_v23, %v6416_v15  ;;  %v6436_v15 = vld [vmem:[%s12323_s7 + $0xd0] sm:$0xff]  ;;  %v6437_v23 = vld [vmem:[%s12323_s7 + $0xd8] sm:$0xff] }
 0x5be   :  { %8028 = vmatprep.subr.bf16.mxu0 %v8787_v20 }
 0x5c1   :  { %8030 = vmatpush3.bf16.msra.mxu0 %v8029_v52  ;;  %v6409_v52 = vld [vmem:[%s12324_s6] ss:$0 sm:$0xff] }
 0x5c2   :  { %8031 = vmatprep.subr.bf16.mxu0 %v8787_v20 }
 0x5c5   :  { %8033 = vmatpush3.bf16.msra.mxu0 %v8032_v44 }
 0x5c6   :  { %8034 = vmatprep.subr.bf16.mxu0 %v8787_v20 }
 0x5c9   :  { %8036 = vmatpush3.bf16.msra.mxu0 %v8035_v8  ;;  %v6427_v8 = vld [vmem:[%s12323_s7 + $0x90] sm:$0xff] }
 0x5ca   :  { %8037 = vmatprep.subr.bf16.mxu0 %v8787_v20 }
 0x5cd   :  { %8039 = vmatpush3.bf16.msra.mxu0 %v8038_v10 }
 0x5ce   :  { %8040 = vmatprep.subr.bf16.mxu0 %v8787_v20 }
 0x5d1   :  { %8042 = vmatpush3.bf16.msra.mxu0 %v8041_v25  ;;  %v8074_v25 = vpack.c.bf16 %v6428_v5, %v6427_v8 }
 0x5d2   :  { %8043 = vmatprep.subr.bf16.mxu0 %v8787_v20 }
 0x5d5   :  { %8045 = vmatpush3.bf16.msra.mxu0 %v8044_v3  ;;  %v6430_v3 = vld [vmem:[%s12323_s7 + $0xa8] sm:$0xff] }
 0x5d6   :  { %8046 = vmatprep.subr.bf16.mxu0 %v8787_v20 }
 0x66f   :  { %v2283_v38 = vpop.f32.mrb[32].mxu0 }
 0x670   :  { %v7113_v53 = vpop.f32.mrb[33].mxu0 }
 0x671   :  { %v8077_v53 = vpack.c.bf16 %v6430_v3, %v6429_v16 }
 0x68b   :  { %v2356_v11 = vpop.f32.mrb[34].mxu0 }
 0x68c   :  { %v2357_v27 = vadd.f32 %v2356_v11, %v2283_v38  ;;  %v7144_v54 = vpop.f32.mrb[35].mxu0  ;;  %v6423_v38 = vld [vmem:[%s12323_s7 + $0x78] sm:$0xff]  ;;  %v6431_v11 = vld [vmem:[%s12323_s7 + $0xb0] sm:$0xff] }
 0x68d   :  { %v8068_v54 = vpack.c.bf16 %v6423_v38, %v6422_v12  ;;  %v6456_v12 = vld [vmem:[%s12317_s0 + $0xa0] sm:$0xff]  ;;  %v6459_v38 = vld [vmem:[%s12317_s0 + $0xb8] sm:$0xff] }
 0x68f   :  { %v2428_v41 = vpop.f32.mrb[36].mxu0 }
 0x690   :  { %v7151_v60 = vpop.f32.mrb[37].mxu0  ;;  %7181 = vmatmul.mubr.msk.f32.vlgmr.msra.gmra.mrb[38].mxu0 %vm1468_vm12, %v2428_v41  ;;  %v6424_v41 = vld [vmem:[%s12323_s7 + $0x80] sm:$0xff] }
 0x691   :  { %7195 = vmatprep.mubr.msk.f32.mxu0 %vm8788_vm13, %v8785_v4  ;;  %8048 = vmatpush3.bf16.msra.mxu0 %v8047_v13  ;;  %v6425_v60 = vld [vmem:[%s12323_s7 + $0x88] sm:$0xff]  ;;  %v6442_v13 = vld [vmem:[%s12323_s7 + $0xf8] sm:$0xff] }
 0x692   :  { %8049 = vmatprep.subr.bf16.mxu0 %v8787_v20  ;;  %v8071_v29 = vpack.c.bf16 %v6425_v60, %v6424_v41  ;;  %v8092_v50 = vpack.c.bf16 %v6442_v13, %v6441_v31  ;;  %v6458_v41 = vld [vmem:[%s12317_s0 + $0xb0] sm:$0xff]  ;;  %v6460_v60 = vld [vmem:[%s12317_s0 + $0xc0] sm:$0xff] }
 0x693   :  { %v6462_v31 = vld [vmem:[%s12317_s0 + $0xd0] sm:$0x3f]  ;;  %v3031_v13 = vld [vmem:[%s12325_s9 + $0x20] sm:$0xff] }
 0x695   :  { %8051 = vmatpush3.bf16.msra.mxu0 %v8050_v49  ;;  %v6443_v49 = vld [vmem:[%s12323_s7 + $0x100] sm:$0xff] }
 0x696   :  { %8052 = vmatprep.subr.bf16.mxu0 %v8787_v20 }
 0x699   :  { %8054 = vmatpush3.bf16.msra.mxu0 %v8053_v43  ;;  %v8095_v43 = vpack.c.bf16 %v6444_v2, %v6443_v49  ;;  %v3037_v2 = vld [vmem:[%s12325_s9 + $0x50] sm:$0xff] }
 0x69a   :  { %8064 = vmatprep.subr.bf16.mxu0 %v8787_v20 }
 0x763   :  { %v2516_v45 = vpop.f32.mrb[38].mxu0 }
 0x764   :  { %v2520_v58 = vadd.f32 %v2516_v45, %v2357_v27  ;;  %v7182_v21 = vpop.f32.mrb[39].mxu0  ;;  %v6432_v27 = vld [vmem:[%s12323_s7 + $0xb8] sm:$0xff]  ;;  %v6445_v45 = vld [vmem:[%s12323_s7 + $0x110] sm:$0xff] }
 0x765   :  { %v8080_v57 = vpack.c.bf16 %v6432_v27, %v6431_v11  ;;  %v6451_v21 = vld [vmem:[%s12317_s0 + $0x78] sm:$0xff] }
 0x766   :  { %v2526_v44 = vadd.f32 %v6409_v52, %v2520_v58  ;;  %v6446_v52 = vld [vmem:[%s12323_s7 + $0x118] sm:$0xff]  ;;  %v8086_v58 = vpack.c.bf16 %v6437_v23, %v6436_v15  ;;  %v6479_v23 = vld [vmem:[%s12318_s1 + $0x168] sm:$0xff] }
 0x767   :  { %v8098_v8 = vpack.c.bf16 %v6446_v52, %v6445_v45  ;;  %v6477_v15 = vld [vmem:[%s12318_s1 + $0x158] sm:$0xff] }
 0x768   :  { %v2527_v59 = vmax.f32 %v2526_v44, 0.0  ;;  %v6453_v44 = vld [vmem:[%s12317_s0 + $0x88] sm:$0xff]  ;;  %v8142_v45 = vpack.c.bf16 %v6479_v23, %v6477_v15 }
 0x769   :  { %v10604_v5 = vpack.c.bf16 %v6453_v44, %v6451_v21 }
 0x76a   :  { %v2533_v10 = vmul.f32 %v6410_v30, %v2527_v59  ;;  %v6438_v30 = vld [vmem:[%s12323_s7 + $0xe0] sm:$0xff]  ;;  %v6439_v59 = vld [vmem:[%s12323_s7 + $0xe8] sm:$0xff] }
 0x76b   :  { %v8089_v18 = vpack.c.bf16 %v6439_v59, %v6438_v30 }
 0x76c   :  { %v10511_v28 = vadd.f32 %v6411_v26, %v2533_v10  ;;  %v6450_v26 = vld [vmem:[%s12317_s0 + $0x70] sm:$0xff]  ;;  %v6452_v10 = vld [vmem:[%s12317_s0 + $0x80] sm:$0xff] }
 0x76d   :  { %v10619_v16 = vpack.c.bf16 %v6452_v10, %v6450_v26 }
 0x76e   :  { %7211 = vmatmul.mubr.msk.f32.vlgmr.msra.gmra.mrb[32].mxu1 %vm2555_vm15, %v10511_v28  ;;  %v2554_v7 = vrot.slane %v10511_v28, 1  ;;  %v2788_v22 = vrot.slane %v10511_v28, 3  ;;  %v2707_v35 = vrot.slane %v10511_v28, 2  ;;  %v2950_v3 = vrot.slane %v10511_v28, 5 }
 0x76f   :  { %8075 = vmatpush3.bf16.msra.mxu1 %v8074_v25  ;;  %7240 = vmatprep.mubr.msk.f32.mxu1 %vm8788_vm13, %v8785_v4  ;;  %v6457_v25 = vld [vmem:[%s12317_s0 + $0xa8] sm:$0xff]  ;;  %v2869_v11 = vrot.slane %v10511_v28, 4  ;;  %v8128_v28 = vpack.c.bf16 %v6460_v60, %v6458_v41 }
 0x770   :  { %7196 = vmatmul.mubr.msk.f32.vlgmr.msra.gmra.mrb[40].mxu0 %vm2555_vm15, %v2554_v7  ;;  %8076 = vmatprep.subr.bf16.mxu1 %v8787_v20  ;;  %v6454_v7 = vld [vmem:[%s12317_s0 + $0x90] sm:$0xff] }
 0x771   :  { %8066 = vmatpush3.bf16.msra.mxu0 %v8065_v42  ;;  %7225 = vmatprep.mubr.msk.f32.mxu0 %vm8788_vm13, %v8785_v4  ;;  %v8122_v42 = vpack.c.bf16 %v6457_v25, %v6455_v51  ;;  %v8124_v27 = vpack.c.bf16 %v6456_v12, %v6454_v7  ;;  %v3024_v7 = vld [vmem:[%s12326_s8] sm:$0x1] }
 0x772   :  { %8067 = vmatprep.subr.bf16.mxu0 %v8787_v20 }
 0x773   :  { %8078 = vmatpush3.bf16.msra.mxu1 %v8077_v53  ;;  %v6461_v53 = vld [vmem:[%s12317_s0 + $0xc8] sm:$0xff] }
 0x774   :  { %8079 = vmatprep.subr.bf16.mxu1 %v8787_v20 }
 0x775   :  { %8069 = vmatpush3.bf16.msra.mxu0 %v8068_v54  ;;  %v8126_v54 = vpack.c.bf16 %v6461_v53, %v6459_v38  ;;  %v6476_v38 = vld [vmem:[%s12318_s1 + $0x150] sm:$0xff]  ;;  %v6478_v53 = vld [vmem:[%s12318_s1 + $0x160] sm:$0xff] }
 0x776   :  { %8070 = vmatprep.subr.bf16.mxu0 %v8787_v20  ;;  %v8144_v41 = vpack.c.bf16 %v6478_v53, %v6476_v38 }
 0x777   :  { %8081 = vmatpush3.bf16.msra.mxu1 %v8080_v57  ;;  %v6463_v57 = vld [vmem:[%s12317_s0 + $0xd8] sm:$0x3f] }
 0x778   :  { %8091 = vmatprep.subr.bf16.mxu1 %v8787_v20 }
 0x779   :  { %8072 = vmatpush3.bf16.msra.mxu0 %v8071_v29  ;;  %v3032_v29 = vld [vmem:[%s12325_s9 + $0x28] sm:$0xff] }
 0x77a   :  { %7241 = vmatmul.mubr.msk.f32.vlgmr.msra.gmra.mrb[34].mxu1 %vm2555_vm15, %v2788_v22  ;;  %8082 = vmatprep.subr.bf16.mxu0 %v8787_v20  ;;  %v8107_v48 = vpack.c.bf16 %v3032_v29, %v3031_v13  ;;  %v3036_v22 = vld [vmem:[%s12325_s9 + $0x48] sm:$0xff]  ;;  %v6489_v13 = vld [vmem:[%s12318_s1 + $0x1b8] sm:$0xff] }
 0x77b   :  { %8093 = vmatpush3.bf16.msra.mxu1 %v8092_v50  ;;  %7270 = vmatprep.mubr.msk.f32.mxu1 %vm8788_vm13, %v8785_v4  ;;  %v6491_v29 = vld [vmem:[%s12318_s1 + $0x1c8] sm:$0xff] }
 0x77c   :  { %7226 = vmatmul.mubr.msk.f32.vlgmr.msra.gmra.mrb[42].mxu0 %vm2555_vm15, %v2707_v35  ;;  %8094 = vmatprep.subr.bf16.mxu1 %v8787_v20 }
 0x77d   :  { %8084 = vmatpush3.bf16.msra.mxu0 %v8083_v34  ;;  %7255 = vmatprep.mubr.msk.f32.mxu0 %vm8788_vm13, %v8785_v4  ;;  %v3038_v34 = vld [vmem:[%s12325_s9 + $0x58] sm:$0xff] }
 0x77e   :  { %8085 = vmatprep.subr.bf16.mxu0 %v8787_v20  ;;  %v8116_v35 = vpack.c.bf16 %v3038_v34, %v3037_v2  ;;  %v6495_v2 = vld [vmem:[%s12318_s1 + $0x1e8] sm:$0xff] }
 0x77f   :  { %8096 = vmatpush3.bf16.msra.mxu1 %v8095_v43  ;;  %v3039_v43 = vld [vmem:[%s12325_s9 + $0x60] sm:$0xf] }
 0x780   :  { %8097 = vmatprep.subr.bf16.mxu1 %v8787_v20 }
 0x781   :  { %8087 = vmatpush3.bf16.msra.mxu0 %v8086_v58 }
 0x782   :  { %8088 = vmatprep.subr.bf16.mxu0 %v8787_v20 }
 0x783   :  { %8099 = vmatpush3.bf16.msra.mxu1 %v8098_v8 }
 0x784   :  { %8119 = vmatprep.subr.bf16.mxu1 %v10604_v5 }
 0x785   :  { %8090 = vmatpush3.bf16.msra.mxu0 %v8089_v18 }
 0x786   :  { %7271 = vmatmul.mubr.msk.f32.vlgmr.msra.gmra.mrb[36].mxu1 %vm2555_vm15, %v2950_v3  ;;  %8100 = vmatprep.subr.bf16.mxu0 %v8787_v20 }
 0x787   :  { %8121 = vmatpush1.bf16.msra.mxu1 %v10619_v16  ;;  %3210 = vmatprep.mubr.f32.mxu1 %v8785_v4 }
 0x788   :  { %7256 = vmatmul.mubr.msk.f32.vlgmr.msra.gmra.mrb[44].mxu0 %vm2555_vm15, %v2869_v11  ;;  %8123 = vmatprep.subr.bf16.mxu1 %v8122_v42  ;;  %v6481_v11 = vld [vmem:[%s12318_s1 + $0x178] sm:$0xff] }
 0x789   :  { %7299 = vmatprep.mubr.msk.f32.mxu0 %vm8788_vm13, %v8785_v4 }
 0x78b   :  { %8125 = vmatpush1.bf16.msra.mxu1 %v8124_v27 }
 0x78c   :  { %8127 = vmatprep.subr.bf16.mxu1 %v8126_v54 }
 0x78f   :  { %8129 = vmatpush1.bf16.msra.mxu1 %v8128_v28 }
 0x790   :  { %6464 = vmatprep.subr.msk.mxu1 %vm138_vm0, %v6463_v57 }
 0x793   :  { %6465 = vmatpush1.msk.msra.mxu1 %vm138_vm0, %v6462_v31 }
 0x794   :  { %6466 = vmatmul.mubr.msk.f32.vlgmr.msra.gmra.mrb[38].mxu1 %vm125_vm3, %v8960_v37  ;;  %8131 = vmatprep.subr.bf16.mxu1 %v10604_v5 }
 0x795   :  { %3216 = vmatprep.mubr.f32.mxu1 %v8785_v4  ;;  %8133 = vmatpush1.bf16.msra.mxu1 %v10619_v16 }
 0x796   :  { %8135 = vmatprep.subr.bf16.mxu1 %v8122_v42 }
 0x798   :  { %6467 = vmatmul.mubr.msk.f32.gmra.mrb[40].mxu1 %vm125_vm3, %v8994_v47 }
 0x799   :  { %3222 = vmatprep.mubr.f32.mxu1 %v8785_v4  ;;  %8137 = vmatpush1.bf16.msra.mxu1 %v8124_v27 }
 0x79a   :  { %8139 = vmatprep.subr.bf16.mxu1 %v8126_v54 }
 0x79c   :  { %6468 = vmatmul.mubr.msk.f32.gmra.mrb[42].mxu1 %vm125_vm3, %v9026_v56  ;;  %v3028_v56 = vld [vmem:[%s12325_s9 + $0x8] sm:$0xff] }
 0x79d   :  { %3228 = vmatprep.mubr.f32.mxu1 %v8785_v4  ;;  %8141 = vmatpush1.bf16.msra.mxu1 %v8128_v28 }
 0x79e   :  { %6470 = vmatprep.subr.msk.mxu1 %vm138_vm0, %v6463_v57 }
 0x7a0   :  { %6469 = vmatmul.mubr.msk.f32.gmra.mrb[44].mxu1 %vm125_vm3, %v9061_v1  ;;  %v3029_v1 = vld [vmem:[%s12325_s9 + $0x10] sm:$0xff] }
 0x7a1   :  { %6471 = vmatpush1.msk.msra.mxu1 %vm138_vm0, %v6462_v31  ;;  %3341 = vmatprep.mubr.f32.mxu1 %v8785_v4 }
 0x7a2   :  { %8223 = vmatprep.subr.bf16.mxu1 %v10604_v5 }
 0x7a4   :  { %6472 = vmatmul.mubr.msk.f32.vlgmr.msra.gmra.mrb[46].mxu1 %vm125_vm3, %v8957_v36 }
 0x7a5   :  { %3347 = vmatprep.mubr.f32.mxu1 %v8785_v4  ;;  %8225 = vmatpush1.bf16.msra.mxu1 %v10619_v16 }
 0x7a6   :  { %8227 = vmatprep.subr.bf16.mxu1 %v8122_v42 }
 0x7a8   :  { %6473 = vmatmul.mubr.msk.f32.gmra.mrb[48].mxu1 %vm125_vm3, %v8990_v46 }
 0x7a9   :  { %3353 = vmatprep.mubr.f32.mxu1 %v8785_v4  ;;  %8229 = vmatpush1.bf16.msra.mxu1 %v8124_v27 }
 0x7aa   :  { %8231 = vmatprep.subr.bf16.mxu1 %v8126_v54 }
 0x7ac   :  { %6474 = vmatmul.mubr.msk.f32.gmra.mrb[50].mxu1 %vm125_vm3, %v9022_v55  ;;  %v3027_v55 = vld [vmem:[%s12325_s9] sm:$0xff] }
 0x7ad   :  { %3359 = vmatprep.mubr.f32.mxu1 %v8785_v4  ;;  %8233 = vmatpush1.bf16.msra.mxu1 %v8128_v28 }
 0x7ae   :  { %6530 = vmatprep.subr.msk.mxu1 %vm138_vm0, %v6463_v57 }
 0x7b0   :  { %6475 = vmatmul.mubr.msk.f32.gmra.mrb[52].mxu1 %vm125_vm3, %v9054_v0  ;;  %v8101_v0 = vpack.c.bf16 %v3028_v56, %v3027_v55  ;;  %v6485_v55 = vld [vmem:[%s12318_s1 + $0x198] sm:$0xff]  ;;  %v6487_v56 = vld [vmem:[%s12318_s1 + $0x1a8] sm:$0xff] }
 0x7b1   :  { %6531 = vmatpush1.msk.msra.mxu1 %vm138_vm0, %v6462_v31  ;;  %3686 = vmatprep.mubr.f32.mxu1 %v8785_v4 }
 0x7b2   :  { %8275 = vmatprep.subr.bf16.mxu1 %v10604_v5  ;;  %8102 = vmatpush3.bf16.msra.mxu0 %v8101_v0 }
 0x7b3   :  { %8103 = vmatprep.subr.bf16.mxu0 %v8787_v20 }
 0x7b4   :  { %6532 = vmatmul.mubr.msk.f32.vlgmr.msra.gmra.mrb[54].mxu1 %vm125_vm3, %v9087_v14 }
 0x7b5   :  { %3692 = vmatprep.mubr.f32.mxu1 %v8785_v4  ;;  %8277 = vmatpush1.bf16.msra.mxu1 %v10619_v16 }
 0x7b6   :  { %8279 = vmatprep.subr.bf16.mxu1 %v8122_v42 }
 0x7b8   :  { %6533 = vmatmul.mubr.msk.f32.gmra.mrb[56].mxu1 %vm125_vm3, %v9110_v32 }
 0x7b9   :  { %3698 = vmatprep.mubr.f32.mxu1 %v8785_v4  ;;  %8281 = vmatpush1.bf16.msra.mxu1 %v8124_v27  ;;  %v6483_v27 = vld [vmem:[%s12318_s1 + $0x188] sm:$0xff] }
 0x7ba   :  { %8283 = vmatprep.subr.bf16.mxu1 %v8126_v54 }
 0x7bc   :  { %6534 = vmatmul.mubr.msk.f32.gmra.mrb[58].mxu1 %vm125_vm3, %v9132_v40  ;;  %v3030_v40 = vld [vmem:[%s12325_s9 + $0x18] sm:$0xff] }
 0x7bd   :  { %3704 = vmatprep.mubr.f32.mxu1 %v8785_v4  ;;  %8285 = vmatpush1.bf16.msra.mxu1 %v8128_v28  ;;  %v8146_v28 = vpack.c.bf16 %v6483_v27, %v6481_v11 }
 0x7be   :  { %6584 = vmatprep.subr.msk.mxu1 %vm138_vm0, %v6463_v57  ;;  %v6480_v57 = vld [vmem:[%s12318_s1 + $0x170] sm:$0xff] }
 0x7c0   :  { %6535 = vmatmul.mubr.msk.f32.gmra.mrb[60].mxu1 %vm125_vm3, %v9154_v19  ;;  %v8104_v19 = vpack.c.bf16 %v3030_v40, %v3029_v1  ;;  %v8150_v1 = vpack.c.bf16 %v6487_v56, %v6485_v55  ;;  %v6484_v40 = vld [vmem:[%s12318_s1 + $0x190] sm:$0xff] }
 0x7c1   :  { %6585 = vmatpush1.msk.msra.mxu1 %vm138_vm0, %v6462_v31  ;;  %3932 = vmatprep.mubr.f32.mxu1 %v8785_v4  ;;  %vm3041_vm0 = vcmask 818176   ;;  %v6482_v31 = vld [vmem:[%s12318_s1 + $0x180] sm:$0xff] }
 0x7c2   :  { %8105 = vmatpush3.bf16.msra.mxu0 %v8104_v19  ;;  %v8148_v0 = vpack.c.bf16 %v6482_v31, %v6480_v57  ;;  %v6486_v19 = vld [vmem:[%s12318_s1 + $0x1a0] sm:$0xff] }
 0x7c3   :  { %8106 = vmatprep.subr.bf16.mxu0 %v8787_v20 }
 0x7c4   :  { %6586 = vmatmul.mubr.msk.f32.vlgmr.msra.gmra.mrb[62].mxu1 %vm125_vm3, %v9179_v24 }
 0x7c5   :  { %3938 = vmatprep.mubr.f32.mxu1 %v8785_v4 }
 0x7c6   :  { %8108 = vmatpush3.bf16.msra.mxu0 %v8107_v48 }
 0x7c7   :  { %8109 = vmatprep.subr.bf16.mxu0 %v8787_v20 }
 0x7c8   :  { %6587 = vmatmul.mubr.msk.f32.gmra.mrb[64].mxu1 %vm125_vm3, %v9199_v61 }
 0x7c9   :  { %3944 = vmatprep.mubr.f32.mxu1 %v8785_v4 }
 0x7cc   :  { %6588 = vmatmul.mubr.msk.f32.gmra.mrb[66].mxu1 %vm125_vm3, %v9207_v63  ;;  %v3033_v63 = vld [vmem:[%s12325_s9 + $0x30] sm:$0xff] }
 0x7cd   :  { %3950 = vmatprep.mubr.f32.mxu1 %v8785_v4  ;;  %v8110_v50 = vpack.c.bf16 %v3034_v17, %v3033_v63  ;;  %v8152_v17 = vpack.c.bf16 %v6486_v19, %v6484_v40  ;;  %v6513_v40 = vld [vmem:[%s12318_s1 + $0x278] sm:$0xff]  ;;  %v6515_v19 = vld [vmem:[%s12318_s1 + $0x288] sm:$0xff] }
 0x7cf   :  { %8111 = vmatpush3.bf16.msra.mxu0 %v8110_v50  ;;  %v8154_v50 = vpack.c.bf16 %v6491_v29, %v6489_v13 }
 0x7d0   :  { %6589 = vmatmul.mubr.msk.f32.gmra.mrb[68].mxu1 %vm125_vm3, %v9214_v39  ;;  %8112 = vmatprep.subr.bf16.mxu0 %v8787_v20  ;;  %v3035_v39 = vld [vmem:[%s12325_s9 + $0x40] sm:$0xff]  ;;  %vm3123_vm3 = vcmask 0  }
 0x7d1   :  { %4266 = vmatprep.mubr.f32.mxu1 %v8785_v4  ;;  %v8113_v49 = vpack.c.bf16 %v3036_v22, %v3035_v39  ;;  %v6488_v39 = vld [vmem:[%s12318_s1 + $0x1b0] sm:$0xff]  ;;  %v6490_v22 = vld [vmem:[%s12318_s1 + $0x1c0] sm:$0xff] }
 0x7d2   :  { %v8156_v15 = vpack.c.bf16 %v6490_v22, %v6488_v39  ;;  %v6512_v39 = vld [vmem:[%s12318_s1 + $0x270] sm:$0xff]  ;;  %v6514_v22 = vld [vmem:[%s12318_s1 + $0x280] sm:$0xff] }
 0x7d3   :  { %8114 = vmatpush3.bf16.msra.mxu0 %v8113_v49  ;;  %v6493_v49 = vld [vmem:[%s12318_s1 + $0x1d8] sm:$0xff] }
 0x7d4   :  { %8115 = vmatprep.subr.bf16.mxu0 %v8787_v20  ;;  %v8158_v23 = vpack.c.bf16 %v6495_v2, %v6493_v49 }
 0x7d7   :  { %8117 = vmatpush3.bf16.msra.mxu0 %v8116_v35 }
 0x7d8   :  { %7297 = vmatprep.subr.mxu0 %v8785_v4 }
 0x7db   :  { %7298 = vmatpush3.msk.msra.mxu0 %vm1235_vm9, %v3039_v43  ;;  %v6492_v43 = vld [vmem:[%s12318_s1 + $0x1d0] sm:$0xff] }
 0x7dc   :  { %8143 = vmatprep.subr.bf16.mxu0 %v8142_v45  ;;  %v6494_v45 = vld [vmem:[%s12318_s1 + $0x1e0] sm:$0xff] }
 0x841   :  { %v2696_v52 = vpop.f32.mrb[32].mxu1 }
 0x842   :  { %v7212_v58 = vpop.f32.mrb[33].mxu1 }
 0x843   :  { %v2624_v21 = vpop.f32.mrb[40].mxu0  ;;  %v6499_v58 = vld [vmem:[%s12318_s1 + $0x208] sm:$0xff] }
 0x844   :  { %v2697_v44 = vadd.f32 %v2696_v52, %v2624_v21  ;;  %v7197_v30 = vpop.f32.mrb[41].mxu0  ;;  %v6497_v52 = vld [vmem:[%s12318_s1 + $0x1f8] sm:$0xff] }
 0x845   :  { %v8160_v30 = vpack.c.bf16 %v6494_v45, %v6492_v43  ;;  %v3236_v43 = vld [vmem:[%s12318_s1 + $0x8] sm:$0xff]  ;;  %v3238_v45 = vld [vmem:[%s12318_s1 + $0x18] sm:$0xff] }
 0x84d   :  { %v2857_v59 = vpop.f32.mrb[34].mxu1 }
 0x84e   :  { %v7242_v8 = vpop.f32.mrb[35].mxu1 }
 0x84f   :  { %v2776_v5 = vpop.f32.mrb[42].mxu0  ;;  %v6496_v8 = vld [vmem:[%s12318_s1 + $0x1f0] sm:$0xff] }
 0x850   :  { %v2780_v26 = vadd.f32 %v2776_v5, %v2697_v44  ;;  %v7227_v10 = vpop.f32.mrb[43].mxu0  ;;  %v6498_v5 = vld [vmem:[%s12318_s1 + $0x200] sm:$0xff] }
 0x851   :  { %v6503_v10 = vld [vmem:[%s12318_s1 + $0x228] sm:$0xff] }
 0x852   :  { %v2861_v18 = vadd.f32 %v2857_v59, %v2780_v26  ;;  %v8162_v59 = vpack.c.bf16 %v6499_v58, %v6497_v52  ;;  %v6501_v26 = vld [vmem:[%s12318_s1 + $0x218] sm:$0xff]  ;;  %v3235_v58 = vld [vmem:[%s12318_s1] sm:$0xff] }
 0x859   :  { %v3019_v51 = vpop.f32.mrb[36].mxu1 }
 0x85a   :  { %v7272_v25 = vpop.f32.mrb[37].mxu1 }
 0x85b   :  { %v2938_v16 = vpop.f32.mrb[44].mxu0  ;;  %v8164_v25 = vpack.c.bf16 %v6498_v5, %v6496_v8  ;;  %v3240_v8 = vld [vmem:[%s12318_s1 + $0x28] sm:$0xff]  ;;  %v3242_v5 = vld [vmem:[%s12318_s1 + $0x38] sm:$0xff] }
 0x85c   :  { %v2942_v3 = vadd.f32 %v2938_v16, %v2861_v18  ;;  %v7257_v42 = vpop.f32.mrb[45].mxu0  ;;  %v8166_v16 = vpack.c.bf16 %v6503_v10, %v6501_v26  ;;  %v6516_v26 = vld [vmem:[%s12318_s1 + $0x290] sm:$0x3]  ;;  %v8182_v10 = vpack.c.bf16 %v3238_v45, %v3236_v43  ;;  %v16_v45 = vstv %s12327_s10 }
 0x85d   :  { %v6502_v42 = vld [vmem:[%s12318_s1 + $0x220] sm:$0xff]  ;;  %17 = vst [vmem:[#allocation2] sm:$0x1] %v16_v45 }
 0x85e   :  { %v3023_v12 = vadd.f32 %v3019_v51, %v2942_v3  ;;  %v6500_v3 = vld [vmem:[%s12318_s1 + $0x210] sm:$0xff]  ;;  %v3271_v45 = vld [vmem:[%s12318_s1 + $0x120] sm:$0xff] }
 0x85f   :  { %v8168_v11 = vpack.c.bf16 %v6502_v42, %v6500_v3  ;;  %v8186_v3 = vpack.c.bf16 %v3242_v5, %v3240_v8  ;;  %v3239_v42 = vld [vmem:[%s12318_s1 + $0x20] sm:$0xff] }
 0x860   :  { %v3025_v54 = vadd.f32 %v3024_v7, %v3023_v12  ;;  %v6505_v7 = vld [vmem:[%s12318_s1 + $0x238] sm:$0xff]  ;;  %v6507_v12 = vld [vmem:[%s12318_s1 + $0x248] sm:$0xff]  ;;  %v3255_v5 = vld [vmem:[%s12318_s1 + $0xa0] sm:$0xff] }
 0x861   :  { %v8170_v27 = vpack.c.bf16 %v6507_v12, %v6505_v7  ;;  %v3241_v7 = vld [vmem:[%s12318_s1 + $0x30] sm:$0xff] }
 0x862   :  { %v3026_v60 = vmax.f32 %v3025_v54, 0.0  ;;  %v6504_v54 = vld [vmem:[%s12318_s1 + $0x230] sm:$0xff] }
 0x864   :  { %7300 = vmatmul.mubr.msk.f32.vlgmr.msra.gmra.mrb[46].mxu0 %vm3041_vm0, %v3026_v60  ;;  %v6509_v60 = vld [vmem:[%s12318_s1 + $0x258] sm:$0xff] }
 0x865   :  { %8145 = vmatpush1.bf16.msra.mxu0 %v8144_v41  ;;  %v6506_v41 = vld [vmem:[%s12318_s1 + $0x240] sm:$0xff] }
 0x866   :  { %8147 = vmatprep.subr.bf16.mxu0 %v8146_v28  ;;  %v6511_v28 = vld [vmem:[%s12318_s1 + $0x268] sm:$0xff]  ;;  %v8172_v55 = vpack.c.bf16 %v6506_v41, %v6504_v54 }
 0x867   :  { %v10809_v48 = vpop.f32.mrb[38].mxu1  ;;  %v8174_v56 = vpack.c.bf16 %v6511_v28, %v6509_v60  ;;  %v3243_v60 = vld [vmem:[%s12318_s1 + $0x40] sm:$0xff]  ;;  %v3245_v28 = vld [vmem:[%s12318_s1 + $0x50] sm:$0xff] }
 0x868   :  { %v10811_v63 = vpop.f32.mrb[39].mxu1 }
 0x869   :  { %8149 = vmatpush1.bf16.msra.mxu0 %v8148_v0  ;;  %v6508_v0 = vld [vmem:[%s12318_s1 + $0x250] sm:$0xff] }
 0x86a   :  { %8151 = vmatprep.subr.bf16.mxu0 %v8150_v1  ;;  %v6510_v1 = vld [vmem:[%s12318_s1 + $0x260] sm:$0xff] }
 0x86b   :  { %v10825_v34 = vpop.f32.mrb[40].mxu1 }
 0x86c   :  { %v10827_v35 = vpop.f32.mrb[41].mxu1 }
 0x86d   :  { %8153 = vmatpush1.bf16.msra.mxu0 %v8152_v17  ;;  %v8176_v17 = vpack.c.bf16 %v6510_v1, %v6508_v0 }
 0x86e   :  { %8155 = vmatprep.subr.bf16.mxu0 %v8154_v50  ;;  %v8178_v50 = vpack.c.bf16 %v6515_v19, %v6513_v40  ;;  %v3247_v40 = vld [vmem:[%s12318_s1 + $0x60] sm:$0xff]  ;;  %v3249_v19 = vld [vmem:[%s12318_s1 + $0x70] sm:$0xff] }
 0x86f   :  { %v10841_v21 = vpop.f32.mrb[42].mxu1 }
 0x870   :  { %v10843_v44 = vpop.f32.mrb[43].mxu1 }
 0x871   :  { %8157 = vmatpush1.bf16.msra.mxu0 %v8156_v15  ;;  %v8180_v15 = vpack.c.bf16 %v6514_v22, %v6512_v39 }
 0x872   :  { %8159 = vmatprep.subr.bf16.mxu0 %v8158_v23  ;;  %v6517_v23 = vld [vmem:[%s12318_s1 + $0x298] sm:$0x3] }
 0x873   :  { %v10857_v18 = vpop.f32.mrb[44].mxu1 }
 0x874   :  { %v10859_v51 = vpop.f32.mrb[45].mxu1 }
 0x875   :  { %8161 = vmatpush1.bf16.msra.mxu0 %v8160_v30  ;;  %v3237_v30 = vld [vmem:[%s12318_s1 + $0x10] sm:$0xff] }
 0x876   :  { %8163 = vmatprep.subr.bf16.mxu0 %v8162_v59 }
 0x877   :  { %v3343_v38 = vpop.f32.mrb[46].mxu1 }
 0x878   :  { %v3345_v53 = vpop.f32.mrb[47].mxu1 }
 0x879   :  { %8165 = vmatpush1.bf16.msra.mxu0 %v8164_v25  ;;  %6520 = vmatprep.mubr.msk.f32.mxu0 %vm420_vm5, %v3345_v53  ;;  %v8184_v25 = vpack.c.bf16 %v3237_v30, %v3235_v58  ;;  %v3244_v53 = vld [vmem:[%s12318_s1 + $0x48] sm:$0xff] }
 0x87a   :  { %8167 = vmatprep.subr.bf16.mxu0 %v8166_v16 }
 0x87b   :  { %v3349_v57 = vpop.f32.mrb[48].mxu1 }
 0x87c   :  { %v3351_v31 = vpop.f32.mrb[49].mxu1 }
 0x87d   :  { %8169 = vmatpush1.bf16.msra.mxu0 %v8168_v11  ;;  %v3246_v11 = vld [vmem:[%s12318_s1 + $0x58] sm:$0xff] }
 0x87e   :  { %8171 = vmatprep.subr.bf16.mxu0 %v8170_v27  ;;  %v8188_v27 = vpack.c.bf16 %v3241_v7, %v3239_v42  ;;  %v8190_v41 = vpack.c.bf16 %v3246_v11, %v3244_v53  ;;  %v3259_v7 = vld [vmem:[%s12318_s1 + $0xc0] sm:$0xff]  ;;  %v3261_v53 = vld [vmem:[%s12318_s1 + $0xd0] sm:$0xff] }
 0x87f   :  { %v3355_v13 = vpop.f32.mrb[50].mxu1 }
 0x880   :  { %v3357_v29 = vpop.f32.mrb[51].mxu1 }
 0x881   :  { %8173 = vmatpush1.bf16.msra.mxu0 %v8172_v55 }
 0x882   :  { %8175 = vmatprep.subr.bf16.mxu0 %v8174_v56  ;;  %v8192_v56 = vpack.c.bf16 %v3245_v28, %v3243_v60  ;;  %v8208_v60 = vpack.c.bf16 %v3261_v53, %v3259_v7  ;;  %v6543_v7 = vld [vmem:[%s12318_s1 + $0x2d8] sm:$0xff]  ;;  %v3275_v53 = vld [vmem:[%s12318_s1 + $0x140] sm:$0x3] }
 0x883   :  { %v10904_v49 = vpop.f32.mrb[52].mxu1 }
 0x884   :  { %v3363_v2 = vpop.f32.mrb[53].mxu1 }
 0x885   :  { %8177 = vmatpush1.bf16.msra.mxu0 %v8176_v17 }
 0x886   :  { %8179 = vmatprep.subr.bf16.mxu0 %v8178_v50  ;;  %v8196_v50 = vpack.c.bf16 %v3249_v19, %v3247_v40  ;;  %v3268_v40 = vld [vmem:[%s12318_s1 + $0x108] sm:$0xff]  ;;  %v3270_v19 = vld [vmem:[%s12318_s1 + $0x118] sm:$0xff] }
 0x887   :  { %v10915_v52 = vpop.f32.mrb[54].mxu1 }
 0x888   :  { %v10923_v59 = vpop.f32.mrb[55].mxu1 }
 0x889   :  { %8181 = vmatpush1.bf16.msra.mxu0 %v8180_v15  ;;  %v3251_v15 = vld [vmem:[%s12318_s1 + $0x80] sm:$0xff] }
 0x88a   :  { %6518 = vmatprep.subr.msk.mxu0 %vm433_vm4, %v6517_v23  ;;  %v3253_v23 = vld [vmem:[%s12318_s1 + $0x90] sm:$0xff] }
 0x88b   :  { %v10935_v16 = vpop.f32.mrb[56].mxu1  ;;  %v8200_v58 = vpack.c.bf16 %v3253_v23, %v3251_v15  ;;  %v3272_v15 = vld [vmem:[%s12318_s1 + $0x128] sm:$0xff]  ;;  %v3274_v23 = vld [vmem:[%s12318_s1 + $0x138] sm:$0xff] }
 0x88c   :  { %v10943_v12 = vpop.f32.mrb[57].mxu1 }
 0x88d   :  { %6519 = vmatpush1.msk.msra.mxu0 %vm433_vm4, %v6516_v26  ;;  %v3257_v26 = vld [vmem:[%s12318_s1 + $0xb0] sm:$0xff] }
 0x88e   :  { %3491 = vmatmul.mubr.f32.vlgmr.msra.gmra.mrb[48].mxu0 %v3343_v38  ;;  %8183 = vmatprep.subr.bf16.mxu0 %v8182_v10  ;;  %v3248_v38 = vld [vmem:[%s12318_s1 + $0x68] sm:$0xff] }
 0x88f   :  { %8185 = vmatpush1.bf16.msra.mxu0 %v8184_v25  ;;  %6521 = vmatprep.mubr.msk.f32.mxu0 %vm420_vm5, %v3351_v31  ;;  %v10953_v54 = vpop.f32.mrb[58].mxu1  ;;  %v3250_v31 = vld [vmem:[%s12318_s1 + $0x78] sm:$0xff]  ;;  %v8204_v25 = vpack.c.bf16 %v3257_v26, %v3255_v5  ;;  %v3276_v5 = vld [vmem:[%s12318_s1 + $0x148] sm:$0x3] }
 0x890   :  { %8187 = vmatprep.subr.bf16.mxu0 %v8186_v3  ;;  %v10961_v55 = vpop.f32.mrb[59].mxu1  ;;  %v8194_v1 = vpack.c.bf16 %v3250_v31, %v3248_v38  ;;  %v3263_v31 = vld [vmem:[%s12318_s1 + $0xe0] sm:$0xff]  ;;  %v6537_v26 = vld [vmem:[%s12318_s1 + $0x2a8] sm:$0xff] }
 0x892   :  { %3497 = vmatmul.mubr.f32.gmra.mrb[50].mxu0 %v3349_v57  ;;  %v3252_v57 = vld [vmem:[%s12318_s1 + $0x88] sm:$0xff] }
 0x893   :  { %8189 = vmatpush1.bf16.msra.mxu0 %v8188_v27  ;;  %6522 = vmatprep.mubr.msk.f32.mxu0 %vm420_vm5, %v3357_v29  ;;  %v10970_v0 = vpop.f32.mrb[60].mxu1  ;;  %v3254_v29 = vld [vmem:[%s12318_s1 + $0x98] sm:$0xff]  ;;  %v3264_v27 = vld [vmem:[%s12318_s1 + $0xe8] sm:$0xff] }
 0x894   :  { %8191 = vmatprep.subr.bf16.mxu0 %v8190_v41  ;;  %v10978_v17 = vpop.f32.mrb[61].mxu1  ;;  %v8198_v22 = vpack.c.bf16 %v3254_v29, %v3252_v57  ;;  %v3266_v41 = vld [vmem:[%s12318_s1 + $0xf8] sm:$0xff]  ;;  %v8214_v29 = vpack.c.bf16 %v3270_v19, %v3268_v40 }
 0x895   :  { %v8210_v38 = vpack.c.bf16 %v3266_v41, %v3264_v27  ;;  %v6547_v40 = vld [vmem:[%s12318_s1 + $0x2f8] sm:$0xff] }
 0x896   :  { %3503 = vmatmul.mubr.f32.gmra.mrb[52].mxu0 %v3355_v13  ;;  %v3256_v13 = vld [vmem:[%s12318_s1 + $0xa8] sm:$0xff] }
 0x897   :  { %8193 = vmatpush1.bf16.msra.mxu0 %v8192_v56  ;;  %6523 = vmatprep.mubr.msk.f32.mxu0 %vm420_vm5, %v3363_v2  ;;  %v10987_v39 = vpop.f32.mrb[62].mxu1  ;;  %v3258_v2 = vld [vmem:[%s12318_s1 + $0xb8] sm:$0xff]  ;;  %v3265_v56 = vld [vmem:[%s12318_s1 + $0xf0] sm:$0xff] }
 0x898   :  { %8195 = vmatprep.subr.bf16.mxu0 %v8194_v1  ;;  %v10995_v43 = vpop.f32.mrb[63].mxu1  ;;  %v8202_v8 = vpack.c.bf16 %v3258_v2, %v3256_v13  ;;  %v8212_v57 = vpack.c.bf16 %v3265_v56, %v3263_v31  ;;  %v8218_v2 = vpack.c.bf16 %v3274_v23, %v3272_v15  ;;  %v6542_v31 = vld [vmem:[%s12318_s1 + $0x2d0] sm:$0xff]  ;;  %v6545_v56 = vld [vmem:[%s12318_s1 + $0x2e8] sm:$0xff]  ;;  %v6548_v23 = vld [vmem:[%s12318_s1 + $0x300] sm:$0xff] }
 0x89a   :  { %3509 = vmatmul.mubr.f32.gmra.mrb[54].mxu0 %v10904_v49  ;;  %v3260_v49 = vld [vmem:[%s12318_s1 + $0xc8] sm:$0xff] }
 0x89b   :  { %8197 = vmatpush1.bf16.msra.mxu0 %v8196_v50  ;;  %6526 = vmatprep.mubr.msk.f32.mxu0 %vm420_vm5, %v10811_v63  ;;  %v11009_v30 = vpop.f32.mrb[64].mxu1  ;;  %v3262_v63 = vld [vmem:[%s12318_s1 + $0xd8] sm:$0xff]  ;;  %v3267_v50 = vld [vmem:[%s12318_s1 + $0x100] sm:$0xff] }
 0x89c   :  { %8199 = vmatprep.subr.bf16.mxu0 %v8198_v22  ;;  %v11017_v10 = vpop.f32.mrb[65].mxu1  ;;  %v8206_v42 = vpack.c.bf16 %v3262_v63, %v3260_v49  ;;  %v3269_v22 = vld [vmem:[%s12318_s1 + $0x110] sm:$0xff]  ;;  %v6539_v49 = vld [vmem:[%s12318_s1 + $0x2b8] sm:$0xff]  ;;  %v6536_v63 = vld [vmem:[%s12318_s1 + $0x2a0] sm:$0xff] }
 0x89d   :  { %v8216_v13 = vpack.c.bf16 %v3269_v22, %v3267_v50  ;;  %v8234_v27 = vpack.c.bf16 %v6539_v49, %v6537_v26  ;;  %v6546_v50 = vld [vmem:[%s12318_s1 + $0x2f0] sm:$0xff]  ;;  %v6556_v49 = vld [vmem:[%s12318_s1 + $0x340] sm:$0xff] }
 0x89f   :  { %8201 = vmatpush1.bf16.msra.mxu0 %v8200_v58  ;;  %v11025_v3 = vpop.f32.mrb[66].mxu1  ;;  %v3273_v58 = vld [vmem:[%s12318_s1 + $0x130] sm:$0xff] }
 0x8a0   :  { %8203 = vmatprep.subr.bf16.mxu0 %v8202_v8  ;;  %v11033_v11 = vpop.f32.mrb[67].mxu1  ;;  %v8220_v8 = vpack.c.bf16 %v3273_v58, %v3271_v45  ;;  %v6552_v58 = vld [vmem:[%s12318_s1 + $0x320] sm:$0xff] }
 0x8a3   :  { %8205 = vmatpush1.bf16.msra.mxu0 %v8204_v25  ;;  %v11041_v28 = vpop.f32.mrb[68].mxu1  ;;  %v6538_v25 = vld [vmem:[%s12318_s1 + $0x2b0] sm:$0xff] }
 0x8a4   :  { %8207 = vmatprep.subr.bf16.mxu0 %v8206_v42  ;;  %v11049_v1 = vpop.f32.mrb[69].mxu1  ;;  %v6541_v42 = vld [vmem:[%s12318_s1 + $0x2c8] sm:$0xff]  ;;  %v8236_v41 = vpack.c.bf16 %v6538_v25, %v6536_v63  ;;  %v6558_v63 = vld [vmem:[%s12318_s1 + $0x350] sm:$0xff] }
 0x8a5   :  { %v6561_v25 = vld [vmem:[%s12318_s1 + $0x368] sm:$0xff] }
 0x8a7   :  { %8209 = vmatpush1.bf16.msra.mxu0 %v8208_v60  ;;  %v8238_v60 = vpack.c.bf16 %v6543_v7, %v6541_v42  ;;  %v6560_v7 = vld [vmem:[%s12318_s1 + $0x360] sm:$0xff] }
 0x8a8   :  { %8211 = vmatprep.subr.bf16.mxu0 %v8210_v38  ;;  %v6540_v38 = vld [vmem:[%s12318_s1 + $0x2c0] sm:$0xff] }
 0x8a9   :  { %v8240_v19 = vpack.c.bf16 %v6542_v31, %v6540_v38  ;;  %v6564_v31 = vld [vmem:[%s12318_s1 + $0x380] sm:$0xff] }
 0x8ab   :  { %8213 = vmatpush1.bf16.msra.mxu0 %v8212_v57  ;;  %v8242_v57 = vpack.c.bf16 %v6547_v40, %v6545_v56  ;;  %v6566_v56 = vld [vmem:[%s12318_s1 + $0x390] sm:$0xff]  ;;  %v6569_v40 = vld [vmem:[%s12318_s1 + $0x3a8] sm:$0xff] }
 0x8ac   :  { %8215 = vmatprep.subr.bf16.mxu0 %v8214_v29  ;;  %v6544_v29 = vld [vmem:[%s12318_s1 + $0x2e0] sm:$0xff] }
 0x8ad   :  { %v8244_v22 = vpack.c.bf16 %v6546_v50, %v6544_v29  ;;  %v6568_v50 = vld [vmem:[%s12318_s1 + $0x3a0] sm:$0xff] }
 0x8af   :  { %8217 = vmatpush1.bf16.msra.mxu0 %v8216_v13  ;;  %v6550_v13 = vld [vmem:[%s12318_s1 + $0x310] sm:$0xff] }
 0x8b0   :  { %8219 = vmatprep.subr.bf16.mxu0 %v8218_v2  ;;  %v6553_v2 = vld [vmem:[%s12318_s1 + $0x328] sm:$0xff] }
 0x8b3   :  { %8221 = vmatpush1.bf16.msra.mxu0 %v8220_v8  ;;  %v6554_v8 = vld [vmem:[%s12318_s1 + $0x330] sm:$0xff] }
 0x8b4   :  { %6524 = vmatprep.subr.msk.mxu0 %vm433_vm4, %v3276_v5  ;;  %v6557_v5 = vld [vmem:[%s12318_s1 + $0x348] sm:$0xff] }
 0x8b7   :  { %6525 = vmatpush1.msk.msra.mxu0 %vm433_vm4, %v3275_v53  ;;  %v6562_v53 = vld [vmem:[%s12318_s1 + $0x370] sm:$0xff] }
 0x8b8   :  { %3598 = vmatmul.mubr.f32.vlgmr.msra.gmra.mrb[48].mxu0 %v10809_v48  ;;  %8235 = vmatprep.subr.bf16.mxu0 %v8234_v27  ;;  %v6549_v48 = vld [vmem:[%s12318_s1 + $0x308] sm:$0xff] }
 0x8b9   :  { %6527 = vmatprep.mubr.msk.f32.mxu0 %vm420_vm5, %v10827_v35  ;;  %8237 = vmatpush1.bf16.msra.mxu0 %v8236_v41  ;;  %v6551_v35 = vld [vmem:[%s12318_s1 + $0x318] sm:$0xff]  ;;  %v6565_v27 = vld [vmem:[%s12318_s1 + $0x388] sm:$0xff] }
 0x8ba   :  { %8239 = vmatprep.subr.bf16.mxu0 %v8238_v60  ;;  %v8246_v15 = vpack.c.bf16 %v6551_v35, %v6549_v48  ;;  %v6567_v41 = vld [vmem:[%s12318_s1 + $0x398] sm:$0xff]  ;;  %v8260_v60 = vpack.c.bf16 %v6562_v53, %v6560_v7  ;;  %v6570_v48 = vld [vmem:[%s12318_s1 + $0x3b0] sm:$0xff]  ;;  %v6573_v35 = vld [vmem:[%s12318_s1 + $0x3c8] sm:$0xff] }
 0x8bb   :  { %v8262_v38 = vpack.c.bf16 %v6567_v41, %v6565_v27  ;;  %v6601_v7 = vld [vmem:[%s12318_s1 + $0x448] sm:$0xff]  ;;  %v6598_v41 = vld [vmem:[%s12318_s1 + $0x430] sm:$0xff] }
 0x8bc   :  { %3604 = vmatmul.mubr.f32.gmra.mrb[50].mxu0 %v10825_v34  ;;  %v6555_v34 = vld [vmem:[%s12318_s1 + $0x338] sm:$0xff] }
 0x8bd   :  { %6528 = vmatprep.mubr.msk.f32.mxu0 %vm420_vm5, %v10843_v44  ;;  %8241 = vmatpush1.bf16.msra.mxu0 %v8240_v19  ;;  %v8248_v44 = vpack.c.bf16 %v6550_v13, %v6548_v23  ;;  %v8250_v45 = vpack.c.bf16 %v6555_v34, %v6553_v2  ;;  %v6571_v19 = vld [vmem:[%s12318_s1 + $0x3b8] sm:$0xff]  ;;  %v6572_v13 = vld [vmem:[%s12318_s1 + $0x3c0] sm:$0xff]  ;;  %v6574_v2 = vld [vmem:[%s12318_s1 + $0x3d0] sm:$0xff] }
 0x8be   :  { %8243 = vmatprep.subr.bf16.mxu0 %v8242_v57  ;;  %v8264_v57 = vpack.c.bf16 %v6566_v56, %v6564_v31  ;;  %v8266_v29 = vpack.c.bf16 %v6571_v19, %v6569_v40  ;;  %v8272_v34 = vpack.c.bf16 %v6574_v2, %v6572_v13  ;;  %v6602_v56 = vld [vmem:[%s12318_s1 + $0x450] sm:$0xff]  ;;  %v6604_v40 = vld [vmem:[%s12318_s1 + $0x460] sm:$0xff]  ;;  %v6607_v19 = vld [vmem:[%s12318_s1 + $0x478] sm:$0xff] }
 0x8bf   :  { %v6614_v2 = vld [vmem:[%s12318_s1 + $0x4b0] sm:$0xff] }
 0x8c0   :  { %3610 = vmatmul.mubr.f32.gmra.mrb[52].mxu0 %v10841_v21  ;;  %v6559_v21 = vld [vmem:[%s12318_s1 + $0x358] sm:$0xff] }
 0x8c1   :  { %6529 = vmatprep.mubr.msk.f32.mxu0 %vm420_vm5, %v10859_v51  ;;  %8245 = vmatpush1.bf16.msra.mxu0 %v8244_v22  ;;  %v8252_v51 = vpack.c.bf16 %v6554_v8, %v6552_v58  ;;  %v8254_v26 = vpack.c.bf16 %v6559_v21, %v6557_v5  ;;  %v6575_v22 = vld [vmem:[%s12318_s1 + $0x3d8] sm:$0xff]  ;;  %v6593_v58 = vld [vmem:[%s12318_s1 + $0x408] sm:$0xff]  ;;  %v6590_v8 = vld [vmem:[%s12318_s1 + $0x3f0] sm:$0xff] }
 0x8c2   :  { %8247 = vmatprep.subr.bf16.mxu0 %v8246_v15  ;;  %v8268_v15 = vpack.c.bf16 %v6570_v48, %v6568_v50  ;;  %v8270_v23 = vpack.c.bf16 %v6575_v22, %v6573_v35  ;;  %v6592_v5 = vld [vmem:[%s12318_s1 + $0x400] sm:$0xff]  ;;  %v6595_v21 = vld [vmem:[%s12318_s1 + $0x418] sm:$0xff]  ;;  %v6610_v22 = vld [vmem:[%s12318_s1 + $0x490] sm:$0xff] }
 0x8c3   :  { %v6608_v50 = vld [vmem:[%s12318_s1 + $0x480] sm:$0xff]  ;;  %v6611_v48 = vld [vmem:[%s12318_s1 + $0x498] sm:$0xff] }
 0x8c4   :  { %3616 = vmatmul.mubr.f32.gmra.mrb[54].mxu0 %v10857_v18  ;;  %v6563_v18 = vld [vmem:[%s12318_s1 + $0x378] sm:$0xff] }
 0x8c5   :  { %8249 = vmatpush1.bf16.msra.mxu0 %v8248_v44  ;;  %6580 = vmatprep.mubr.msk.f32.mxu0 %vm420_vm5, %v10923_v59  ;;  %v8256_v59 = vpack.c.bf16 %v6558_v63, %v6556_v49  ;;  %v8258_v42 = vpack.c.bf16 %v6563_v18, %v6561_v25  ;;  %v6577_v44 = vld [vmem:[%s12318_s1 + $0x3e8] sm:$0x3]  ;;  %v8288_v63 = vpack.c.bf16 %v6592_v5, %v6590_v8  ;;  %v6594_v18 = vld [vmem:[%s12318_s1 + $0x410] sm:$0xff] }
 0x8c6   :  { %8251 = vmatprep.subr.bf16.mxu0 %v8250_v45  ;;  %v6591_v45 = vld [vmem:[%s12318_s1 + $0x3f8] sm:$0xff]  ;;  %v6618_v5 = vld [vmem:[%s12318_s1 + $0x4d0] sm:$0xff] }
 0x8c7   :  { %v8286_v49 = vpack.c.bf16 %v6593_v58, %v6591_v45  ;;  %v6621_v45 = vld [vmem:[%s12318_s1 + $0x4e8] sm:$0xff] }
 0x8c9   :  { %8253 = vmatpush1.bf16.msra.mxu0 %v8252_v51  ;;  %v6597_v51 = vld [vmem:[%s12318_s1 + $0x428] sm:$0xff] }
 0x8ca   :  { %8255 = vmatprep.subr.bf16.mxu0 %v8254_v26  ;;  %v6576_v26 = vld [vmem:[%s12318_s1 + $0x3e0] sm:$0x3]  ;;  %v8290_v25 = vpack.c.bf16 %v6597_v51, %v6595_v21  ;;  %v6623_v51 = vld [vmem:[%s12318_s1 + $0x4f8] sm:$0xff] }
 0x8cb   :  { %v6620_v21 = vld [vmem:[%s12318_s1 + $0x4e0] sm:$0xff] }
 0x8cd   :  { %8257 = vmatpush1.bf16.msra.mxu0 %v8256_v59  ;;  %v6596_v59 = vld [vmem:[%s12318_s1 + $0x420] sm:$0xff] }
 0x8ce   :  { %8259 = vmatprep.subr.bf16.mxu0 %v8258_v42  ;;  %v6599_v42 = vld [vmem:[%s12318_s1 + $0x438] sm:$0xff]  ;;  %v8292_v53 = vpack.c.bf16 %v6596_v59, %v6594_v18  ;;  %v6624_v18 = vld [vmem:[%s12318_s1 + $0x500] sm:$0xff] }
 0x8cf   :  { %v8294_v27 = vpack.c.bf16 %v6601_v7, %v6599_v42  ;;  %v6627_v59 = vld [vmem:[%s12318_s1 + $0x518] sm:$0xff]  ;;  %v6629_v42 = vld [vmem:[%s12318_s1 + $0x528] sm:$0xff] }
 0x8d1   :  { %8261 = vmatpush1.bf16.msra.mxu0 %v8260_v60  ;;  %v6600_v60 = vld [vmem:[%s12318_s1 + $0x440] sm:$0xff] }
 0x8d2   :  { %8263 = vmatprep.subr.bf16.mxu0 %v8262_v38  ;;  %v6605_v38 = vld [vmem:[%s12318_s1 + $0x468] sm:$0xff] }
 0x8d5   :  { %8265 = vmatpush1.bf16.msra.mxu0 %v8264_v57 }
 0x8d6   :  { %8267 = vmatprep.subr.bf16.mxu0 %v8266_v29  ;;  %v6606_v29 = vld [vmem:[%s12318_s1 + $0x470] sm:$0xff] }
 0x8d9   :  { %8269 = vmatpush1.bf16.msra.mxu0 %v8268_v15  ;;  %v6612_v15 = vld [vmem:[%s12318_s1 + $0x4a0] sm:$0xff] }
 0x8da   :  { %8271 = vmatprep.subr.bf16.mxu0 %v8270_v23  ;;  %v6615_v23 = vld [vmem:[%s12318_s1 + $0x4b8] sm:$0xff] }
 0x8dd   :  { %8273 = vmatpush1.bf16.msra.mxu0 %v8272_v34  ;;  %v6616_v34 = vld [vmem:[%s12318_s1 + $0x4c0] sm:$0xff] }
 0x8de   :  { %6578 = vmatprep.subr.msk.mxu0 %vm433_vm4, %v6577_v44  ;;  %v6619_v44 = vld [vmem:[%s12318_s1 + $0x4d8] sm:$0xff]  ;;  %v8312_v58 = vpack.c.bf16 %v6616_v34, %v6614_v2 }
 0x8df   :  { %v8314_v8 = vpack.c.bf16 %v6621_v45, %v6619_v44 }
 0x8e1   :  { %6579 = vmatpush1.msk.msra.mxu0 %vm433_vm4, %v6576_v26  ;;  %v6625_v26 = vld [vmem:[%s12318_s1 + $0x508] sm:$0xff] }
 0x8e2   :  { %3836 = vmatmul.mubr.f32.vlgmr.msra.gmra.mrb[48].mxu0 %v10915_v52  ;;  %8287 = vmatprep.subr.bf16.mxu0 %v8286_v49  ;;  %v6603_v52 = vld [vmem:[%s12318_s1 + $0x458] sm:$0xff]  ;;  %v8316_v49 = vpack.c.bf16 %v6620_v21, %v6618_v5 }
 0x8e3   :  { %8289 = vmatpush1.bf16.msra.mxu0 %v8288_v63  ;;  %6581 = vmatprep.mubr.msk.f32.mxu0 %vm420_vm5, %v10943_v12  ;;  %v8296_v12 = vpack.c.bf16 %v6600_v60, %v6598_v41  ;;  %v8298_v31 = vpack.c.bf16 %v6605_v38, %v6603_v52  ;;  %v8318_v63 = vpack.c.bf16 %v6625_v26, %v6623_v51  ;;  %v6628_v41 = vld [vmem:[%s12318_s1 + $0x520] sm:$0xff]  ;;  %v6631_v52 = vld [vmem:[%s12318_s1 + $0x538] sm:$0x3]  ;;  %v6630_v38 = vld [vmem:[%s12318_s1 + $0x530] sm:$0x3] }
 0x8e4   :  { %8291 = vmatprep.subr.bf16.mxu0 %v8290_v25  ;;  %v6622_v25 = vld [vmem:[%s12318_s1 + $0x4f0] sm:$0xff] }
 0x8e5   :  { %v8320_v7 = vpack.c.bf16 %v6624_v18, %v6622_v25 }
 0x8e6   :  { %3842 = vmatmul.mubr.f32.gmra.mrb[50].mxu0 %v10935_v16  ;;  %v6609_v16 = vld [vmem:[%s12318_s1 + $0x488] sm:$0xff] }
 0x8e7   :  { %8293 = vmatpush1.bf16.msra.mxu0 %v8292_v53  ;;  %6582 = vmatprep.mubr.msk.f32.mxu0 %vm420_vm5, %v10961_v55  ;;  %v8300_v55 = vpack.c.bf16 %v6604_v40, %v6602_v56  ;;  %v8302_v57 = vpack.c.bf16 %v6609_v16, %v6607_v19  ;;  %v8322_v53 = vpack.c.bf16 %v6629_v42, %v6627_v59 }
 0x8e8   :  { %8295 = vmatprep.subr.bf16.mxu0 %v8294_v27  ;;  %v6626_v27 = vld [vmem:[%s12318_s1 + $0x510] sm:$0xff] }
 0x8e9   :  { %v8324_v60 = vpack.c.bf16 %v6628_v41, %v6626_v27 }
 0x8ea   :  { %3848 = vmatmul.mubr.f32.gmra.mrb[52].mxu0 %v10953_v54  ;;  %v6613_v54 = vld [vmem:[%s12318_s1 + $0x4a8] sm:$0xff] }
 0x8eb   :  { %8297 = vmatpush1.bf16.msra.mxu0 %v8296_v12  ;;  %6583 = vmatprep.mubr.msk.f32.mxu0 %vm420_vm5, %v10978_v17  ;;  %v8304_v17 = vpack.c.bf16 %v6608_v50, %v6606_v29  ;;  %v8306_v35 = vpack.c.bf16 %v6613_v54, %v6611_v48  ;;  %v3040_v12 = vld [vmem:[#allocation2] sm:$0x1] }
 0x8ec   :  { %8299 = vmatprep.subr.bf16.mxu0 %v8298_v31 }
 0x8ee   :  { %3854 = vmatmul.mubr.f32.gmra.mrb[54].mxu0 %v10970_v0  ;;  %v6617_v0 = vld [vmem:[%s12318_s1 + $0x4c8] sm:$0xff] }
 0x8ef   :  { %8301 = vmatpush1.bf16.msra.mxu0 %v8300_v55  ;;  %6634 = vmatprep.mubr.msk.f32.mxu0 %vm420_vm5, %v10995_v43  ;;  %v8308_v43 = vpack.c.bf16 %v6612_v15, %v6610_v22  ;;  %v8310_v13 = vpack.c.bf16 %v6617_v0, %v6615_v23 }
 0x8f0   :  { %8303 = vmatprep.subr.bf16.mxu0 %v8302_v57 }
 0x8f3   :  { %8305 = vmatpush1.bf16.msra.mxu0 %v8304_v17 }
 0x8f4   :  { %8307 = vmatprep.subr.bf16.mxu0 %v8306_v35 }
 0x8f7   :  { %8309 = vmatpush1.bf16.msra.mxu0 %v8308_v43 }
 0x8f8   :  { %8311 = vmatprep.subr.bf16.mxu0 %v8310_v13 }
 0x8fb   :  { %8313 = vmatpush1.bf16.msra.mxu0 %v8312_v58 }
 0x8fc   :  { %8315 = vmatprep.subr.bf16.mxu0 %v8314_v8 }
 0x8ff   :  { %8317 = vmatpush1.bf16.msra.mxu0 %v8316_v49 }
 0x900   :  { %8319 = vmatprep.subr.bf16.mxu0 %v8318_v63 }
 0x903   :  { %8321 = vmatpush1.bf16.msra.mxu0 %v8320_v7 }
 0x904   :  { %8323 = vmatprep.subr.bf16.mxu0 %v8322_v53 }
 0x907   :  { %8325 = vmatpush1.bf16.msra.mxu0 %v8324_v60 }
 0x908   :  { %6632 = vmatprep.subr.msk.mxu0 %vm433_vm4, %v6631_v52 }
 0x90b   :  { %6633 = vmatpush1.msk.msra.mxu0 %vm433_vm4, %v6630_v38 }
 0x90c   :  { %4082 = vmatmul.mubr.f32.vlgmr.msra.gmra.mrb[48].mxu0 %v10987_v39 }
 0x90d   :  { %6635 = vmatprep.mubr.msk.f32.mxu0 %vm420_vm5, %v11017_v10 }
 0x910   :  { %4088 = vmatmul.mubr.f32.gmra.mrb[50].mxu0 %v11009_v30 }
 0x911   :  { %6636 = vmatprep.mubr.msk.f32.mxu0 %vm420_vm5, %v11033_v11 }
 0x914   :  { %4094 = vmatmul.mubr.f32.gmra.mrb[52].mxu0 %v11025_v3  ;;  %v4114_v3 = vld [vmem:[%s12319_s2] ss:$2 sm:$0x3] }
 0x915   :  { %6637 = vmatprep.mubr.msk.f32.mxu0 %vm420_vm5, %v11049_v1  ;;  %v4119_v1 = vrot.slane %v4114_v3, %v9698_v62  ;;  %v4123_v16 = vrot.slane %v4114_v3, %v9704_v6 }
 0x918   :  { %4100 = vmatmul.mubr.f32.gmra.mrb[54].mxu0 %v11041_v28  ;;  %v6638_v28 = vld [vmem:[%s12319_s2 + $0x1] ss:$2 sm:$0x3] }
 0x919   :  { %4642 = vmatprep.mubr.f32.mxu0 %v8785_v4  ;;  %v4139_v55 = vrot.slane %v6638_v28, %v9698_v62  ;;  %v4143_v29 = vrot.slane %v6638_v28, %v9704_v6 }
 0x937   :  { %v3114_v31 = vpop.f32.mrb[46].mxu0 }
 0x938   :  { %v3115_v39 = vadd.f32 %v3114_v31, %v3040_v12  ;;  %v7301_v56 = vpop.f32.mrb[47].mxu0 }
 0x93a   :  { %v3118_v40 = vsub.f32 0.0, %v3115_v39 }
 0x93c   :  { %v3119_v10 = vmul.f32 1.442695, %v3118_v40 }
 0x93e   :  { %8777 = vpow2.f32 %v3119_v10 }
 0x948   :  { %v8778_v30 = vpop.eup %8777 }
 0x949   :  { %v3121_v19 = vadd.f32 1.0, %v8778_v30 }
 0x94b   :  { %8779 = vrcp.f32 %v3121_v19 }
 0x955   :  { %v8780_v11 = vpop.eup %8779 }
 0x956   :  { %3124 = vst.msk [vmem:[%s12328_s11] sm:$0x1] %vm3123_vm3, %v8780_v11 }
 0x9df   :  { %v4083_v57 = vpop.f32.mrb[48].mxu0 }
 0x9e0   :  { %v4126_v50 = vmul.f32 %v4119_v1, %v4083_v57  ;;  %v4085_v48 = vpop.f32.mrb[49].mxu0 }
 0x9e1   :  { %v4127_v54 = vmul.f32 %v4123_v16, %v4085_v48  ;;  %v6657_v48 = vld [vmem:[%s12320_s3 + $0x100] sm:$0xff] }
 0x9e2   :  { %v4146_v17 = vadd.f32 %v4139_v55, %v4126_v50  ;;  %v6656_v50 = vld [vmem:[%s12320_s3 + $0xf8] sm:$0xff] }
 0x9e3   :  { %v4147_v35 = vadd.f32 %v4143_v29, %v4127_v54  ;;  %v4089_v22 = vpop.f32.mrb[50].mxu0  ;;  %v6659_v54 = vld [vmem:[%s12320_s3 + $0x110] sm:$0xff] }
 0x9e4   :  { %v4128_v15 = vmul.f32 %v4119_v1, %v4089_v22  ;;  %v4091_v23 = vpop.f32.mrb[51].mxu0  ;;  %v4154_v43 = vmax.f32 %v4146_v17, 0.0  ;;  %v6660_v17 = vld [vmem:[%s12320_s3 + $0x118] sm:$0xff]  ;;  %v6662_v22 = vld [vmem:[%s12320_s3 + $0x128] sm:$0xff] }
 0x9e5   :  { %v4129_v0 = vmul.f32 %v4123_v16, %v4091_v23  ;;  %v4155_v2 = vmax.f32 %v4147_v35, 0.0  ;;  %v6661_v35 = vld [vmem:[%s12320_s3 + $0x120] sm:$0xff] }
 0x9e6   :  { %v4148_v13 = vadd.f32 %v4139_v55, %v4128_v15  ;;  %v4170_v6 = vrot.slane %v4154_v43, 6  ;;  %v6664_v15 = vld [vmem:[%s12320_s3 + $0x138] sm:$0xff]  ;;  %v6666_v43 = vld [vmem:[%s12320_s3 + $0x148] sm:$0xff] }
 0x9e7   :  { %v4149_v34 = vadd.f32 %v4143_v29, %v4129_v0  ;;  %v4095_v44 = vpop.f32.mrb[52].mxu0  ;;  %v4171_v26 = vrot.slane %v4155_v2, 6  ;;  %v6665_v0 = vld [vmem:[%s12320_s3 + $0x140] sm:$0xff]  ;;  %v6667_v2 = vld [vmem:[%s12320_s3 + $0x150] sm:$0xff] }
 0x9e8   :  { %v4156_v45 = vmax.f32 %v4148_v13, 0.0  ;;  %v4130_v58 = vmul.f32 %v4119_v1, %v4095_v44  ;;  %v4097_v62 = vpop.f32.mrb[53].mxu0  ;;  %v8366_v13 = vpack.c.bf16 %v6666_v43, %v6665_v0  ;;  %v4291_v0 = vld [vmem:[%s12320_s3 + $0x60] sm:$0xff]  ;;  %v4292_v43 = vld [vmem:[%s12320_s3 + $0x68] sm:$0xff] }
 0x9e9   :  { %v4157_v8 = vmax.f32 %v4149_v34, 0.0  ;;  %v4131_v5 = vmul.f32 %v4123_v16, %v4097_v62  ;;  %v6668_v34 = vld [vmem:[%s12320_s3 + $0x158] sm:$0xff] }
 0x9ea   :  { %v4172_v21 = vrot.slane %v4156_v45, 6  ;;  %v4150_v51 = vadd.f32 %v4139_v55, %v4130_v58  ;;  %v8369_v44 = vpack.c.bf16 %v6668_v34, %v6667_v2  ;;  %v6669_v45 = vld [vmem:[%s12320_s3 + $0x160] sm:$0xff]  ;;  %v6670_v58 = vld [vmem:[%s12320_s3 + $0x168] sm:$0xff]  ;;  %v4293_v2 = vld [vmem:[%s12320_s3 + $0x70] sm:$0xff] }
 0x9eb   :  { %v4174_v49 = vrot.slane %v4157_v8, 6  ;;  %v4151_v63 = vadd.f32 %v4143_v29, %v4131_v5  ;;  %v4101_v25 = vpop.f32.mrb[54].mxu0  ;;  %v8372_v62 = vpack.c.bf16 %v6670_v58, %v6669_v45  ;;  %v6671_v8 = vld [vmem:[%s12320_s3 + $0x170] sm:$0xff]  ;;  %v6672_v5 = vld [vmem:[%s12320_s3 + $0x178] sm:$0xff]  ;;  %v4295_v45 = vld [vmem:[%s12320_s3 + $0x80] sm:$0xff] }
 0x9ec   :  { %v4173_v18 = vsel %vm433_vm4, %v4170_v6, %v4172_v21  ;;  %v4158_v59 = vmax.f32 %v4150_v51, 0.0  ;;  %v4132_v42 = vmul.f32 %v4119_v1, %v4101_v25  ;;  %v4103_v7 = vpop.f32.mrb[55].mxu0  ;;  %v6674_v51 = vld [vmem:[%s12320_s3 + $0x188] sm:$0xff]  ;;  %v4294_v34 = vld [vmem:[%s12320_s3 + $0x78] sm:$0xff] }
 0x9ed   :  { %v8329_v53 = vpack.c.bf16 %v4173_v18, %v4170_v6  ;;  %v4175_v27 = vsel %vm433_vm4, %v4171_v26, %v4174_v49  ;;  %v4159_v41 = vmax.f32 %v4151_v63, 0.0  ;;  %v4133_v60 = vmul.f32 %v4123_v16, %v4103_v7  ;;  %v6676_v63 = vld [vmem:[%s12320_s3 + $0x198] sm:$0xff]  ;;  %v6677_v18 = vld [vmem:[%s12320_s3 + $0x1a0] sm:$0xff]  ;;  %v6679_v7 = vld [vmem:[%s12320_s3 + $0x1b0] sm:$0xff] }
 0x9ee   :  { %v4176_v52 = vrot.slane %v4158_v59, 6  ;;  %v4152_v38 = vadd.f32 %v4139_v55, %v4132_v42  ;;  %v8326_v12 = vpack.c.bf16 %v4175_v27, %v4171_v26  ;;  %v8375_v6 = vpack.c.bf16 %v6672_v5, %v6671_v8  ;;  %v6678_v59 = vld [vmem:[%s12320_s3 + $0x1a8] sm:$0xff]  ;;  %v4297_v8 = vld [vmem:[%s12320_s3 + $0x90] sm:$0xff]  ;;  %v4298_v5 = vld [vmem:[%s12320_s3 + $0x98] sm:$0xff] }
 0x9ef   :  { %v4178_v31 = vrot.slane %v4159_v41, 6  ;;  %v4153_v39 = vadd.f32 %v4143_v29, %v4133_v60  ;;  %v6655_v29 = vld [vmem:[%s12320_s3 + $0xf0] sm:$0xff]  ;;  %v8384_v42 = vpack.c.bf16 %v6678_v59, %v6677_v18  ;;  %v6681_v41 = vld [vmem:[%s12320_s3 + $0x1c0] sm:$0xff]  ;;  %v6682_v60 = vld [vmem:[%s12320_s3 + $0x1c8] sm:$0xff] }
 0x9f0   :  { %v4177_v56 = vsel %vm433_vm4, %v4172_v21, %v4176_v52  ;;  %v4160_v40 = vmax.f32 %v4152_v38, 0.0  ;;  %8328 = vmatprep.subr.msk.bf16.mxu1 %vm9719_vm8, %v8326_v12  ;;  %8442 = vmatprep.subr.msk.bf16.mxu0 %vm9719_vm8, %v8326_v12  ;;  %v8351_v33 = vpack.c.bf16 %v6656_v50, %v6655_v29  ;;  %v6673_v21 = vld [vmem:[%s12320_s3 + $0x180] sm:$0xff]  ;;  %v6683_v38 = vld [vmem:[%s12320_s3 + $0x1d0] sm:$0xff]  ;;  %v4296_v58 = vld [vmem:[%s12320_s3 + $0x88] sm:$0xff] }
 0x9f1   :  { %v4179_v10 = vsel %vm433_vm4, %v4174_v49, %v4178_v31  ;;  %v4161_v30 = vmax.f32 %v4153_v39, 0.0  ;;  %8331 = vmatpush1.bf16.msk.msra.mxu1 %vm9719_vm8, %v8329_v53  ;;  %8445 = vmatpush1.bf16.msk.msra.mxu0 %vm9719_vm8, %v8329_v53  ;;  %v8378_v26 = vpack.c.bf16 %v6674_v51, %v6673_v21  ;;  %v6675_v49 = vld [vmem:[%s12320_s3 + $0x190] sm:$0xff]  ;;  %v4299_v21 = vld [vmem:[%s12320_s3 + $0xa0] sm:$0xff]  ;;  %v4300_v51 = vld [vmem:[%s12320_s3 + $0xa8] sm:$0xff] }
 0x9f2   :  { %v4180_v19 = vrot.slane %v4160_v40, 6  ;;  %v8381_v25 = vpack.c.bf16 %v6676_v63, %v6675_v49  ;;  %v4301_v49 = vld [vmem:[%s12320_s3 + $0xb0] sm:$0xff]  ;;  %v4302_v63 = vld [vmem:[%s12320_s3 + $0xb8] sm:$0xff]  ;;  %v4303_v59 = vld [vmem:[%s12320_s3 + $0xc0] sm:$0xff] }
 0x9f3   :  { %v4182_v11 = vrot.slane %v4161_v30, 6 }
 0x9f4   :  { %v4181_v3 = vsel %vm433_vm4, %v4176_v52, %v4180_v19  ;;  %v8390_v52 = vpack.c.bf16 %v6682_v60, %v6681_v41  ;;  %v4305_v41 = vld [vmem:[%s12320_s3 + $0xd0] sm:$0xff]  ;;  %v4306_v60 = vld [vmem:[%s12320_s3 + $0xd8] sm:$0xff] }
 0x9f5   :  { %v4194_v28 = vsel %vm1235_vm9, %v4181_v3, 0.0  ;;  %v4183_v1 = vsel %vm433_vm4, %v4178_v31, %v4182_v11  ;;  %v4279_v11 = vld [vmem:[%s12320_s3] sm:$0xff]  ;;  %v4280_v3 = vld [vmem:[%s12320_s3 + $0x8] sm:$0xff] }
 0x9f6   :  { %v8335_v16 = vpack.c.bf16 %v4194_v28, %v4177_v56  ;;  %v4195_v55 = vsel %vm1235_vm9, %v4183_v1, 0.0  ;;  %v8396_v1 = vpack.c.bf16 %v4280_v3, %v4279_v11 }
 0x9f7   :  { %v8332_v57 = vpack.c.bf16 %v4195_v55, %v4179_v10  ;;  %v4281_v55 = vld [vmem:[%s12320_s3 + $0x10] sm:$0xff] }
 0x9f9   :  { %8334 = vmatprep.subr.msk.bf16.mxu1 %vm9740_vm10, %v8332_v57  ;;  %8448 = vmatprep.subr.msk.bf16.mxu0 %vm9740_vm10, %v8332_v57 }
 0x9fa   :  { %8337 = vmatpush1.bf16.msk.msra.mxu1 %vm9740_vm10, %v8335_v16  ;;  %8451 = vmatpush1.bf16.msk.msra.mxu0 %vm9740_vm10, %v8335_v16 }
 0x9fb   :  { %8340 = vmatprep.subr.msk.bf16.mxu1 %vm9719_vm8, %v8326_v12  ;;  %8499 = vmatprep.subr.msk.bf16.mxu0 %vm9719_vm8, %v8326_v12  ;;  %v6684_v12 = vld [vmem:[%s12320_s3 + $0x1d8] sm:$0xff] }
 0x9fc   :  { %v8393_v31 = vpack.c.bf16 %v6684_v12, %v6683_v38  ;;  %v8435_v38 = vpack.c.bf16 %v4306_v60, %v4305_v41  ;;  %v6737_v41 = vld [vmem:[%s12320_s3 + $0x2d0] sm:$0xff]  ;;  %v6738_v60 = vld [vmem:[%s12320_s3 + $0x2d8] sm:$0xff] }
 0x9fd   :  { %6645 = vmatmul.mubr.msk.f32.vlgmr.msra.gmra.mrb[70].mxu1 %vm1238_vm11, %v8960_v37  ;;  %6695 = vmatmul.mubr.msk.f32.vlgmr.msra.gmra.mrb[56].mxu0 %vm1238_vm11, %v9087_v14 }
 0x9fe   :  { %8343 = vmatpush1.bf16.msk.msra.mxu1 %vm9719_vm8, %v8329_v53  ;;  %8502 = vmatpush1.bf16.msk.msra.mxu0 %vm9719_vm8, %v8329_v53  ;;  %v6680_v53 = vld [vmem:[%s12320_s3 + $0x1b8] sm:$0xff] }
 0x9ff   :  { %8346 = vmatprep.subr.msk.bf16.mxu1 %vm9740_vm10, %v8332_v57  ;;  %8505 = vmatprep.subr.msk.bf16.mxu0 %vm9740_vm10, %v8332_v57  ;;  %v8387_v27 = vpack.c.bf16 %v6680_v53, %v6679_v7  ;;  %v4282_v57 = vld [vmem:[%s12320_s3 + $0x18] sm:$0xff] }
 0xa00   :  { %4272 = vmatprep.mubr.f32.mxu1 %v8785_v4  ;;  %4648 = vmatprep.mubr.f32.mxu0 %v8785_v4  ;;  %v8399_v50 = vpack.c.bf16 %v4282_v57, %v4281_v55  ;;  %v6699_v55 = vld [vmem:[%s12320_s3 + $0x1f0] sm:$0xff]  ;;  %v6700_v57 = vld [vmem:[%s12320_s3 + $0x1f8] sm:$0xff] }
 0xa01   :  { %6646 = vmatmul.mubr.msk.f32.gmra.mrb[72].mxu1 %vm1238_vm11, %v8994_v47  ;;  %6696 = vmatmul.mubr.msk.f32.gmra.mrb[58].mxu0 %vm1238_vm11, %v9110_v32  ;;  %v6658_v47 = vld [vmem:[%s12320_s3 + $0x108] sm:$0xff] }
 0xa02   :  { %8349 = vmatpush1.bf16.msk.msra.mxu1 %vm9740_vm10, %v8335_v16  ;;  %8508 = vmatpush1.bf16.msk.msra.mxu0 %vm9740_vm10, %v8335_v16  ;;  %v8354_v32 = vpack.c.bf16 %v6658_v47, %v6657_v48  ;;  %v4283_v48 = vld [vmem:[%s12320_s3 + $0x20] sm:$0xff]  ;;  %v4284_v47 = vld [vmem:[%s12320_s3 + $0x28] sm:$0xff] }
 0xa03   :  { %4373 = vmatprep.mubr.f32.mxu1 %v8785_v4  ;;  %8350 = vmatprep.subr.bf16.mxu1 %v8787_v20 }
 0xa04   :  { %4832 = vmatprep.mubr.f32.mxu0 %v8785_v4  ;;  %8554 = vmatprep.subr.bf16.mxu0 %v8787_v20 }
 0xa05   :  { %6653 = vmatmul.mubr.msk.f32.vlgmr.msra.gmra.mrb[74].mxu1 %vm1238_vm11, %v8957_v36  ;;  %6735 = vmatmul.mubr.msk.f32.vlgmr.msra.gmra.mrb[60].mxu0 %vm1238_vm11, %v9179_v24  ;;  %v8357_v24 = vpack.c.bf16 %v6660_v17, %v6659_v54  ;;  %v4285_v54 = vld [vmem:[%s12320_s3 + $0x30] sm:$0xff]  ;;  %v4286_v17 = vld [vmem:[%s12320_s3 + $0x38] sm:$0xff] }
 0xa06   :  { %4379 = vmatprep.mubr.f32.mxu1 %v8785_v4  ;;  %8352 = vmatpush1.bf16.msra.mxu1 %v8351_v33 }
 0xa07   :  { %8353 = vmatprep.subr.bf16.mxu1 %v8787_v20  ;;  %4838 = vmatprep.mubr.f32.mxu0 %v8785_v4 }
 0xa09   :  { %6654 = vmatmul.mubr.msk.f32.gmra.mrb[76].mxu1 %vm1238_vm11, %v8990_v46  ;;  %6736 = vmatmul.mubr.msk.f32.gmra.mrb[62].mxu0 %vm1238_vm11, %v9199_v61  ;;  %v8360_v46 = vpack.c.bf16 %v6662_v22, %v6661_v35  ;;  %v6663_v61 = vld [vmem:[%s12320_s3 + $0x130] sm:$0xff]  ;;  %v4287_v35 = vld [vmem:[%s12320_s3 + $0x40] sm:$0xff]  ;;  %v4288_v22 = vld [vmem:[%s12320_s3 + $0x48] sm:$0xff] }
 0xa0a   :  { %8355 = vmatpush1.bf16.msra.mxu1 %v8354_v32  ;;  %7306 = vmatprep.mubr.msk.f32.mxu0 %vm8788_vm13, %v8785_v4  ;;  %v8363_v23 = vpack.c.bf16 %v6664_v15, %v6663_v61  ;;  %v8402_v32 = vpack.c.bf16 %v4284_v47, %v4283_v48  ;;  %v4289_v61 = vld [vmem:[%s12320_s3 + $0x50] sm:$0xff]  ;;  %v4290_v15 = vld [vmem:[%s12320_s3 + $0x58] sm:$0xff] }
 0xa0b   :  { %8356 = vmatprep.subr.bf16.mxu1 %v8787_v20 }
 0xa0e   :  { %8358 = vmatpush1.bf16.msra.mxu1 %v8357_v24  ;;  %v8405_v24 = vpack.c.bf16 %v4286_v17, %v4285_v54  ;;  %v6707_v54 = vld [vmem:[%s12320_s3 + $0x230] sm:$0xff]  ;;  %v6708_v17 = vld [vmem:[%s12320_s3 + $0x238] sm:$0xff] }
 0xa0f   :  { %8359 = vmatprep.subr.bf16.mxu1 %v8787_v20 }
 0xa12   :  { %8361 = vmatpush1.bf16.msra.mxu1 %v8360_v46  ;;  %v8408_v46 = vpack.c.bf16 %v4288_v22, %v4287_v35  ;;  %v6709_v35 = vld [vmem:[%s12320_s3 + $0x240] sm:$0xff]  ;;  %v6710_v22 = vld [vmem:[%s12320_s3 + $0x248] sm:$0xff] }
 0xa13   :  { %8362 = vmatprep.subr.bf16.mxu1 %v8787_v20 }
 0xa16   :  { %8364 = vmatpush1.bf16.msra.mxu1 %v8363_v23  ;;  %v8411_v23 = vpack.c.bf16 %v4290_v15, %v4289_v61  ;;  %v6711_v61 = vld [vmem:[%s12320_s3 + $0x250] sm:$0xff]  ;;  %v6712_v15 = vld [vmem:[%s12320_s3 + $0x258] sm:$0xff] }
 0xa17   :  { %8365 = vmatprep.subr.bf16.mxu1 %v8787_v20 }
 0xa1a   :  { %8367 = vmatpush1.bf16.msra.mxu1 %v8366_v13  ;;  %v8414_v13 = vpack.c.bf16 %v4292_v43, %v4291_v0  ;;  %v6713_v0 = vld [vmem:[%s12320_s3 + $0x260] sm:$0xff]  ;;  %v6714_v43 = vld [vmem:[%s12320_s3 + $0x268] sm:$0xff] }
 0xa1b   :  { %8368 = vmatprep.subr.bf16.mxu1 %v8787_v20 }
 0xa1e   :  { %8370 = vmatpush1.bf16.msra.mxu1 %v8369_v44  ;;  %v8417_v44 = vpack.c.bf16 %v4294_v34, %v4293_v2  ;;  %v6715_v2 = vld [vmem:[%s12320_s3 + $0x270] sm:$0xff]  ;;  %v6716_v34 = vld [vmem:[%s12320_s3 + $0x278] sm:$0xff] }
 0xa1f   :  { %8371 = vmatprep.subr.bf16.mxu1 %v8787_v20 }
 0xa22   :  { %8373 = vmatpush1.bf16.msra.mxu1 %v8372_v62  ;;  %v8420_v62 = vpack.c.bf16 %v4296_v58, %v4295_v45  ;;  %v6717_v45 = vld [vmem:[%s12320_s3 + $0x280] sm:$0xff]  ;;  %v6718_v58 = vld [vmem:[%s12320_s3 + $0x288] sm:$0xff] }
 0xa23   :  { %8374 = vmatprep.subr.bf16.mxu1 %v8787_v20 }
 0xa26   :  { %8376 = vmatpush1.bf16.msra.mxu1 %v8375_v6  ;;  %v8423_v6 = vpack.c.bf16 %v4298_v5, %v4297_v8  ;;  %v6719_v8 = vld [vmem:[%s12320_s3 + $0x290] sm:$0xff]  ;;  %v6720_v5 = vld [vmem:[%s12320_s3 + $0x298] sm:$0xff] }
 0xa27   :  { %8377 = vmatprep.subr.bf16.mxu1 %v8787_v20 }
 0xa2a   :  { %8379 = vmatpush1.bf16.msra.mxu1 %v8378_v26  ;;  %v8426_v26 = vpack.c.bf16 %v4300_v51, %v4299_v21  ;;  %v6721_v21 = vld [vmem:[%s12320_s3 + $0x2a0] sm:$0xff]  ;;  %v6722_v51 = vld [vmem:[%s12320_s3 + $0x2a8] sm:$0xff] }
 0xa2b   :  { %8380 = vmatprep.subr.bf16.mxu1 %v8787_v20 }
 0xa2e   :  { %8382 = vmatpush1.bf16.msra.mxu1 %v8381_v25  ;;  %v8429_v25 = vpack.c.bf16 %v4302_v63, %v4301_v49  ;;  %v6723_v49 = vld [vmem:[%s12320_s3 + $0x2b0] sm:$0xff]  ;;  %v6724_v63 = vld [vmem:[%s12320_s3 + $0x2b8] sm:$0xff] }
 0xa2f   :  { %8383 = vmatprep.subr.bf16.mxu1 %v8787_v20 }
 0xa32   :  { %8385 = vmatpush1.bf16.msra.mxu1 %v8384_v42  ;;  %v4304_v42 = vld [vmem:[%s12320_s3 + $0xc8] sm:$0xff] }
 0xa33   :  { %8386 = vmatprep.subr.bf16.mxu1 %v8787_v20  ;;  %v8432_v53 = vpack.c.bf16 %v4304_v42, %v4303_v59  ;;  %v6725_v59 = vld [vmem:[%s12320_s3 + $0x2c0] sm:$0xff]  ;;  %v6726_v42 = vld [vmem:[%s12320_s3 + $0x2c8] sm:$0xff] }
 0xa36   :  { %8388 = vmatpush1.bf16.msra.mxu1 %v8387_v27 }
 0xa37   :  { %8389 = vmatprep.subr.bf16.mxu1 %v8787_v20 }
 0xa3a   :  { %8391 = vmatpush1.bf16.msra.mxu1 %v8390_v52 }
 0xa3b   :  { %8392 = vmatprep.subr.bf16.mxu1 %v8787_v20 }
 0xa3e   :  { %8394 = vmatpush1.bf16.msra.mxu1 %v8393_v31  ;;  %v4307_v31 = vld [vmem:[%s12320_s3 + $0xe0] sm:$0xff] }
 0xa3f   :  { %8395 = vmatprep.subr.bf16.mxu1 %v8787_v20 }
 0xad0   :  { %v11559_v39 = vpop.f32.mrb[70].mxu1  ;;  %v11561_v56 = vpop.f32.mrb[56].mxu0 }
 0xad1   :  { %v4270_v40 = vpop.f32.mrb[71].mxu1  ;;  %v11563_v10 = vpop.f32.mrb[57].mxu0 }
 0xad4   :  { %v11565_v30 = vpop.f32.mrb[72].mxu1  ;;  %v11654_v18 = vpop.f32.mrb[58].mxu0 }
 0xad5   :  { %v11567_v19 = vpop.f32.mrb[73].mxu1  ;;  %v11663_v7 = vpop.f32.mrb[59].mxu0 }
 0xad8   :  { %v4375_v28 = vpop.f32.mrb[74].mxu1  ;;  %v11665_v27 = vpop.f32.mrb[60].mxu0 }
 0xad9   :  { %v4377_v16 = vpop.f32.mrb[75].mxu1  ;;  %v11674_v52 = vpop.f32.mrb[61].mxu0 }
 0xada   :  { %6685 = vmatprep.mubr.msk.f32.mxu1 %vm1468_vm12, %v4377_v16 }
 0xadb   :  { %4487 = vmatmul.mubr.f32.vlgmr.msra.gmra.mrb[78].mxu1 %v4375_v28  ;;  %v6697_v28 = vld [vmem:[%s12320_s3 + $0x1e0] sm:$0xff] }
 0xadc   :  { %8397 = vmatpush1.bf16.msra.mxu1 %v8396_v1  ;;  %v4381_v29 = vpop.f32.mrb[76].mxu1  ;;  %v11676_v12 = vpop.f32.mrb[62].mxu0  ;;  %v6698_v1 = vld [vmem:[%s12320_s3 + $0x1e8] sm:$0xff] }
 0xadd   :  { %v4383_v33 = vpop.f32.mrb[77].mxu1  ;;  %8398 = vmatprep.subr.bf16.mxu1 %v8787_v20  ;;  %v11685_v11 = vpop.f32.mrb[63].mxu0  ;;  %v8453_v16 = vpack.c.bf16 %v6698_v1, %v6697_v28  ;;  %v6741_v28 = vld [vmem:[%s12320_s3 + $0x2f0] sm:$0xff]  ;;  %v6742_v1 = vld [vmem:[%s12320_s3 + $0x2f8] sm:$0xff] }
 0xade   :  { %6686 = vmatprep.mubr.msk.f32.mxu1 %vm1468_vm12, %v4383_v33  ;;  %v6702_v33 = vld [vmem:[%s12320_s3 + $0x208] sm:$0xff] }
 0xadf   :  { %4492 = vmatmul.mubr.f32.gmra.mrb[80].mxu1 %v4381_v29  ;;  %v8456_v29 = vpack.c.bf16 %v6700_v57, %v6699_v55 }
 0xae0   :  { %8400 = vmatpush1.bf16.msra.mxu1 %v8399_v50  ;;  %6687 = vmatprep.mubr.msk.f32.mxu1 %vm1468_vm12, %v4270_v40  ;;  %v4308_v40 = vld [vmem:[%s12320_s3 + $0xe8] sm:$0xff]  ;;  %v6701_v50 = vld [vmem:[%s12320_s3 + $0x200] sm:$0xff] }
 0xae1   :  { %8401 = vmatprep.subr.bf16.mxu1 %v8787_v20  ;;  %v8438_v3 = vpack.c.bf16 %v4308_v40, %v4307_v31  ;;  %v8459_v48 = vpack.c.bf16 %v6702_v33, %v6701_v50  ;;  %v6739_v31 = vld [vmem:[%s12320_s3 + $0x2e0] sm:$0xff]  ;;  %v6740_v40 = vld [vmem:[%s12320_s3 + $0x2e8] sm:$0xff] }
 0xae2   :  { %v6748_v50 = vld [vmem:[%s12320_s3 + $0x328] sm:$0xff] }
 0xae4   :  { %8403 = vmatpush1.bf16.msra.mxu1 %v8402_v32 }
 0xae5   :  { %8404 = vmatprep.subr.bf16.mxu1 %v8787_v20 }
 0xae8   :  { %8406 = vmatpush1.bf16.msra.mxu1 %v8405_v24  ;;  %v8468_v24 = vpack.c.bf16 %v6708_v17, %v6707_v54  ;;  %v6754_v54 = vld [vmem:[%s12320_s3 + $0x358] sm:$0xff] }
 0xae9   :  { %8407 = vmatprep.subr.bf16.mxu1 %v8787_v20 }
 0xaec   :  { %8409 = vmatpush1.bf16.msra.mxu1 %v8408_v46  ;;  %v8471_v46 = vpack.c.bf16 %v6710_v22, %v6709_v35  ;;  %v6756_v35 = vld [vmem:[%s12320_s3 + $0x368] sm:$0xff] }
 0xaed   :  { %8410 = vmatprep.subr.bf16.mxu1 %v8787_v20 }
 0xaf0   :  { %8412 = vmatpush1.bf16.msra.mxu1 %v8411_v23  ;;  %v8474_v23 = vpack.c.bf16 %v6712_v15, %v6711_v61  ;;  %v6758_v61 = vld [vmem:[%s12320_s3 + $0x378] sm:$0xff] }
 0xaf1   :  { %8413 = vmatprep.subr.bf16.mxu1 %v8787_v20 }
 0xaf4   :  { %8415 = vmatpush1.bf16.msra.mxu1 %v8414_v13  ;;  %v8477_v13 = vpack.c.bf16 %v6714_v43, %v6713_v0  ;;  %v6760_v0 = vld [vmem:[%s12320_s3 + $0x388] sm:$0xff] }
 0xaf5   :  { %8416 = vmatprep.subr.bf16.mxu1 %v8787_v20 }
 0xaf8   :  { %8418 = vmatpush1.bf16.msra.mxu1 %v8417_v44  ;;  %v8480_v44 = vpack.c.bf16 %v6716_v34, %v6715_v2  ;;  %v6762_v2 = vld [vmem:[%s12320_s3 + $0x398] sm:$0xff] }
 0xaf9   :  { %8419 = vmatprep.subr.bf16.mxu1 %v8787_v20 }
 0xafc   :  { %8421 = vmatpush1.bf16.msra.mxu1 %v8420_v62  ;;  %v8483_v62 = vpack.c.bf16 %v6718_v58, %v6717_v45  ;;  %v6764_v45 = vld [vmem:[%s12320_s3 + $0x3a8] sm:$0xff] }
 0xafd   :  { %8422 = vmatprep.subr.bf16.mxu1 %v8787_v20 }
 0xb00   :  { %8424 = vmatpush1.bf16.msra.mxu1 %v8423_v6  ;;  %v8486_v6 = vpack.c.bf16 %v6720_v5, %v6719_v8  ;;  %v6766_v8 = vld [vmem:[%s12320_s3 + $0x3b8] sm:$0xff] }
 0xb01   :  { %8425 = vmatprep.subr.bf16.mxu1 %v8787_v20 }
 0xb04   :  { %8427 = vmatpush1.bf16.msra.mxu1 %v8426_v26  ;;  %v8489_v26 = vpack.c.bf16 %v6722_v51, %v6721_v21 }
 0xb05   :  { %8428 = vmatprep.subr.bf16.mxu1 %v8787_v20 }
 0xb08   :  { %8430 = vmatpush1.bf16.msra.mxu1 %v8429_v25  ;;  %v8492_v25 = vpack.c.bf16 %v6724_v63, %v6723_v49  ;;  %v6770_v49 = vld [vmem:[%s12321_s4 + $0x1] ss:$0 sm:$0xff] }
 0xb09   :  { %8431 = vmatprep.subr.bf16.mxu1 %v8787_v20 }
 0xb0c   :  { %8433 = vmatpush1.bf16.msra.mxu1 %v8432_v53  ;;  %v8495_v53 = vpack.c.bf16 %v6726_v42, %v6725_v59 }
 0xb0d   :  { %8434 = vmatprep.subr.bf16.mxu1 %v8787_v20 }
 0xb10   :  { %8436 = vmatpush1.bf16.msra.mxu1 %v8435_v38  ;;  %v8510_v38 = vpack.c.bf16 %v6738_v60, %v6737_v41  ;;  %v6775_v41 = vld [vmem:[%s12322_s5 + $0x70] sm:$0xff]  ;;  %v6776_v60 = vld [vmem:[%s12322_s5 + $0x78] sm:$0xff] }
 0xb11   :  { %8437 = vmatprep.subr.bf16.mxu1 %v8787_v20 }
 0xb14   :  { %8439 = vmatpush1.bf16.msra.mxu1 %v8438_v3  ;;  %v8513_v3 = vpack.c.bf16 %v6740_v40, %v6739_v31  ;;  %v6777_v31 = vld [vmem:[%s12322_s5 + $0x80] sm:$0xff]  ;;  %v6778_v40 = vld [vmem:[%s12322_s5 + $0x88] sm:$0xff] }
 0xb15   :  { %8452 = vmatprep.subr.bf16.mxu1 %v8787_v20 }
 0xb17   :  { %4568 = vmatmul.mubr.f32.vlgmr.msra.gmra.mrb[78].mxu1 %v11559_v39  ;;  %v6703_v39 = vld [vmem:[%s12320_s3 + $0x210] sm:$0xff] }
 0xb18   :  { %6688 = vmatprep.mubr.msk.f32.mxu1 %vm1468_vm12, %v11567_v19  ;;  %8454 = vmatpush1.bf16.msra.mxu1 %v8453_v16  ;;  %v6704_v19 = vld [vmem:[%s12320_s3 + $0x218] sm:$0xff]  ;;  %v8516_v16 = vpack.c.bf16 %v6742_v1, %v6741_v28 }
 0xb19   :  { %8455 = vmatprep.subr.bf16.mxu1 %v8787_v20  ;;  %v8462_v47 = vpack.c.bf16 %v6704_v19, %v6703_v39  ;;  %v6750_v39 = vld [vmem:[%s12320_s3 + $0x338] sm:$0xff] }
 0xb1a   :  { %v6780_v28 = vld [vmem:[%s12322_s5 + $0x98] sm:$0xff] }
 0xb1b   :  { %4573 = vmatmul.mubr.f32.gmra.mrb[80].mxu1 %v11565_v30  ;;  %v6705_v30 = vld [vmem:[%s12320_s3 + $0x220] sm:$0xff] }
 0xb1c   :  { %8457 = vmatpush1.bf16.msra.mxu1 %v8456_v29  ;;  %6727 = vmatprep.mubr.msk.f32.mxu1 %vm1468_vm12, %v11563_v10  ;;  %v6706_v10 = vld [vmem:[%s12320_s3 + $0x228] sm:$0xff]  ;;  %v6747_v29 = vld [vmem:[%s12320_s3 + $0x320] sm:$0xff] }
 0xb1d   :  { %8458 = vmatprep.subr.bf16.mxu1 %v8787_v20  ;;  %v8465_v32 = vpack.c.bf16 %v6706_v10, %v6705_v30  ;;  %v8525_v33 = vpack.c.bf16 %v6748_v50, %v6747_v29  ;;  %v6752_v30 = vld [vmem:[%s12320_s3 + $0x348] sm:$0xff]  ;;  %v6787_v50 = vld [vmem:[%s12322_s5 + $0xd0] sm:$0xff] }
 0xb20   :  { %8460 = vmatpush1.bf16.msra.mxu1 %v8459_v48  ;;  %v6749_v48 = vld [vmem:[%s12320_s3 + $0x330] sm:$0xff] }
 0xb21   :  { %8461 = vmatprep.subr.bf16.mxu1 %v8787_v20  ;;  %v8528_v19 = vpack.c.bf16 %v6750_v39, %v6749_v48  ;;  %v5047_v39 = vld [vmem:[%s12322_s5] sm:$0xff] }
 0xb24   :  { %8463 = vmatpush1.bf16.msra.mxu1 %v8462_v47  ;;  %v6751_v47 = vld [vmem:[%s12320_s3 + $0x340] sm:$0xff] }
 0xb25   :  { %8464 = vmatprep.subr.bf16.mxu1 %v8787_v20  ;;  %v8531_v10 = vpack.c.bf16 %v6752_v30, %v6751_v47 }
 0xb28   :  { %8466 = vmatpush1.bf16.msra.mxu1 %v8465_v32  ;;  %v6753_v32 = vld [vmem:[%s12320_s3 + $0x350] sm:$0xff] }
 0xb29   :  { %8467 = vmatprep.subr.bf16.mxu1 %v8787_v20  ;;  %v8534_v17 = vpack.c.bf16 %v6754_v54, %v6753_v32  ;;  %v5049_v32 = vld [vmem:[%s12322_s5 + $0x10] sm:$0xff]  ;;  %v5050_v54 = vld [vmem:[%s12322_s5 + $0x18] sm:$0xff] }
 0xb2c   :  { %8469 = vmatpush1.bf16.msra.mxu1 %v8468_v24  ;;  %v6755_v24 = vld [vmem:[%s12320_s3 + $0x360] sm:$0xff] }
 0xb2d   :  { %8470 = vmatprep.subr.bf16.mxu1 %v8787_v20  ;;  %v8537_v22 = vpack.c.bf16 %v6756_v35, %v6755_v24  ;;  %v8587_v35 = vpack.c.bf16 %v5050_v54, %v5049_v32  ;;  %v6823_v32 = vld [vmem:[%s12323_s7 + $0x80] sm:$0xff] }
 0xb30   :  { %8472 = vmatpush1.bf16.msra.mxu1 %v8471_v46  ;;  %v6757_v46 = vld [vmem:[%s12320_s3 + $0x370] sm:$0xff] }
 0xb31   :  { %8473 = vmatprep.subr.bf16.mxu1 %v8787_v20  ;;  %v8540_v15 = vpack.c.bf16 %v6758_v61, %v6757_v46  ;;  %v5052_v46 = vld [vmem:[%s12322_s5 + $0x28] sm:$0xff] }
 0xb34   :  { %8475 = vmatpush1.bf16.msra.mxu1 %v8474_v23  ;;  %v6759_v23 = vld [vmem:[%s12320_s3 + $0x380] sm:$0xff] }
 0xb35   :  { %8476 = vmatprep.subr.bf16.mxu1 %v8787_v20  ;;  %v8543_v43 = vpack.c.bf16 %v6760_v0, %v6759_v23  ;;  %v5054_v23 = vld [vmem:[%s12322_s5 + $0x38] sm:$0xff] }
 0xb38   :  { %8478 = vmatpush1.bf16.msra.mxu1 %v8477_v13  ;;  %v6761_v13 = vld [vmem:[%s12320_s3 + $0x390] sm:$0xff] }
 0xb39   :  { %8479 = vmatprep.subr.bf16.mxu1 %v8787_v20  ;;  %v8546_v34 = vpack.c.bf16 %v6762_v2, %v6761_v13  ;;  %v5056_v13 = vld [vmem:[%s12322_s5 + $0x48] sm:$0xff] }
 0xb3c   :  { %8481 = vmatpush1.bf16.msra.mxu1 %v8480_v44  ;;  %v6763_v44 = vld [vmem:[%s12320_s3 + $0x3a0] sm:$0xff] }
 0xb3d   :  { %8482 = vmatprep.subr.bf16.mxu1 %v8787_v20  ;;  %v8549_v58 = vpack.c.bf16 %v6764_v45, %v6763_v44  ;;  %v5058_v44 = vld [vmem:[%s12322_s5 + $0x58] sm:$0xff] }
 0xb40   :  { %8484 = vmatpush1.bf16.msra.mxu1 %v8483_v62  ;;  %v6765_v62 = vld [vmem:[%s12320_s3 + $0x3b0] sm:$0xff] }
 0xb41   :  { %8485 = vmatprep.subr.bf16.mxu1 %v8787_v20  ;;  %v8552_v5 = vpack.c.bf16 %v6766_v8, %v6765_v62  ;;  %v5060_v62 = vld [vmem:[%s12322_s5 + $0x68] sm:$0xff] }
 0xb44   :  { %8487 = vmatpush1.bf16.msra.mxu1 %v8486_v6  ;;  %v6769_v6 = vld [vmem:[%s12321_s4] ss:$0 sm:$0xff] }
 0xb45   :  { %8488 = vmatprep.subr.bf16.mxu1 %v8787_v20 }
 0xb48   :  { %8490 = vmatpush1.bf16.msra.mxu1 %v8489_v26 }
 0xb49   :  { %8491 = vmatprep.subr.bf16.mxu1 %v8787_v20 }
 0xb4c   :  { %8493 = vmatpush1.bf16.msra.mxu1 %v8492_v25 }
 0xb4d   :  { %8494 = vmatprep.subr.bf16.mxu1 %v8787_v20 }
 0xb50   :  { %8496 = vmatpush1.bf16.msra.mxu1 %v8495_v53 }
 0xb51   :  { %8509 = vmatprep.subr.bf16.mxu1 %v8787_v20 }
 0xb53   :  { %4756 = vmatmul.mubr.f32.vlgmr.msra.gmra.mrb[78].mxu1 %v11561_v56  ;;  %v6743_v56 = vld [vmem:[%s12320_s3 + $0x300] sm:$0xff] }
 0xb54   :  { %8511 = vmatpush1.bf16.msra.mxu1 %v8510_v38  ;;  %6728 = vmatprep.mubr.msk.f32.mxu1 %vm1468_vm12, %v11663_v7  ;;  %v6744_v7 = vld [vmem:[%s12320_s3 + $0x308] sm:$0xff]  ;;  %v8563_v38 = vpack.c.bf16 %v6776_v60, %v6775_v41  ;;  %v6804_v41 = vld [vmem:[%s12322_s5 + $0x138] sm:$0xff] }
 0xb55   :  { %8512 = vmatprep.subr.bf16.mxu1 %v8787_v20  ;;  %v8519_v55 = vpack.c.bf16 %v6744_v7, %v6743_v56  ;;  %v6783_v7 = vld [vmem:[%s12322_s5 + $0xb0] sm:$0xff] }
 0xb57   :  { %4761 = vmatmul.mubr.f32.gmra.mrb[80].mxu1 %v11654_v18  ;;  %v6745_v18 = vld [vmem:[%s12320_s3 + $0x310] sm:$0xff] }
 0xb58   :  { %8514 = vmatpush1.bf16.msra.mxu1 %v8513_v3  ;;  %6767 = vmatprep.mubr.msk.f32.mxu1 %vm1468_vm12, %v11674_v52  ;;  %v6746_v52 = vld [vmem:[%s12320_s3 + $0x318] sm:$0xff]  ;;  %v6779_v3 = vld [vmem:[%s12322_s5 + $0x90] sm:$0xff] }
 0xb59   :  { %8515 = vmatprep.subr.bf16.mxu1 %v8787_v20  ;;  %v8522_v57 = vpack.c.bf16 %v6746_v52, %v6745_v18  ;;  %v8569_v1 = vpack.c.bf16 %v6780_v28, %v6779_v3  ;;  %v6785_v52 = vld [vmem:[%s12322_s5 + $0xc0] sm:$0xff] }
 0xb5c   :  { %8517 = vmatpush1.bf16.msra.mxu1 %v8516_v16  ;;  %v6782_v16 = vld [vmem:[%s12322_s5 + $0xa8] sm:$0xff] }
 0xb5d   :  { %8518 = vmatprep.subr.bf16.mxu1 %v8787_v20 }
 0xb60   :  { %8520 = vmatpush1.bf16.msra.mxu1 %v8519_v55  ;;  %v6784_v55 = vld [vmem:[%s12322_s5 + $0xb8] sm:$0xff] }
 0xb61   :  { %8521 = vmatprep.subr.bf16.mxu1 %v8787_v20  ;;  %v8575_v18 = vpack.c.bf16 %v6784_v55, %v6783_v7  ;;  %v6811_v7 = vld [vmem:[%s12323_s7 + $0x30] sm:$0xff]  ;;  %v6812_v55 = vld [vmem:[%s12323_s7 + $0x38] sm:$0xff] }
 0xb64   :  { %8523 = vmatpush1.bf16.msra.mxu1 %v8522_v57  ;;  %v6786_v57 = vld [vmem:[%s12322_s5 + $0xc8] sm:$0xff] }
 0xb65   :  { %8524 = vmatprep.subr.bf16.mxu1 %v8787_v20  ;;  %v8578_v29 = vpack.c.bf16 %v6786_v57, %v6785_v52  ;;  %v8630_v52 = vpack.c.bf16 %v6812_v55, %v6811_v7  ;;  %v6820_v57 = vld [vmem:[%s12323_s7 + $0x68] sm:$0xff]  ;;  %v6842_v7 = vld [vmem:[%s12323_s7 + $0x100] sm:$0xff] }
 0xb66   :  { %v6843_v55 = vld [vmem:[%s12323_s7 + $0x108] sm:$0xff] }
 0xb68   :  { %8526 = vmatpush1.bf16.msra.mxu1 %v8525_v33  ;;  %v6788_v33 = vld [vmem:[%s12322_s5 + $0xd8] sm:$0xff] }
 0xb69   :  { %8527 = vmatprep.subr.bf16.mxu1 %v8787_v20  ;;  %v8581_v48 = vpack.c.bf16 %v6788_v33, %v6787_v50  ;;  %v6813_v50 = vld [vmem:[%s12323_s7 + $0x40] sm:$0xff]  ;;  %v6814_v33 = vld [vmem:[%s12323_s7 + $0x48] sm:$0xff] }
 0xb6c   :  { %8529 = vmatpush1.bf16.msra.mxu1 %v8528_v19  ;;  %v5048_v19 = vld [vmem:[%s12322_s5 + $0x8] sm:$0xff] }
 0xb6d   :  { %8530 = vmatprep.subr.bf16.mxu1 %v8787_v20 }
 0xb70   :  { %8532 = vmatpush1.bf16.msra.mxu1 %v8531_v10  ;;  %v8584_v10 = vpack.c.bf16 %v5048_v19, %v5047_v39  ;;  %v8633_v39 = vpack.c.bf16 %v6814_v33, %v6813_v50  ;;  %v6822_v19 = vld [vmem:[%s12323_s7 + $0x78] sm:$0xff]  ;;  %v5949_v33 = vld [vmem:[%s12325_s9] sm:$0xff] }
 0xb71   :  { %8533 = vmatprep.subr.bf16.mxu1 %v8787_v20 }
 0xb74   :  { %8535 = vmatpush1.bf16.msra.mxu1 %v8534_v17 }
 0xb75   :  { %8536 = vmatprep.subr.bf16.mxu1 %v8787_v20 }
 0xb78   :  { %8538 = vmatpush1.bf16.msra.mxu1 %v8537_v22  ;;  %v5051_v22 = vld [vmem:[%s12322_s5 + $0x20] sm:$0xff] }
 0xb79   :  { %8539 = vmatprep.subr.bf16.mxu1 %v8787_v20  ;;  %v8590_v61 = vpack.c.bf16 %v5052_v46, %v5051_v22  ;;  %v6808_v22 = vld [vmem:[%s12324_s6] ss:$0 sm:$0xff] }
 0xb7c   :  { %8541 = vmatpush1.bf16.msra.mxu1 %v8540_v15  ;;  %v5053_v15 = vld [vmem:[%s12322_s5 + $0x30] sm:$0xff] }
 0xb7d   :  { %8542 = vmatprep.subr.bf16.mxu1 %v8787_v20  ;;  %v8593_v0 = vpack.c.bf16 %v5054_v23, %v5053_v15  ;;  %v6809_v23 = vld [vmem:[%s12324_s6 + $0x1] ss:$0 sm:$0xff] }
 0xb80   :  { %8544 = vmatpush1.bf16.msra.mxu1 %v8543_v43  ;;  %v5055_v43 = vld [vmem:[%s12322_s5 + $0x40] sm:$0xff] }
 0xb81   :  { %8545 = vmatprep.subr.bf16.mxu1 %v8787_v20  ;;  %v8596_v2 = vpack.c.bf16 %v5056_v13, %v5055_v43  ;;  %v6810_v43 = vld [vmem:[%s12324_s6 + $0x2] ss:$0 sm:$0xff] }
 0xb82   :  { %v5468_v13 = vld [vmem:[%s12323_s7] sm:$0xff] }
 0xb84   :  { %8547 = vmatpush1.bf16.msra.mxu1 %v8546_v34  ;;  %v5057_v34 = vld [vmem:[%s12322_s5 + $0x50] sm:$0xff] }
 0xb85   :  { %8548 = vmatprep.subr.bf16.mxu1 %v8787_v20  ;;  %v8599_v45 = vpack.c.bf16 %v5058_v44, %v5057_v34  ;;  %v5469_v34 = vld [vmem:[%s12323_s7 + $0x8] sm:$0xff]  ;;  %v6833_v44 = vld [vmem:[%s12323_s7 + $0xc0] sm:$0xff] }
 0xb88   :  { %8550 = vmatpush1.bf16.msra.mxu1 %v8549_v58  ;;  %v5059_v58 = vld [vmem:[%s12322_s5 + $0x60] sm:$0xff] }
 0xb89   :  { %8551 = vmatprep.subr.bf16.mxu1 %v8787_v20  ;;  %v8602_v8 = vpack.c.bf16 %v5060_v62, %v5059_v58  ;;  %v8639_v62 = vpack.c.bf16 %v5469_v34, %v5468_v13 }
 0xb8c   :  { %8553 = vmatpush1.bf16.msra.mxu1 %v8552_v5  ;;  %v6793_v5 = vld [vmem:[%s12322_s5 + $0xe0] sm:$0xff] }
 0xb8d   :  { %8647 = vmatprep.subr.bf16.mxu1 %v8787_v20 }
 0xb8f   :  { %4946 = vmatmul.mubr.f32.vlgmr.msra.gmra.mrb[78].mxu1 %v11665_v27 }
 0xb90   :  { %6768 = vmatprep.mubr.msk.f32.mxu1 %vm1468_vm12, %v11685_v11 }
 0xb93   :  { %4951 = vmatmul.mubr.f32.gmra.mrb[80].mxu1 %v11676_v12 }
 0xb94   :  { %7458 = vmatprep.mubr.msk.f32.mxu1 %vm8788_vm13, %v8785_v4 }
 0xc62   :  { %v4947_v21 = vpop.f32.mrb[78].mxu1 }
 0xc63   :  { %v4963_v51 = vmul.f32 %v6769_v6, %v4947_v21  ;;  %v4949_v26 = vpop.f32.mrb[79].mxu1  ;;  %v8609_v21 = vpack.c.bf16 %v6794_v9, %v6793_v5  ;;  %v5470_v5 = vld [vmem:[%s12323_s7 + $0x10] sm:$0xff] }
 0xc64   :  { %v6797_v26 = vld [vmem:[%s12322_s5 + $0x100] sm:$0xff] }
 0xc65   :  { %v4970_v63 = vadd.f32 %v6770_v49, %v4963_v51 }
 0xc66   :  { %v4952_v27 = vpop.f32.mrb[80].mxu1 }
 0xc67   :  { %v4964_v25 = vmul.f32 %v6769_v6, %v4952_v27  ;;  %v4954_v11 = vpop.f32.mrb[81].mxu1  ;;  %v4972_v12 = vmax.f32 %v4970_v63, 0.0  ;;  %v6795_v6 = vld [vmem:[%s12322_s5 + $0xf0] sm:$0xff] }
 0xc68   :  { %v6799_v63 = vld [vmem:[%s12322_s5 + $0x110] sm:$0xff] }
 0xc69   :  { %v4971_v59 = vadd.f32 %v6770_v49, %v4964_v25  ;;  %v6798_v49 = vld [vmem:[%s12322_s5 + $0x108] sm:$0xff]  ;;  %v6800_v25 = vld [vmem:[%s12322_s5 + $0x118] sm:$0xff] }
 0xc6a   :  { %v8615_v27 = vpack.c.bf16 %v6798_v49, %v6797_v26  ;;  %v8618_v11 = vpack.c.bf16 %v6800_v25, %v6799_v63  ;;  %v5473_v63 = vld [vmem:[%s12323_s7 + $0x28] sm:$0xff]  ;;  %v6837_v25 = vld [vmem:[%s12323_s7 + $0xe0] sm:$0xff] }
 0xc6b   :  { %v4973_v42 = vmax.f32 %v4971_v59, 0.0  ;;  %v6801_v59 = vld [vmem:[%s12322_s5 + $0x120] sm:$0xff] }
 0xc6d   :  { %v11923_v53 = vpack.c.bf16 %v4973_v42, %v4972_v12  ;;  %v6802_v12 = vld [vmem:[%s12322_s5 + $0x128] sm:$0xff] }
 0xc6e   :  { %v8621_v42 = vpack.c.bf16 %v6802_v12, %v6801_v59 }
 0xc6f   :  { %8557 = vmatpush3.bf16.msk.msra.mxu0 %vm9740_vm10, %v11923_v53 }
 0xc70   :  { %8558 = vmatprep.subr.bf16.mxu0 %v8787_v20 }
 0xc72   :  { %7307 = vmatmul.mubr.msk.f32.vlgmr.msra.gmra.mrb[64].mxu0 %vm2037_vm14, %v8960_v37  ;;  %v8566_v37 = vpack.c.bf16 %v6778_v40, %v6777_v31  ;;  %v6806_v31 = vld [vmem:[%s12322_s5 + $0x148] sm:$0xff] }
 0xc73   :  { %8561 = vmatpush3.bf16.msk.msra.mxu0 %vm9740_vm10, %v11923_v53  ;;  %7313 = vmatprep.mubr.msk.f32.mxu0 %vm8788_vm13, %v8785_v4 }
 0xc74   :  { %8562 = vmatprep.subr.bf16.mxu0 %v8787_v20 }
 0xc76   :  { %7314 = vmatmul.mubr.msk.f32.vlgmr.msra.gmra.mrb[66].mxu0 %vm2037_vm14, %v8957_v36  ;;  %v6781_v36 = vld [vmem:[%s12322_s5 + $0xa0] sm:$0xff] }
 0xc77   :  { %8564 = vmatpush3.bf16.msra.mxu0 %v8563_v38  ;;  %7344 = vmatprep.mubr.msk.f32.mxu0 %vm8788_vm13, %v8785_v4  ;;  %v8572_v56 = vpack.c.bf16 %v6782_v16, %v6781_v36  ;;  %v6805_v38 = vld [vmem:[%s12322_s5 + $0x140] sm:$0xff] }
 0xc78   :  { %8565 = vmatprep.subr.bf16.mxu0 %v8787_v20  ;;  %v8627_v40 = vpack.c.bf16 %v6806_v31, %v6805_v38  ;;  %v6828_v38 = vld [vmem:[%s12323_s7 + $0xa0] sm:$0xff]  ;;  %v6829_v31 = vld [vmem:[%s12323_s7 + $0xa8] sm:$0xff] }
 0xc7b   :  { %8567 = vmatpush3.bf16.msra.mxu0 %v8566_v37 }
 0xc7c   :  { %8568 = vmatprep.subr.bf16.mxu0 %v8787_v20 }
 0xc7f   :  { %8570 = vmatpush3.bf16.msra.mxu0 %v8569_v1 }
 0xc80   :  { %8571 = vmatprep.subr.bf16.mxu0 %v8787_v20 }
 0xc83   :  { %8573 = vmatpush3.bf16.msra.mxu0 %v8572_v56 }
 0xc84   :  { %8574 = vmatprep.subr.bf16.mxu0 %v8787_v20 }
 0xc87   :  { %8576 = vmatpush3.bf16.msra.mxu0 %v8575_v18  ;;  %v6819_v18 = vld [vmem:[%s12323_s7 + $0x60] sm:$0xff] }
 0xc88   :  { %8577 = vmatprep.subr.bf16.mxu0 %v8787_v20 }
 0xc8b   :  { %8579 = vmatpush3.bf16.msra.mxu0 %v8578_v29  ;;  %v8648_v29 = vpack.c.bf16 %v6820_v57, %v6819_v18  ;;  %v8678_v18 = vpack.c.bf16 %v6843_v55, %v6842_v7  ;;  %v6845_v57 = vld [vmem:[%s12323_s7 + $0x118] sm:$0xff] }
 0xc8c   :  { %8580 = vmatprep.subr.bf16.mxu0 %v8787_v20 }
 0xc8d   :  { %8649 = vmatpush3.bf16.msra.mxu1 %v8648_v29 }
 0xc8e   :  { %8650 = vmatprep.subr.bf16.mxu1 %v8787_v20 }
 0xc8f   :  { %8582 = vmatpush3.bf16.msra.mxu0 %v8581_v48  ;;  %v6821_v48 = vld [vmem:[%s12323_s7 + $0x70] sm:$0xff] }
 0xc90   :  { %8583 = vmatprep.subr.bf16.mxu0 %v8787_v20 }
 0xd45   :  { %v5043_v47 = vpop.f32.mrb[64].mxu0 }
 0xd46   :  { %v7308_v30 = vpop.f32.mrb[65].mxu0 }
 0xd47   :  { %v6815_v30 = vld [vmem:[%s12323_s7 + $0x50] sm:$0xff] }
 0xd49   :  { %v5127_v17 = vpop.f32.mrb[66].mxu0 }
 0xd4a   :  { %7345 = vmatmul.mubr.msk.f32.vlgmr.msra.gmra.mrb[68].mxu0 %vm1468_vm12, %v5127_v17  ;;  %v7315_v24 = vpop.f32.mrb[67].mxu0  ;;  %v6824_v17 = vld [vmem:[%s12323_s7 + $0x88] sm:$0xff] }
 0xd4b   :  { %8585 = vmatpush3.bf16.msra.mxu0 %v8584_v10  ;;  %7375 = vmatprep.mubr.msk.f32.mxu0 %vm8788_vm13, %v8785_v4  ;;  %v6816_v10 = vld [vmem:[%s12323_s7 + $0x58] sm:$0xff]  ;;  %v8654_v24 = vpack.c.bf16 %v6824_v17, %v6823_v32  ;;  %v5954_v32 = vld [vmem:[%s12325_s9 + $0x28] sm:$0xff]  ;;  %v5955_v17 = vld [vmem:[%s12325_s9 + $0x30] sm:$0xff] }
 0xd4c   :  { %8586 = vmatprep.subr.bf16.mxu0 %v8787_v20  ;;  %v8636_v54 = vpack.c.bf16 %v6816_v10, %v6815_v30  ;;  %v5953_v10 = vld [vmem:[%s12325_s9 + $0x20] sm:$0xff] }
 0xd4f   :  { %8588 = vmatpush3.bf16.msra.mxu0 %v8587_v35 }
 0xd50   :  { %8589 = vmatprep.subr.bf16.mxu0 %v8787_v20 }
 0xd53   :  { %8591 = vmatpush3.bf16.msra.mxu0 %v8590_v61 }
 0xd54   :  { %8592 = vmatprep.subr.bf16.mxu0 %v8787_v20 }
 0xd57   :  { %8594 = vmatpush3.bf16.msra.mxu0 %v8593_v0 }
 0xd58   :  { %8595 = vmatprep.subr.bf16.mxu0 %v8787_v20 }
 0xd5b   :  { %8597 = vmatpush3.bf16.msra.mxu0 %v8596_v2 }
 0xd5c   :  { %8598 = vmatprep.subr.bf16.mxu0 %v8787_v20 }
 0xd5f   :  { %8600 = vmatpush3.bf16.msra.mxu0 %v8599_v45  ;;  %v6834_v45 = vld [vmem:[%s12323_s7 + $0xc8] sm:$0xff] }
 0xd60   :  { %8601 = vmatprep.subr.bf16.mxu0 %v8787_v20 }
 0xd63   :  { %8603 = vmatpush3.bf16.msra.mxu0 %v8602_v8  ;;  %v8666_v8 = vpack.c.bf16 %v6834_v45, %v6833_v44 }
 0xd64   :  { %8604 = vmatprep.subr.bf16.mxu0 %v8787_v20 }
 0xd66   :  { %7376 = vmatmul.mubr.msk.f32.vlgmr.msra.gmra.mrb[70].mxu0 %vm1468_vm12, %v5043_v47  ;;  %v8651_v47 = vpack.c.bf16 %v6822_v19, %v6821_v48  ;;  %v5950_v48 = vld [vmem:[%s12325_s9 + $0x8] sm:$0xff] }
 0xd67   :  { %8607 = vmatpush3.bf16.msk.msra.mxu0 %vm9740_vm10, %v11923_v53  ;;  %7382 = vmatprep.mubr.msk.f32.mxu0 %vm8788_vm13, %v8785_v4  ;;  %v6803_v53 = vld [vmem:[%s12322_s5 + $0x130] sm:$0xff]  ;;  %v8684_v19 = vpack.c.bf16 %v5950_v48, %v5949_v33 }
 0xd68   :  { %8608 = vmatprep.subr.bf16.mxu0 %v8787_v20  ;;  %v8624_v60 = vpack.c.bf16 %v6804_v41, %v6803_v53  ;;  %8652 = vmatpush3.bf16.msra.mxu1 %v8651_v47  ;;  %v6827_v53 = vld [vmem:[%s12323_s7 + $0x98] sm:$0xff] }
 0xd69   :  { %8653 = vmatprep.subr.bf16.mxu1 %v8787_v20  ;;  %v5952_v47 = vld [vmem:[%s12325_s9 + $0x18] sm:$0xff] }
 0xd6a   :  { %7383 = vmatmul.mubr.msk.f32.vlgmr.msra.gmra.mrb[72].mxu0 %vm2037_vm14, %v9087_v14  ;;  %v6796_v14 = vld [vmem:[%s12322_s5 + $0xf8] sm:$0xff] }
 0xd6b   :  { %7413 = vmatprep.mubr.msk.f32.mxu0 %vm8788_vm13, %v8785_v4  ;;  %8610 = vmatpush3.bf16.msra.mxu0 %v8609_v21  ;;  %v8612_v51 = vpack.c.bf16 %v6796_v14, %v6795_v6  ;;  %v5471_v21 = vld [vmem:[%s12323_s7 + $0x18] sm:$0xff]  ;;  %v6835_v14 = vld [vmem:[%s12323_s7 + $0xd0] sm:$0xff] }
 0xd6c   :  { %8611 = vmatprep.subr.bf16.mxu0 %v8787_v20  ;;  %8655 = vmatpush3.bf16.msra.mxu1 %v8654_v24  ;;  %v8642_v26 = vpack.c.bf16 %v5471_v21, %v5470_v5  ;;  %v5956_v24 = vld [vmem:[%s12325_s9 + $0x38] sm:$0xff] }
 0xd6d   :  { %8665 = vmatprep.subr.bf16.mxu1 %v8787_v20 }
 0xd6f   :  { %8613 = vmatpush3.bf16.msra.mxu0 %v8612_v51  ;;  %v6836_v51 = vld [vmem:[%s12323_s7 + $0xd8] sm:$0xff] }
 0xd70   :  { %8614 = vmatprep.subr.bf16.mxu0 %v8787_v20  ;;  %v8669_v49 = vpack.c.bf16 %v6836_v51, %v6835_v14  ;;  %v5946_v51 = vld [vmem:[%s12326_s8] sm:$0x1] }
 0xd73   :  { %8616 = vmatpush3.bf16.msra.mxu0 %v8615_v27  ;;  %v5472_v27 = vld [vmem:[%s12323_s7 + $0x20] sm:$0xff] }
 0xd74   :  { %8617 = vmatprep.subr.bf16.mxu0 %v8787_v20  ;;  %v8645_v59 = vpack.c.bf16 %v5473_v63, %v5472_v27 }
 0xd77   :  { %8619 = vmatpush3.bf16.msra.mxu0 %v8618_v11  ;;  %v6838_v11 = vld [vmem:[%s12323_s7 + $0xe8] sm:$0xff] }
 0xd78   :  { %8620 = vmatprep.subr.bf16.mxu0 %v8787_v20  ;;  %v8672_v12 = vpack.c.bf16 %v6838_v11, %v6837_v25  ;;  %v5962_v25 = vld [vmem:[#allocation2] sm:$0x1] }
 0xd7b   :  { %8622 = vmatpush3.bf16.msra.mxu0 %v8621_v42  ;;  %v6826_v42 = vld [vmem:[%s12323_s7 + $0x90] sm:$0xff] }
 0xd7c   :  { %8623 = vmatprep.subr.bf16.mxu0 %v8787_v20  ;;  %v8657_v41 = vpack.c.bf16 %v6827_v53, %v6826_v42 }
 0xd7f   :  { %8625 = vmatpush3.bf16.msra.mxu0 %v8624_v60 }
 0xd80   :  { %8626 = vmatprep.subr.bf16.mxu0 %v8787_v20 }
 0xd83   :  { %8628 = vmatpush3.bf16.msra.mxu0 %v8627_v40  ;;  %v8660_v40 = vpack.c.bf16 %v6829_v31, %v6828_v38 }
 0xd84   :  { %8629 = vmatprep.subr.bf16.mxu0 %v8787_v20 }
 0xe1d   :  { %v5214_v37 = vpop.f32.mrb[68].mxu0 }
 0xe1e   :  { %v7346_v3 = vpop.f32.mrb[69].mxu0 }
 0xe1f   :  { %v6831_v3 = vld [vmem:[%s12323_s7 + $0xb8] sm:$0xff] }
 0xe39   :  { %v5287_v28 = vpop.f32.mrb[70].mxu0 }
 0xe3a   :  { %v5288_v1 = vadd.f32 %v5287_v28, %v5214_v37  ;;  %v7377_v36 = vpop.f32.mrb[71].mxu0  ;;  %v6830_v37 = vld [vmem:[%s12323_s7 + $0xb0] sm:$0xff] }
 0xe3b   :  { %v8663_v28 = vpack.c.bf16 %v6831_v3, %v6830_v37  ;;  %v6841_v36 = vld [vmem:[%s12323_s7 + $0xf8] sm:$0xff] }
 0xe3d   :  { %v5357_v16 = vpop.f32.mrb[72].mxu0 }
 0xe3e   :  { %7414 = vmatmul.mubr.msk.f32.vlgmr.msra.gmra.mrb[74].mxu0 %vm1468_vm12, %v5357_v16  ;;  %v7384_v56 = vpop.f32.mrb[73].mxu0 }
 0xe3f   :  { %7428 = vmatprep.mubr.msk.f32.mxu0 %vm8788_vm13, %v8785_v4  ;;  %8631 = vmatpush3.bf16.msra.mxu0 %v8630_v52  ;;  %v6844_v52 = vld [vmem:[%s12323_s7 + $0x110] sm:$0xff] }
 0xe40   :  { %8632 = vmatprep.subr.bf16.mxu0 %v8787_v20  ;;  %v8681_v29 = vpack.c.bf16 %v6845_v57, %v6844_v52 }
 0xe43   :  { %8634 = vmatpush3.bf16.msra.mxu0 %v8633_v39  ;;  %v5951_v39 = vld [vmem:[%s12325_s9 + $0x10] sm:$0xff] }
 0xe44   :  { %8635 = vmatprep.subr.bf16.mxu0 %v8787_v20  ;;  %v8687_v30 = vpack.c.bf16 %v5952_v47, %v5951_v39 }
 0xe47   :  { %8637 = vmatpush3.bf16.msra.mxu0 %v8636_v54  ;;  %v8690_v54 = vpack.c.bf16 %v5954_v32, %v5953_v10 }
 0xe48   :  { %8638 = vmatprep.subr.bf16.mxu0 %v8787_v20 }
 0xf11   :  { %v5444_v35 = vpop.f32.mrb[74].mxu0 }
 0xf12   :  { %v5448_v46 = vadd.f32 %v5444_v35, %v5288_v1  ;;  %v7415_v61 = vpop.f32.mrb[75].mxu0  ;;  %v6840_v1 = vld [vmem:[%s12323_s7 + $0xf0] sm:$0xff]  ;;  %v8693_v35 = vpack.c.bf16 %v5956_v24, %v5955_v17 }
 0xf13   :  { %v8675_v16 = vpack.c.bf16 %v6841_v36, %v6840_v1 }
 0xf14   :  { %v5454_v15 = vadd.f32 %v6808_v22, %v5448_v46  ;;  %v5957_v22 = vld [vmem:[%s12325_s9 + $0x40] sm:$0xff]  ;;  %v5958_v46 = vld [vmem:[%s12325_s9 + $0x48] sm:$0xff] }
 0xf15   :  { %v8696_v61 = vpack.c.bf16 %v5958_v46, %v5957_v22 }
 0xf16   :  { %v5455_v0 = vmax.f32 %v5454_v15, 0.0  ;;  %v5959_v15 = vld [vmem:[%s12325_s9 + $0x50] sm:$0xff] }
 0xf18   :  { %v5461_v2 = vmul.f32 %v6809_v23, %v5455_v0  ;;  %v5960_v23 = vld [vmem:[%s12325_s9 + $0x58] sm:$0xff] }
 0xf19   :  { %v8699_v0 = vpack.c.bf16 %v5960_v23, %v5959_v15 }
 0xf1a   :  { %v12168_v58 = vadd.f32 %v6810_v43, %v5461_v2  ;;  %v5961_v43 = vld [vmem:[%s12325_s9 + $0x60] sm:$0xf] }
 0xf1c   :  { %v5481_v9 = vrot.slane %v12168_v58, 1  ;;  %v5632_v6 = vrot.slane %v12168_v58, 2  ;;  %v5792_v60 = vrot.slane %v12168_v58, 4  ;;  %v5712_v56 = vrot.slane %v12168_v58, 3 }
 0xf1d   :  { %v5872_v50 = vrot.slane %v12168_v58, 5 }
 0xf1e   :  { %7429 = vmatmul.mubr.msk.f32.vlgmr.msra.gmra.mrb[76].mxu0 %vm2555_vm15, %v5481_v9  ;;  %7459 = vmatmul.mubr.msk.f32.vlgmr.msra.gmra.mrb[82].mxu1 %vm2555_vm15, %v5632_v6 }
 0xf1f   :  { %8640 = vmatpush3.bf16.msra.mxu0 %v8639_v62  ;;  %8667 = vmatpush3.bf16.msra.mxu1 %v8666_v8 }
 0xf20   :  { %8641 = vmatprep.subr.bf16.mxu0 %v8787_v20  ;;  %8668 = vmatprep.subr.bf16.mxu1 %v8787_v20 }
 0xf21   :  { %7443 = vmatprep.mubr.msk.f32.mxu0 %vm8788_vm13, %v8785_v4  ;;  %7488 = vmatprep.mubr.msk.f32.mxu1 %vm8788_vm13, %v8785_v4 }
 0xf23   :  { %8643 = vmatpush3.bf16.msra.mxu0 %v8642_v26  ;;  %8670 = vmatpush3.bf16.msra.mxu1 %v8669_v49 }
 0xf24   :  { %8644 = vmatprep.subr.bf16.mxu0 %v8787_v20  ;;  %8671 = vmatprep.subr.bf16.mxu1 %v8787_v20 }
 0xf27   :  { %8646 = vmatpush3.bf16.msra.mxu0 %v8645_v59  ;;  %8673 = vmatpush3.bf16.msra.mxu1 %v8672_v12 }
 0xf28   :  { %8656 = vmatprep.subr.bf16.mxu0 %v8787_v20  ;;  %8683 = vmatprep.subr.bf16.mxu1 %v8787_v20 }
 0xf2a   :  { %7444 = vmatmul.mubr.msk.f32.vlgmr.msra.gmra.mrb[78].mxu0 %vm2555_vm15, %v12168_v58  ;;  %7489 = vmatmul.mubr.msk.f32.vlgmr.msra.gmra.mrb[84].mxu1 %vm2555_vm15, %v5792_v60 }
 0xf2b   :  { %8658 = vmatpush3.bf16.msra.mxu0 %v8657_v41  ;;  %7473 = vmatprep.mubr.msk.f32.mxu0 %vm8788_vm13, %v8785_v4 }
 0xf2c   :  { %8659 = vmatprep.subr.bf16.mxu0 %v8787_v20  ;;  %7532 = vmatprep.mubr.msk.f32.mxu1 %vm8788_vm13, %v8785_v4 }
 0xf2d   :  { %8685 = vmatpush3.bf16.msra.mxu1 %v8684_v19 }
 0xf2e   :  { %8686 = vmatprep.subr.bf16.mxu1 %v8787_v20 }
 0xf2f   :  { %8661 = vmatpush3.bf16.msra.mxu0 %v8660_v40 }
 0xf30   :  { %8662 = vmatprep.subr.bf16.mxu0 %v8787_v20 }
 0xf31   :  { %8688 = vmatpush3.bf16.msra.mxu1 %v8687_v30 }
 0xf32   :  { %8689 = vmatprep.subr.bf16.mxu1 %v8787_v20 }
 0xf33   :  { %8664 = vmatpush3.bf16.msra.mxu0 %v8663_v28 }
 0xf34   :  { %8674 = vmatprep.subr.bf16.mxu0 %v8787_v20 }
 0xf35   :  { %8691 = vmatpush3.bf16.msra.mxu1 %v8690_v54 }
 0xf36   :  { %7474 = vmatmul.mubr.msk.f32.vlgmr.msra.gmra.mrb[80].mxu0 %vm2555_vm15, %v5712_v56  ;;  %8692 = vmatprep.subr.bf16.mxu1 %v8787_v20 }
 0xf37   :  { %8676 = vmatpush3.bf16.msra.mxu0 %v8675_v16  ;;  %7503 = vmatprep.mubr.msk.f32.mxu0 %vm8788_vm13, %v8785_v4 }
 0xf38   :  { %8677 = vmatprep.subr.bf16.mxu0 %v8787_v20 }
 0xf39   :  { %8694 = vmatpush3.bf16.msra.mxu1 %v8693_v35 }
 0xf3a   :  { %8695 = vmatprep.subr.bf16.mxu1 %v8787_v20 }
 0xf3b   :  { %8679 = vmatpush3.bf16.msra.mxu0 %v8678_v18 }
 0xf3c   :  { %8680 = vmatprep.subr.bf16.mxu0 %v8787_v20 }
 0xf3d   :  { %8697 = vmatpush3.bf16.msra.mxu1 %v8696_v61 }
 0xf3e   :  { %8698 = vmatprep.subr.bf16.mxu1 %v8787_v20 }
 0xf3f   :  { %8682 = vmatpush3.bf16.msra.mxu0 %v8681_v29 }
 0xf41   :  { %8700 = vmatpush3.bf16.msra.mxu1 %v8699_v0 }
 0xf42   :  { %7504 = vmatmul.mubr.msk.f32.vlgmr.msra.gmra.mrb[82].mxu0 %vm2555_vm15, %v5872_v50  ;;  %7530 = vmatprep.subr.mxu1 %v8785_v4 }
 0xf45   :  { %7531 = vmatpush3.msk.msra.mxu1 %vm1235_vm9, %v5961_v43 }
 0xff1   :  { %v5550_v13 = vpop.f32.mrb[76].mxu0  ;;  %v5701_v20 = vpop.f32.mrb[82].mxu1 }
 0xff2   :  { %v7430_v2 = vpop.f32.mrb[77].mxu0  ;;  %v7460_v34 = vpop.f32.mrb[83].mxu1 }
 0xffd   :  { %v5622_v44 = vpop.f32.mrb[78].mxu0  ;;  %v5861_v45 = vpop.f32.mrb[84].mxu1 }
 0xffe   :  { %v5623_v58 = vadd.f32 %v5622_v44, %v5550_v13  ;;  %v7445_v62 = vpop.f32.mrb[79].mxu0  ;;  %v7490_v8 = vpop.f32.mrb[85].mxu1 }
0x1000   :  { %v5705_v5 = vadd.f32 %v5701_v20, %v5623_v58 }
0x1009   :  { %v5781_v9 = vpop.f32.mrb[80].mxu0 }
0x100a   :  { %v5785_v6 = vadd.f32 %v5781_v9, %v5705_v5  ;;  %v7475_v21 = vpop.f32.mrb[81].mxu0 }
0x100c   :  { %v5865_v4 = vadd.f32 %v5861_v45, %v5785_v6 }
0x1015   :  { %v5941_v14 = vpop.f32.mrb[82].mxu0 }
0x1016   :  { %v5945_v26 = vadd.f32 %v5941_v14, %v5865_v4  ;;  %v7505_v49 = vpop.f32.mrb[83].mxu0 }
0x1018   :  { %v5947_v27 = vadd.f32 %v5946_v51, %v5945_v26 }
0x101a   :  { %v5948_v63 = vmax.f32 %v5947_v27, 0.0 }
0x101c   :  { %7533 = vmatmul.mubr.msk.f32.vlgmr.msra.gmra.mrb[86].mxu1 %vm3041_vm0, %v5948_v63 }
0x10ef   :  { %v6035_v11 = vpop.f32.mrb[86].mxu1 }
0x10f0   :  { %v6036_v59 = vadd.f32 %v6035_v11, %v5962_v25  ;;  %v7534_v12 = vpop.f32.mrb[87].mxu1 }
0x10f2   :  { %v6039_v42 = vsub.f32 0.0, %v6036_v59 }
0x10f4   :  { %v6040_v53 = vmul.f32 1.442695, %v6039_v42 }
0x10f6   :  { %8781 = vpow2.f32 %v6040_v53 }
0x1100   :  { %v8782_v41 = vpop.eup %8781 }
0x1101   :  { %v6042_v60 = vadd.f32 1.0, %v8782_v41 }
0x1103   :  { %8783 = vrcp.f32 %v6042_v60 }
0x110d   :  { %v8784_v38 = vpop.eup %8783 }
0x110e   :  { %6044 = vst.msk [vmem:[%s12328_s11 + $0x1] sm:$0x1] %vm3123_vm3, %v8784_v38 }

</bundles_post_ra>
